<compile_context>
chip_gen: v6e
topology: v6e:2x2x1
jax: 0.10.0
libtpu: 0.0.40
codegen_flags: <defaults>
</compile_context>

<pallas_src>
import jax
import jax.numpy as jnp
from jax.experimental import pallas as pl
from jax.experimental.pallas import tpu as pltpu


def _vq_kernel(x_ref, e_ref, esq_ref, q_ref, enc_ref, cnt_ref, sq_ref):
    """One (bn * t_hw)-row tile of the vector quantizer.

    x_ref:   (bn, C, t_hw)   NCHW input tile (channels on sublanes)
    e_ref:   (K, D)          codebook (resident across the grid)
    esq_ref: (1, K)          precomputed ||e_k||^2 (resident)
    q_ref:   (bn, C, t_hw)   quantized tile, written back in NCHW layout
    enc_ref: (bn, t_hw, K)   one-hot encodings (row-major flat order)
    cnt_ref: (1, 1, 8, K)    per-tile code-count partial (row 0 holds counts)
    sq_ref:  (1, 1, 8, 128)  per-tile sum((q - x)^2) partial (scalar, broadcast)
    """
    bn, c, t_hw = x_ref.shape
    k = e_ref.shape[0]

    e = e_ref[...]                                                  # (K, D)
    esq = esq_ref[...]                                              # (1, K)

    counts = jnp.zeros((1, k), jnp.float32)
    sqerr = jnp.zeros((), jnp.float32)

    # bn is a small static int -> trace-time unroll; all ops below are plain
    # 2-D VPU/MXU/XLU work on (t_hw, C) / (t_hw, K) tiles.
    for b in range(bn):
        x = x_ref[b].T                                              # (t_hw, C)

        # distances up to the per-row constant ||x||^2 (argmin unchanged)
        xe = jax.lax.dot_general(x, e, (((1,), (1,)), ((), ())),
                                 preferred_element_type=jnp.float32)  # (t_hw, K)
        d = esq - 2.0 * xe                                          # (t_hw, K)

        # first-minimum argmin as a one-hot (matches torch.argmin tie-breaking)
        dmin = jnp.min(d, axis=1, keepdims=True)                    # (t_hw, 1)
        col = jax.lax.broadcasted_iota(jnp.int32, d.shape, 1)       # (t_hw, K)
        idx = jnp.min(jnp.where(d == dmin, col, k), axis=1, keepdims=True)
        onehot = (col == idx).astype(jnp.float32)                   # (t_hw, K)
        enc_ref[b] = onehot

        # quantized rows: one_hot @ E on the MXU, stored back channel-major
        q = jnp.dot(onehot, e, preferred_element_type=jnp.float32)  # (t_hw, D)
        q_ref[b] = q.T                                              # (C, t_hw)

        # global-reduction partials for this tile
        diff = q - x
        sqerr = sqerr + jnp.sum(diff * diff)
        counts = counts + jnp.sum(onehot, axis=0, keepdims=True)    # (1, K)

    # lane-dense partial outputs: row 0 of the (8, K) tile holds the counts,
    # the squared-error scalar is broadcast into its (8, 128) tile.
    row0 = jax.lax.broadcasted_iota(jnp.int32, (8, k), 0) == 0
    cnt_ref[0, 0] = jnp.where(row0, counts, 0.0)
    sq_ref[0, 0] = jnp.zeros((8, 128), jnp.float32) + sqerr


def _pick_spatial_tile(hw, rows_target):
    """Largest multiple of 128 dividing hw (<= rows_target), else the full hw."""
    best = None
    t = 128
    while t <= min(hw, rows_target):
        if hw % t == 0:
            best = t
        t += 128
    return best if best is not None else hw


def vector_quantizer(x_nchw, embedding, commitment_cost, *, rows_target=1024):
    """VectorQuantizer forward. Returns (loss, quantized_nchw, perplexity, encodings)."""
    N, C, H, W = x_nchw.shape
    K, D = embedding.shape
    assert C == D, (C, D)
    HW = H * W
    R = N * HW

    # Free reshapes only (no transposes) on the host side of the kernel.
    x3 = x_nchw.reshape(N, C, HW).astype(jnp.float32)
    e = embedding.astype(jnp.float32)
    esq = jnp.sum(e * e, axis=1)[None, :]                           # (1, K)

    # Spatial tile along H*W (lane axis of the NCHW blocks).
    t_hw = _pick_spatial_tile(HW, rows_target)

    # When one item's whole spatial extent fits in a tile, group several batch
    # items per grid step so each step streams ~rows_target rows.
    bn = 1
    if t_hw == HW and HW < rows_target:
        bn = min(N, max(1, rows_target // HW))
        while N % bn:
            bn -= 1

    NB = N // bn
    TB = HW // t_hw
    grid = (NB, TB)
    # TODO(synk): for huge H*W not divisible by 128 this falls back to one
    # full-extent spatial tile per batch item (correct, just less pipelined).

    q3, enc, cnt_part, sq_part = pl.pallas_call(
        _vq_kernel,
        grid=grid,
        in_specs=[
            pl.BlockSpec((bn, C, t_hw), lambda nb, tb: (nb, 0, tb)),   # x (NCHW)
            pl.BlockSpec((K, D), lambda nb, tb: (0, 0)),               # codebook
            pl.BlockSpec((1, K), lambda nb, tb: (0, 0)),               # ||e||^2
        ],
        out_specs=[
            pl.BlockSpec((bn, C, t_hw), lambda nb, tb: (nb, 0, tb)),   # quantized
            pl.BlockSpec((bn, t_hw, K), lambda nb, tb: (nb, tb, 0)),   # encodings
            pl.BlockSpec((1, 1, 8, K), lambda nb, tb: (nb, tb, 0, 0)),   # counts
            pl.BlockSpec((1, 1, 8, 128), lambda nb, tb: (nb, tb, 0, 0)), # sq err
        ],
        out_shape=[
            jax.ShapeDtypeStruct((N, C, HW), jnp.float32),
            jax.ShapeDtypeStruct((N, HW, K), jnp.float32),
            jax.ShapeDtypeStruct((NB, TB, 8, K), jnp.float32),
            jax.ShapeDtypeStruct((NB, TB, 8, 128), jnp.float32),
        ],
        compiler_params=pltpu.CompilerParams(
            # no cross-step accumulation -> both axes parallel (v7x megacore)
            dimension_semantics=("parallel", "parallel"),
            vmem_limit_bytes=32 * 1024 * 1024,
        ),
    )(x3, e, esq)

    # Tiny finalize on the per-tile partials (negligible vs. the streamed tensors).
    total_sq = jnp.sum(sq_part[:, :, 0, 0])
    mse = total_sq / float(R * D)
    # q_latent_loss + commitment_cost * e_latent_loss (both equal mse in forward)
    loss = (1.0 + float(commitment_cost)) * mse
    counts = jnp.sum(cnt_part, axis=(0, 1, 2))                      # (K,)
    avg_probs = counts / float(R)
    perplexity = jnp.exp(-jnp.sum(avg_probs * jnp.log(avg_probs + 1e-10)))

    quantized = q3.reshape(N, C, H, W)        # free reshape (already NCHW)
    encodings = enc.reshape(R, K)             # free reshape (row-major flat)
    return loss, quantized, perplexity, encodings


def vector_quantizer_ref(x_nchw, embedding, commitment_cost):
    """Pure-JAX reference mirroring the PyTorch module's forward."""
    x = jnp.transpose(x_nchw, (0, 2, 3, 1)).astype(jnp.float32)     # NHWC
    in_shape = x.shape
    flat = x.reshape(-1, embedding.shape[1])
    e = embedding.astype(jnp.float32)
    distances = (jnp.sum(flat ** 2, axis=1, keepdims=True)
                 + jnp.sum(e ** 2, axis=1)
                 - 2.0 * flat @ e.T)
    idx = jnp.argmin(distances, axis=1)
    encodings = jax.nn.one_hot(idx, e.shape[0], dtype=jnp.float32)
    quantized = (encodings @ e).reshape(in_shape)
    e_latent = jnp.mean((quantized - x) ** 2)
    q_latent = jnp.mean((quantized - x) ** 2)
    loss = q_latent + commitment_cost * e_latent
    avg_probs = jnp.mean(encodings, axis=0)
    perplexity = jnp.exp(-jnp.sum(avg_probs * jnp.log(avg_probs + 1e-10)))
    return loss, jnp.transpose(quantized, (0, 3, 1, 2)), perplexity, encodings


def _run_case(seed, N, C, H, W, K, commitment_cost):
    key = jax.random.PRNGKey(seed)
    ke, ki, kn = jax.random.split(key, 3)

    # codebook + inputs clustered near codebook entries -> unambiguous nearest
    # codes (keeps the argmin comparison against the reference tie-free).
    embedding = jax.random.normal(ke, (K, C), jnp.float32)
    true_idx = jax.random.randint(ki, (N * H * W,), 0, K)
    x_flat = embedding[true_idx] + 0.05 * jax.random.normal(
        kn, (N * H * W, C), jnp.float32)
    x = jnp.transpose(x_flat.reshape(N, H, W, C), (0, 3, 1, 2))     # NCHW

    out = jax.block_until_ready(vector_quantizer(x, embedding, commitment_cost))
    ref = jax.block_until_ready(vector_quantizer_ref(x, embedding, commitment_cost))

    loss, quantized, perplexity, encodings = out
    loss_r, quantized_r, perplexity_r, encodings_r = ref

    assert quantized.shape == (N, C, H, W), quantized.shape
    assert encodings.shape == (N * H * W, K), encodings.shape
    assert jnp.array_equal(encodings, encodings_r), "encodings mismatch"
    assert jnp.allclose(quantized, quantized_r, atol=1e-5, rtol=1e-5), \
        f"max abs err = {float(jnp.max(jnp.abs(quantized - quantized_r)))}"
    assert jnp.allclose(loss, loss_r, atol=1e-5, rtol=1e-4), \
        (float(loss), float(loss_r))
    assert jnp.allclose(perplexity, perplexity_r, atol=1e-3, rtol=1e-4), \
        (float(perplexity), float(perplexity_r))


if __name__ == "__main__":
    commitment_cost = 0.25
    # Case A: batch-grouped single tile (bn=2, 512 rows per grid step).
    _run_case(0, N=2, C=128, H=16, W=16, K=128, commitment_cost=commitment_cost)
    # Case B: multi-step grid (bn=1, 1024-row spatial tiles), larger codebook.
    _run_case(0, N=2, C=128, H=32, W=32, K=256, commitment_cost=commitment_cost)
    print("KERNEL_OK")
</pallas_src>

<mosaic_0001>
module attributes {stable_mosaic.version = 11 : i64} {
  func.func @_vq_kernel(%arg0: i32, %arg1: i32, %arg2: memref<2x128x256xf32, #tpu.memory_space<vmem>>, %arg3: memref<128x128xf32, #tpu.memory_space<vmem>>, %arg4: memref<1x128xf32, #tpu.memory_space<vmem>>, %arg5: memref<2x128x256xf32, #tpu.memory_space<vmem>>, %arg6: memref<2x256x128xf32, #tpu.memory_space<vmem>>, %arg7: memref<1x1x8x128xf32, #tpu.memory_space<vmem>>, %arg8: memref<1x1x8x128xf32, #tpu.memory_space<vmem>>) attributes {dimension_semantics = [#tpu.dimension_semantics<parallel>, #tpu.dimension_semantics<parallel>], iteration_bounds = array<i64: 1, 1>, scalar_prefetch = 0 : i64, scratch_operands = 0 : i64, tpu.core_type = #tpu.core_type<tc>, window_params = [{transform_indices = @transform_0, window_bounds = array<i64: 2, 128, 256>}, {pipeline_mode = #tpu.pipeline_mode<synchronous>, transform_indices = @transform_1, window_bounds = array<i64: 128, 128>}, {pipeline_mode = #tpu.pipeline_mode<synchronous>, transform_indices = @transform_2, window_bounds = array<i64: 1, 128>}, {transform_indices = @transform_3, window_bounds = array<i64: 2, 128, 256>}, {transform_indices = @transform_4, window_bounds = array<i64: 2, 256, 128>}, {transform_indices = @transform_5, window_bounds = array<i64: 1, 1, 8, 128>}, {transform_indices = @transform_6, window_bounds = array<i64: 1, 1, 8, 128>}]} {
    %c0 = arith.constant 0 : index
    %c0_0 = arith.constant 0 : index
    %0 = vector.load %arg3[%c0, %c0_0] : memref<128x128xf32, #tpu.memory_space<vmem>>, vector<128x128xf32>
    %c0_1 = arith.constant 0 : index
    %c0_2 = arith.constant 0 : index
    %1 = vector.load %arg4[%c0_1, %c0_2] : memref<1x128xf32, #tpu.memory_space<vmem>>, vector<1x128xf32>
    %cst = arith.constant 0.000000e+00 : f32
    %2 = vector.broadcast %cst : f32 to vector<1x128xf32>
    %c0_3 = arith.constant 0 : index
    %c0_4 = arith.constant 0 : index
    %c0_5 = arith.constant 0 : index
    %3 = vector.load %arg2[%c0_3, %c0_4, %c0_5] : memref<2x128x256xf32, #tpu.memory_space<vmem>>, vector<1x128x256xf32>
    %4 = vector.shape_cast %3 : vector<1x128x256xf32> to vector<128x256xf32>
    %5 = tpu.transpose %4, [1, 0] : vector<128x256xf32> -> vector<256x128xf32>
    %cst_6 = arith.constant dense<0.000000e+00> : vector<256x128xf32>
    %6 = tpu.matmul %5, %0, %cst_6 {dimension_numbers = #tpu.dot_dimension_numbers<[1], [1], [0], [0], [0, 0, 1, 0], [], []>} : vector<256x128xf32>, vector<128x128xf32>, vector<256x128xf32> -> vector<256x128xf32>
    %cst_7 = arith.constant 2.000000e+00 : f32
    %7 = vector.broadcast %cst_7 : f32 to vector<256x128xf32>
    %8 = arith.mulf %7, %6 : vector<256x128xf32>
    %9 = vector.broadcast %1 : vector<1x128xf32> to vector<256x128xf32>
    %10 = arith.subf %9, %8 : vector<256x128xf32>
    %cst_8 = arith.constant dense<0x7F800000> : vector<256xf32>
    %11 = vector.multi_reduction <minimumf>, %10, %cst_8 [1] : vector<256x128xf32> to vector<256xf32>
    %12 = vector.shape_cast %11 : vector<256xf32> to vector<256x1xf32>
    %13 = tpu.iota {dimensions = array<i32: 1>} : vector<256x128xi32>
    %14 = vector.broadcast %12 : vector<256x1xf32> to vector<256x128xf32>
    %15 = arith.cmpf oeq, %10, %14 : vector<256x128xf32>
    %c128_i32 = arith.constant 128 : i32
    %16 = vector.broadcast %c128_i32 : i32 to vector<256x128xi32>
    %17 = arith.select %15, %13, %16 : vector<256x128xi1>, vector<256x128xi32>
    %cst_9 = arith.constant dense<2147483647> : vector<256xi32>
    %18 = vector.multi_reduction <minsi>, %17, %cst_9 [1] : vector<256x128xi32> to vector<256xi32>
    %19 = vector.shape_cast %18 : vector<256xi32> to vector<256x1xi32>
    %20 = vector.broadcast %19 : vector<256x1xi32> to vector<256x128xi32>
    %21 = arith.cmpi eq, %13, %20 : vector<256x128xi32>
    %22 = arith.extui %21 : vector<256x128xi1> to vector<256x128xi32>
    %23 = arith.sitofp %22 : vector<256x128xi32> to vector<256x128xf32>
    %c0_10 = arith.constant 0 : index
    %c0_11 = arith.constant 0 : index
    %c0_12 = arith.constant 0 : index
    %24 = vector.load %arg6[%c0_10, %c0_11, %c0_12] : memref<2x256x128xf32, #tpu.memory_space<vmem>>, vector<1x256x128xf32>
    %25 = vector.shape_cast %24 : vector<1x256x128xf32> to vector<256x128xf32>
    %26 = vector.shape_cast %23 : vector<256x128xf32> to vector<1x256x128xf32>
    tpu.vector_store %arg6[%c0_10, %c0_11, %c0_12], %26 {strides = array<i32>} : memref<2x256x128xf32, #tpu.memory_space<vmem>>, vector<1x256x128xf32>,
    %cst_13 = arith.constant dense<0.000000e+00> : vector<256x128xf32>
    %27 = tpu.matmul %23, %0, %cst_13 {dimension_numbers = #tpu.dot_dimension_numbers<[1], [0], [0], [1], [0, 0, 1, 1], [], []>} : vector<256x128xf32>, vector<128x128xf32>, vector<256x128xf32> -> vector<256x128xf32>
    %28 = tpu.transpose %27, [1, 0] : vector<256x128xf32> -> vector<128x256xf32>
    %c0_14 = arith.constant 0 : index
    %c0_15 = arith.constant 0 : index
    %c0_16 = arith.constant 0 : index
    %29 = vector.load %arg5[%c0_14, %c0_15, %c0_16] : memref<2x128x256xf32, #tpu.memory_space<vmem>>, vector<1x128x256xf32>
    %30 = vector.shape_cast %29 : vector<1x128x256xf32> to vector<128x256xf32>
    %31 = vector.shape_cast %28 : vector<128x256xf32> to vector<1x128x256xf32>
    tpu.vector_store %arg5[%c0_14, %c0_15, %c0_16], %31 {strides = array<i32>} : memref<2x128x256xf32, #tpu.memory_space<vmem>>, vector<1x128x256xf32>,
    %32 = arith.subf %27, %5 : vector<256x128xf32>
    %33 = arith.mulf %32, %32 : vector<256x128xf32>
    %34 = vector.shape_cast %33 : vector<256x128xf32> to vector<1x256x128xf32>
    %cst_17 = arith.constant dense<0.000000e+00> : vector<1xf32>
    %35 = vector.multi_reduction <add>, %34, %cst_17 [1, 2] : vector<1x256x128xf32> to vector<1xf32>
    %36 = vector.shape_cast %35 : vector<1xf32> to vector<1x1x1xf32>
    %37 = vector.extract %36[0, 0, 0] : f32 from vector<1x1x1xf32>
    %cst_18 = arith.constant 0.000000e+00 : f32
    %38 = arith.addf %cst_18, %37 : f32
    %cst_19 = arith.constant dense<0.000000e+00> : vector<128xf32>
    %39 = vector.multi_reduction <add>, %23, %cst_19 [0] : vector<256x128xf32> to vector<128xf32>
    %40 = vector.shape_cast %39 : vector<128xf32> to vector<1x128xf32>
    %41 = arith.addf %2, %40 : vector<1x128xf32>
    %c1 = arith.constant 1 : index
    %c0_20 = arith.constant 0 : index
    %c0_21 = arith.constant 0 : index
    %42 = vector.load %arg2[%c1, %c0_20, %c0_21] : memref<2x128x256xf32, #tpu.memory_space<vmem>>, vector<1x128x256xf32>
    %43 = vector.shape_cast %42 : vector<1x128x256xf32> to vector<128x256xf32>
    %44 = tpu.transpose %43, [1, 0] : vector<128x256xf32> -> vector<256x128xf32>
    %cst_22 = arith.constant dense<0.000000e+00> : vector<256x128xf32>
    %45 = tpu.matmul %44, %0, %cst_22 {dimension_numbers = #tpu.dot_dimension_numbers<[1], [1], [0], [0], [0, 0, 1, 0], [], []>} : vector<256x128xf32>, vector<128x128xf32>, vector<256x128xf32> -> vector<256x128xf32>
    %cst_23 = arith.constant 2.000000e+00 : f32
    %46 = vector.broadcast %cst_23 : f32 to vector<256x128xf32>
    %47 = arith.mulf %46, %45 : vector<256x128xf32>
    %48 = vector.broadcast %1 : vector<1x128xf32> to vector<256x128xf32>
    %49 = arith.subf %48, %47 : vector<256x128xf32>
    %cst_24 = arith.constant dense<0x7F800000> : vector<256xf32>
    %50 = vector.multi_reduction <minimumf>, %49, %cst_24 [1] : vector<256x128xf32> to vector<256xf32>
    %51 = vector.shape_cast %50 : vector<256xf32> to vector<256x1xf32>
    %52 = tpu.iota {dimensions = array<i32: 1>} : vector<256x128xi32>
    %53 = vector.broadcast %51 : vector<256x1xf32> to vector<256x128xf32>
    %54 = arith.cmpf oeq, %49, %53 : vector<256x128xf32>
    %c128_i32_25 = arith.constant 128 : i32
    %55 = vector.broadcast %c128_i32_25 : i32 to vector<256x128xi32>
    %56 = arith.select %54, %52, %55 : vector<256x128xi1>, vector<256x128xi32>
    %cst_26 = arith.constant dense<2147483647> : vector<256xi32>
    %57 = vector.multi_reduction <minsi>, %56, %cst_26 [1] : vector<256x128xi32> to vector<256xi32>
    %58 = vector.shape_cast %57 : vector<256xi32> to vector<256x1xi32>
    %59 = vector.broadcast %58 : vector<256x1xi32> to vector<256x128xi32>
    %60 = arith.cmpi eq, %52, %59 : vector<256x128xi32>
    %61 = arith.extui %60 : vector<256x128xi1> to vector<256x128xi32>
    %62 = arith.sitofp %61 : vector<256x128xi32> to vector<256x128xf32>
    %c1_27 = arith.constant 1 : index
    %c0_28 = arith.constant 0 : index
    %c0_29 = arith.constant 0 : index
    %63 = vector.load %arg6[%c1_27, %c0_28, %c0_29] : memref<2x256x128xf32, #tpu.memory_space<vmem>>, vector<1x256x128xf32>
    %64 = vector.shape_cast %63 : vector<1x256x128xf32> to vector<256x128xf32>
    %65 = vector.shape_cast %62 : vector<256x128xf32> to vector<1x256x128xf32>
    tpu.vector_store %arg6[%c1_27, %c0_28, %c0_29], %65 {strides = array<i32>} : memref<2x256x128xf32, #tpu.memory_space<vmem>>, vector<1x256x128xf32>,
    %cst_30 = arith.constant dense<0.000000e+00> : vector<256x128xf32>
    %66 = tpu.matmul %62, %0, %cst_30 {dimension_numbers = #tpu.dot_dimension_numbers<[1], [0], [0], [1], [0, 0, 1, 1], [], []>} : vector<256x128xf32>, vector<128x128xf32>, vector<256x128xf32> -> vector<256x128xf32>
    %67 = tpu.transpose %66, [1, 0] : vector<256x128xf32> -> vector<128x256xf32>
    %c1_31 = arith.constant 1 : index
    %c0_32 = arith.constant 0 : index
    %c0_33 = arith.constant 0 : index
    %68 = vector.load %arg5[%c1_31, %c0_32, %c0_33] : memref<2x128x256xf32, #tpu.memory_space<vmem>>, vector<1x128x256xf32>
    %69 = vector.shape_cast %68 : vector<1x128x256xf32> to vector<128x256xf32>
    %70 = vector.shape_cast %67 : vector<128x256xf32> to vector<1x128x256xf32>
    tpu.vector_store %arg5[%c1_31, %c0_32, %c0_33], %70 {strides = array<i32>} : memref<2x128x256xf32, #tpu.memory_space<vmem>>, vector<1x128x256xf32>,
    %71 = arith.subf %66, %44 : vector<256x128xf32>
    %72 = arith.mulf %71, %71 : vector<256x128xf32>
    %73 = vector.shape_cast %72 : vector<256x128xf32> to vector<1x256x128xf32>
    %cst_34 = arith.constant dense<0.000000e+00> : vector<1xf32>
    %74 = vector.multi_reduction <add>, %73, %cst_34 [1, 2] : vector<1x256x128xf32> to vector<1xf32>
    %75 = vector.shape_cast %74 : vector<1xf32> to vector<1x1x1xf32>
    %76 = vector.extract %75[0, 0, 0] : f32 from vector<1x1x1xf32>
    %77 = arith.addf %38, %76 : f32
    %cst_35 = arith.constant dense<0.000000e+00> : vector<128xf32>
    %78 = vector.multi_reduction <add>, %62, %cst_35 [0] : vector<256x128xf32> to vector<128xf32>
    %79 = vector.shape_cast %78 : vector<128xf32> to vector<1x128xf32>
    %80 = arith.addf %41, %79 : vector<1x128xf32>
    %81 = tpu.iota {dimensions = array<i32: 0>} : vector<8x128xi32>
    %c0_i32 = arith.constant 0 : i32
    %82 = vector.broadcast %c0_i32 : i32 to vector<8x128xi32>
    %83 = arith.cmpi eq, %81, %82 : vector<8x128xi32>
    %cst_36 = arith.constant 0.000000e+00 : f32
    %84 = vector.shape_cast %80 : vector<1x128xf32> to vector<1x128xf32>
    %85 = vector.broadcast %84 : vector<1x128xf32> to vector<8x128xf32>
    %86 = vector.broadcast %cst_36 : f32 to vector<8x128xf32>
    %87 = arith.select %83, %85, %86 : vector<8x128xi1>, vector<8x128xf32>
    %c0_37 = arith.constant 0 : index
    %c0_38 = arith.constant 0 : index
    %c0_39 = arith.constant 0 : index
    %c0_40 = arith.constant 0 : index
    %88 = vector.load %arg7[%c0_37, %c0_38, %c0_39, %c0_40] : memref<1x1x8x128xf32, #tpu.memory_space<vmem>>, vector<1x1x8x128xf32>
    %89 = vector.shape_cast %88 : vector<1x1x8x128xf32> to vector<8x128xf32>
    %90 = vector.shape_cast %87 : vector<8x128xf32> to vector<1x1x8x128xf32>
    tpu.vector_store %arg7[%c0_37, %c0_38, %c0_39, %c0_40], %90 {strides = array<i32>} : memref<1x1x8x128xf32, #tpu.memory_space<vmem>>, vector<1x1x8x128xf32>,
    %cst_41 = arith.constant 0.000000e+00 : f32
    %91 = vector.broadcast %cst_41 : f32 to vector<8x128xf32>
    %92 = vector.broadcast %77 : f32 to vector<8x128xf32>
    %93 = arith.addf %91, %92 : vector<8x128xf32>
    %c0_42 = arith.constant 0 : index
    %c0_43 = arith.constant 0 : index
    %c0_44 = arith.constant 0 : index
    %c0_45 = arith.constant 0 : index
    %94 = vector.load %arg8[%c0_42, %c0_43, %c0_44, %c0_45] : memref<1x1x8x128xf32, #tpu.memory_space<vmem>>, vector<1x1x8x128xf32>
    %95 = vector.shape_cast %94 : vector<1x1x8x128xf32> to vector<8x128xf32>
    %96 = vector.shape_cast %93 : vector<8x128xf32> to vector<1x1x8x128xf32>
    tpu.vector_store %arg8[%c0_42, %c0_43, %c0_44, %c0_45], %96 {strides = array<i32>} : memref<1x1x8x128xf32, #tpu.memory_space<vmem>>, vector<1x1x8x128xf32>,
    return
  }
  func.func @transform_0(%arg0: i32, %arg1: i32) -> (i32, i32, i32) {
    %c0_i32 = arith.constant 0 : i32
    %c0_i32_0 = arith.constant 0 : i32
    return %arg0, %c0_i32, %arg1 : i32, i32, i32
  }
  func.func @transform_1(%arg0: i32, %arg1: i32) -> (i32, i32) {
    %c0_i32 = arith.constant 0 : i32
    %c0_i32_0 = arith.constant 0 : i32
    %c0_i32_1 = arith.constant 0 : i32
    return %c0_i32, %c0_i32_0 : i32, i32
  }
  func.func @transform_2(%arg0: i32, %arg1: i32) -> (i32, i32) {
    %c0_i32 = arith.constant 0 : i32
    %c0_i32_0 = arith.constant 0 : i32
    %c0_i32_1 = arith.constant 0 : i32
    return %c0_i32, %c0_i32_0 : i32, i32
  }
  func.func @transform_3(%arg0: i32, %arg1: i32) -> (i32, i32, i32) {
    %c0_i32 = arith.constant 0 : i32
    %c0_i32_0 = arith.constant 0 : i32
    return %arg0, %c0_i32, %arg1 : i32, i32, i32
  }
  func.func @transform_4(%arg0: i32, %arg1: i32) -> (i32, i32, i32) {
    %c0_i32 = arith.constant 0 : i32
    %c0_i32_0 = arith.constant 0 : i32
    return %arg0, %arg1, %c0_i32 : i32, i32, i32
  }
  func.func @transform_5(%arg0: i32, %arg1: i32) -> (i32, i32, i32, i32) {
    %c0_i32 = arith.constant 0 : i32
    %c0_i32_0 = arith.constant 0 : i32
    %c0_i32_1 = arith.constant 0 : i32
    return %arg0, %arg1, %c0_i32, %c0_i32_0 : i32, i32, i32, i32
  }
  func.func @transform_6(%arg0: i32, %arg1: i32) -> (i32, i32, i32, i32) {
    %c0_i32 = arith.constant 0 : i32
    %c0_i32_0 = arith.constant 0 : i32
    %c0_i32_1 = arith.constant 0 : i32
    return %arg0, %arg1, %c0_i32, %c0_i32_0 : i32, i32, i32, i32
  }
}

</mosaic_0001>

<bundles_post_ra>
// kernel: tpu_custom_call.1
= control target key start
LH: loop header
LB: loop body
LE: loop exit
PB: predicated region body
PF: predicated region fallthrough
CT: control target
= control target key end

     0   :  { %12 = vsyncpa [#allocation3], 0  ;;  %s6287_s0 = inlined_call_operand.hbm [shape: f32[2,128,256], index: 0, kind: input, shape index: {}]   ;;  %s6288_s1 = inlined_call_operand.hbm [shape: f32[128,128], index: 1, kind: input, shape index: {}]   ;;  %s6289_s2 = inlined_call_operand.vmem [shape: f32[1,128], index: 2, kind: input, shape index: {}]   ;;  %s6290_s3 = inlined_call_operand.hbm [shape: f32[2,128,256], index: 3, kind: output, shape index: {0}]   ;;  %s6291_s4 = inlined_call_operand.hbm [shape: f32[2,256,128], index: 4, kind: output, shape index: {1}]   ;;  %s6292_s5 = inlined_call_operand.hbm [shape: f32[1,1,8,128], index: 5, kind: output, shape index: {2}]   ;;  %s6293_s6 = inlined_call_operand.hbm [shape: f32[1,1,8,128], index: 6, kind: output, shape index: {3}]  }
   0x1   :  { %13 = vsyncpa [#allocation6], 0 }
   0x2   :  { %14 = vsyncpa [#allocation4], 0 }
   0x3   :  { %15 = vsyncpa [#allocation9], 0 }
   0x4   :  { %16 = vsyncpa [#allocation12], 0  ;;  %s4088_s21 = smov [#allocation2]  }
   0x5   :  { %s22_s22 = sshll.u32 %s4088_s21, 4  ;;  %s23_s22 = int_to_ptr.vmem [resolvable:$true] %s22_s22 }
   0x6   :  { %s3966_s23 = scalar_lea.vmem %s23_s22, 8192  ;;  %p3971_p1 = scmp.lt.s32.totalorder %s23_s22, %s23_s22 }
   0x7   :  { %p3967_p0 = scmp.ne.s32.totalorder %s23_s22, %s3966_s23  ;;  %p3972_p2 = scmp.lt.s32.totalorder %s3966_s23, %s3966_s23 }
   0x9   :  { %p3973_p3 = por %p3972_p2, %p3971_p1 }
   0xb   :  { %p3974_p4 = pnand %p3973_p3, %p3967_p0 }
   0xd   :  { %3977 = shalt.err (!%p3974_p4)
}
   0xe   :  { %s4089_s24 = smov 256   ;;  %s4090_s25 = smov 16  }
   0xf   :  { %28 = dma.hbm_to_vmem [thread:$0]  %s6287_s0, 8192, %s23_s22, [#allocation3], %s4089_s24, %s4089_s24, %s4090_s25  }
  0x10   :  { %s4091_s28 = smov [#allocation5]  }
  0x11   :  { %s34_s29 = sshll.u32 %s4091_s28, 4  ;;  %s35_s29 = int_to_ptr.vmem [resolvable:$true] %s34_s29 }
  0x12   :  { %s3986_s30 = scalar_lea.vmem %s35_s29, 2048  ;;  %p3991_p6 = scmp.lt.s32.totalorder %s35_s29, %s35_s29 }
  0x13   :  { %p3987_p5 = scmp.ne.s32.totalorder %s35_s29, %s3986_s30  ;;  %p3992_p7 = scmp.lt.s32.totalorder %s3986_s30, %s3986_s30 }
  0x15   :  { %p3993_p8 = por %p3992_p7, %p3991_p6 }
  0x17   :  { %p3994_p9 = pnand %p3993_p8, %p3987_p5 }
  0x19   :  { %3997 = shalt.err (!%p3994_p9)
}
  0x1a   :  { %s4092_s7 = smov 128   ;;  %s4093_s8 = smov 8  }
  0x1b   :  { %40 = dma.hbm_to_vmem [thread:$0]  %s6288_s1, 2048, %s35_s29, [#allocation6], %s4092_s7, %s4092_s7, %s4093_s8  }
  0x1c   :  { %4078 = dma.done.wait [#allocation3], 8192  }
  0x1d   :  { %4079 = vsyncadd [#allocation3], 4294959104 }
  0x1e   :  { %4080 = dma.done.wait [#allocation6], 2048  }
  0x1f   :  { %4081 = vsyncadd [#allocation6], 4294965248  ;;  %v66_v0 = vld [vmem:[#allocation2] sm:$0xff]  ;;  %v68_v1 = vld [vmem:[#allocation2 + $0x10] sm:$0xff] }
  0x20   :  { %98 = vxpose.xlu0.b32.start [1/16] %v66_v0, 128  ;;  %v67_v2 = vld [vmem:[#allocation2 + $0x8] sm:$0xff]  ;;  %v69_v3 = vld [vmem:[#allocation2 + $0x18] sm:$0xff]  ;;  %v70_v4 = vld [vmem:[#allocation2 + $0x20] sm:$0xff] }
  0x21   :  { %130 = vxpose.xlu1.b32.start [1/16] %v67_v2, 128  ;;  %v71_v5 = vld [vmem:[#allocation2 + $0x28] sm:$0xff]  ;;  %v4147_v6 = vld [vmem:[#allocation5 + $0x78] sm:$0xff]  ;;  %v4150_v7 = vld [vmem:[#allocation5 + $0x70] sm:$0xff] }
  0x22   :  { %3573 = vmatprep.subr.mxu0 %v4147_v6  ;;  %v72_v8 = vld [vmem:[#allocation2 + $0x30] sm:$0xff]  ;;  %3653 = vmatprep.subr.mxu1 %v4147_v6  ;;  %v73_v9 = vld [vmem:[#allocation2 + $0x38] sm:$0xff]  ;;  %v4155_v10 = vld [vmem:[#allocation5 + $0x68] sm:$0xff] }
  0x23   :  { %3574 = vmatpush3.xpose.msra.mxu0 %v4147_v6  ;;  %3654 = vmatpush3.msra.mxu1 %v4147_v6  ;;  %v74_v11 = vld [vmem:[#allocation2 + $0x40] sm:$0xff]  ;;  %v75_v12 = vld [vmem:[#allocation2 + $0x48] sm:$0xff]  ;;  %v76_v14 = vld [vmem:[#allocation2 + $0x50] sm:$0xff] }
  0x24   :  { %99 = vxpose.xlu0.b32.cont [2/16] %v68_v1, 128  ;;  %3575 = vmatprep.subr.mxu0 %v4150_v7  ;;  %v4162_v13 = vld [vmem:[#allocation5 + $0x60] sm:$0xff]  ;;  %v77_v15 = vld [vmem:[#allocation2 + $0x58] sm:$0xff]  ;;  %v4176_v18 = vld [vmem:[#allocation5 + $0x50] sm:$0xff] }
  0x25   :  { %131 = vxpose.xlu1.b32.cont [2/16] %v69_v3, 128  ;;  %3655 = vmatprep.subr.mxu1 %v4150_v7  ;;  %v4169_v16 = vld [vmem:[#allocation5 + $0x58] sm:$0xff]  ;;  %v78_v17 = vld [vmem:[#allocation2 + $0x60] sm:$0xff]  ;;  %v79_v19 = vld [vmem:[#allocation2 + $0x68] sm:$0xff] }
  0x26   :  { %3656 = vmatpush3.msra.mxu1 %v4150_v7  ;;  %v4179_v20 = vld [vmem:[#allocation5 + $0x48] sm:$0xff]  ;;  %v80_v21 = vld [vmem:[#allocation2 + $0x70] sm:$0xff]  ;;  %v81_v22 = vld [vmem:[#allocation2 + $0x78] sm:$0xff] }
  0x27   :  { %3576 = vmatpush3.xpose.msra.mxu0 %v4150_v7  ;;  %3657 = vmatprep.subr.mxu1 %v4155_v10  ;;  %v4185_v23 = vld [vmem:[#allocation5 + $0x40] sm:$0xff]  ;;  %v4192_v25 = vld [vmem:[#allocation5 + $0x38] sm:$0xff]  ;;  %v83_v26 = vld [vmem:[#allocation2 + $0x88] sm:$0xff] }
  0x28   :  { %100 = vxpose.xlu0.b32.cont [3/16] %v70_v4, 128  ;;  %3577 = vmatprep.subr.mxu0 %v4155_v10  ;;  %v82_v24 = vld [vmem:[#allocation2 + $0x80] sm:$0xff]  ;;  %v4195_v27 = vld [vmem:[#allocation5 + $0x30] sm:$0xff]  ;;  %v85_v29 = vld [vmem:[#allocation2 + $0x98] sm:$0xff] }
  0x29   :  { %132 = vxpose.xlu1.b32.cont [3/16] %v71_v5, 128  ;;  %3658 = vmatpush3.msra.mxu1 %v4155_v10  ;;  %v84_v28 = vld [vmem:[#allocation2 + $0x90] sm:$0xff]  ;;  %v4201_v30 = vld [vmem:[#allocation5 + $0x28] sm:$0xff]  ;;  %v86_v31 = vld [vmem:[#allocation2 + $0xa0] sm:$0xff] }
  0x2a   :  { %3659 = vmatprep.subr.mxu1 %v4162_v13  ;;  %v4208_v32 = vld [vmem:[#allocation5 + $0x20] sm:$0xff]  ;;  %v87_v33 = vld [vmem:[#allocation2 + $0xa8] sm:$0xff]  ;;  %v4211_v34 = vld [vmem:[#allocation5 + $0x18] sm:$0xff] }
  0x2b   :  { %3578 = vmatpush3.xpose.msra.mxu0 %v4155_v10  ;;  %3660 = vmatpush3.msra.mxu1 %v4162_v13  ;;  %v88_v35 = vld [vmem:[#allocation2 + $0xb0] sm:$0xff]  ;;  %v89_v36 = vld [vmem:[#allocation2 + $0xb8] sm:$0xff]  ;;  %v90_v38 = vld [vmem:[#allocation2 + $0xc0] sm:$0xff] }
  0x2c   :  { %101 = vxpose.xlu0.b32.cont [4/16] %v72_v8, 128  ;;  %3579 = vmatprep.subr.mxu0 %v4162_v13  ;;  %v4217_v37 = vld [vmem:[#allocation5 + $0x10] sm:$0xff]  ;;  %v4224_v39 = vld [vmem:[#allocation5 + $0x8] sm:$0xff]  ;;  %v4227_v41 = vld [vmem:[#allocation5] sm:$0xff] }
  0x2d   :  { %133 = vxpose.xlu1.b32.cont [4/16] %v73_v9, 128  ;;  %3661 = vmatprep.subr.mxu1 %v4169_v16  ;;  %v91_v40 = vld [vmem:[#allocation2 + $0xc8] sm:$0xff]  ;;  %v92_v42 = vld [vmem:[#allocation2 + $0xd0] sm:$0xff]  ;;  %v93_v43 = vld [vmem:[#allocation2 + $0xd8] sm:$0xff] }
  0x2e   :  { %3662 = vmatpush3.msra.mxu1 %v4169_v16  ;;  %v94_v44 = vld [vmem:[#allocation2 + $0xe0] sm:$0xff]  ;;  %v95_v45 = vld [vmem:[#allocation2 + $0xe8] sm:$0xff]  ;;  %v96_v46 = vld [vmem:[#allocation2 + $0xf0] sm:$0xff] }
  0x2f   :  { %3580 = vmatpush3.xpose.msra.mxu0 %v4162_v13  ;;  %3663 = vmatprep.subr.mxu1 %v4176_v18  ;;  %v97_v47 = vld [vmem:[#allocation2 + $0xf8] sm:$0xff] }
  0x30   :  { %102 = vxpose.xlu0.b32.cont [5/16] %v74_v11, 128  ;;  %3581 = vmatprep.subr.mxu0 %v4169_v16 }
  0x31   :  { %134 = vxpose.xlu1.b32.cont [5/16] %v75_v12, 128  ;;  %3664 = vmatpush3.msra.mxu1 %v4176_v18 }
  0x32   :  { %3665 = vmatprep.subr.mxu1 %v4179_v20 }
  0x33   :  { %3582 = vmatpush3.xpose.msra.mxu0 %v4169_v16  ;;  %3666 = vmatpush3.msra.mxu1 %v4179_v20 }
  0x34   :  { %103 = vxpose.xlu0.b32.cont [6/16] %v76_v14, 128  ;;  %3583 = vmatprep.subr.mxu0 %v4176_v18 }
  0x35   :  { %135 = vxpose.xlu1.b32.cont [6/16] %v77_v15, 128  ;;  %3667 = vmatprep.subr.mxu1 %v4185_v23 }
  0x36   :  { %3668 = vmatpush3.msra.mxu1 %v4185_v23 }
  0x37   :  { %3584 = vmatpush3.xpose.msra.mxu0 %v4176_v18  ;;  %3669 = vmatprep.subr.mxu1 %v4192_v25 }
  0x38   :  { %104 = vxpose.xlu0.b32.cont [7/16] %v78_v17, 128  ;;  %3585 = vmatprep.subr.mxu0 %v4179_v20  ;;  %v4375_v17 = vld [vmem:[%s6289_s2] ss:$0 sm:$0xff] }
  0x39   :  { %136 = vxpose.xlu1.b32.cont [7/16] %v79_v19, 128  ;;  %3670 = vmatpush3.msra.mxu1 %v4192_v25 }
  0x3a   :  { %3671 = vmatprep.subr.mxu1 %v4195_v27 }
  0x3b   :  { %3586 = vmatpush3.xpose.msra.mxu0 %v4179_v20  ;;  %3672 = vmatpush3.msra.mxu1 %v4195_v27 }
  0x3c   :  { %105 = vxpose.xlu0.b32.cont [8/16] %v80_v21, 128  ;;  %3587 = vmatprep.subr.mxu0 %v4185_v23 }
  0x3d   :  { %137 = vxpose.xlu1.b32.cont [8/16] %v81_v22, 128  ;;  %3673 = vmatprep.subr.mxu1 %v4201_v30 }
  0x3e   :  { %3674 = vmatpush3.msra.mxu1 %v4201_v30 }
  0x3f   :  { %3588 = vmatpush3.xpose.msra.mxu0 %v4185_v23  ;;  %3675 = vmatprep.subr.mxu1 %v4208_v32 }
  0x40   :  { %106 = vxpose.xlu0.b32.cont [9/16] %v82_v24, 128  ;;  %3589 = vmatprep.subr.mxu0 %v4192_v25 }
  0x41   :  { %138 = vxpose.xlu1.b32.cont [9/16] %v83_v26, 128  ;;  %3676 = vmatpush3.msra.mxu1 %v4208_v32 }
  0x42   :  { %3677 = vmatprep.subr.mxu1 %v4211_v34 }
  0x43   :  { %3590 = vmatpush3.xpose.msra.mxu0 %v4192_v25  ;;  %3678 = vmatpush3.msra.mxu1 %v4211_v34 }
  0x44   :  { %107 = vxpose.xlu0.b32.cont [10/16] %v84_v28, 128  ;;  %3591 = vmatprep.subr.mxu0 %v4195_v27 }
  0x45   :  { %139 = vxpose.xlu1.b32.cont [10/16] %v85_v29, 128  ;;  %3679 = vmatprep.subr.mxu1 %v4217_v37 }
  0x46   :  { %3680 = vmatpush3.msra.mxu1 %v4217_v37 }
  0x47   :  { %3592 = vmatpush3.xpose.msra.mxu0 %v4195_v27  ;;  %3681 = vmatprep.subr.mxu1 %v4224_v39 }
  0x48   :  { %108 = vxpose.xlu0.b32.cont [11/16] %v86_v31, 128  ;;  %3593 = vmatprep.subr.mxu0 %v4201_v30 }
  0x49   :  { %140 = vxpose.xlu1.b32.cont [11/16] %v87_v33, 128  ;;  %3682 = vmatpush3.msra.mxu1 %v4224_v39 }
  0x4a   :  { %3683 = vmatprep.subr.mxu1 %v4227_v41 }
  0x4b   :  { %3594 = vmatpush3.xpose.msra.mxu0 %v4201_v30  ;;  %3684 = vmatpush3.msra.mxu1 %v4227_v41 }
  0x4c   :  { %109 = vxpose.xlu0.b32.cont [12/16] %v88_v35, 128  ;;  %3595 = vmatprep.subr.mxu0 %v4208_v32 }
  0x4d   :  { %141 = vxpose.xlu1.b32.cont [12/16] %v89_v36, 128  ;;  %3733 = vmatprep.subr.mxu1 %v4147_v6 }
  0x4f   :  { %3596 = vmatpush3.xpose.msra.mxu0 %v4208_v32 }
  0x50   :  { %110 = vxpose.xlu0.b32.cont [13/16] %v90_v38, 128  ;;  %3597 = vmatprep.subr.mxu0 %v4211_v34 }
  0x51   :  { %142 = vxpose.xlu1.b32.cont [13/16] %v91_v40, 128 }
  0x53   :  { %3598 = vmatpush3.xpose.msra.mxu0 %v4211_v34 }
  0x54   :  { %111 = vxpose.xlu0.b32.cont [14/16] %v92_v42, 128  ;;  %3599 = vmatprep.subr.mxu0 %v4217_v37 }
  0x55   :  { %143 = vxpose.xlu1.b32.cont [14/16] %v93_v43, 128 }
  0x57   :  { %3600 = vmatpush3.xpose.msra.mxu0 %v4217_v37 }
  0x58   :  { %112 = vxpose.xlu0.b32.cont [15/16] %v94_v44, 128  ;;  %3601 = vmatprep.subr.mxu0 %v4224_v39 }
  0x59   :  { %144 = vxpose.xlu1.b32.cont [15/16] %v95_v45, 128 }
  0x5b   :  { %3602 = vmatpush3.xpose.msra.mxu0 %v4224_v39 }
  0x5c   :  { %113 = vxpose.xlu0.b32.end [16/16] %v96_v46, 128  ;;  %3603 = vmatprep.subr.mxu0 %v4227_v41 }
  0x5d   :  { %145 = vxpose.xlu1.b32.end [16/16] %v97_v47, 128 }
  0x5f   :  { %3604 = vmatpush3.xpose.msra.mxu0 %v4227_v41 }
  0x60   :  { %3813 = vmatprep.subr.mxu0 %v4147_v6 }
  0x9c   :  { %v4245_v48 = vpop.trf.xlu0 }
  0x9d   :  { %6441 = vst [vmem:[#allocation18_spill] sm:$0xff] %v4245_v48  ;;  %3605 = vmatprep.mubr.f32.mxu0 %v4245_v48  ;;  %v4248_v49 = vpop.trf.xlu1 }
  0x9e   :  { %6442 = vst [vmem:[#allocation19_spill] sm:$0xff] %v4248_v49 }
  0xa0   :  { %v4250_v50 = vpop.trf.xlu0 }
  0xa1   :  { %6443 = vst [vmem:[#allocation20_spill] sm:$0xff] %v4250_v50  ;;  %3606 = vmatmul.mubr.f32.vlgmr.msra.gmra.mxu0 %v4250_v50  ;;  %v4253_v51 = vpop.trf.xlu1 }
  0xa2   :  { %6444 = vst [vmem:[#allocation21_spill] sm:$0xff] %v4253_v51  ;;  %3814 = vmatpush3.msra.mxu0 %v4147_v6 }
  0xa3   :  { %3815 = vmatprep.subr.mxu0 %v4150_v7 }
  0xa4   :  { %v4257_v52 = vpop.trf.xlu0  ;;  %3816 = vmatpush3.msra.mxu0 %v4150_v7 }
  0xa5   :  { %6445 = vst [vmem:[#allocation22_spill] sm:$0xff] %v4257_v52  ;;  %3608 = vmatprep.mubr.f32.mxu0 %v4257_v52  ;;  %3817 = vmatprep.subr.mxu0 %v4155_v10  ;;  %v4266_v54 = vpop.trf.xlu1 }
  0xa6   :  { %3818 = vmatpush3.msra.mxu0 %v4155_v10  ;;  %6447 = vst [vmem:[#allocation24_spill] sm:$0xff] %v4266_v54 }
  0xa7   :  { %3819 = vmatprep.subr.mxu0 %v4162_v13 }
  0xa8   :  { %v4264_v53 = vpop.trf.xlu0  ;;  %3820 = vmatpush3.msra.mxu0 %v4162_v13 }
  0xa9   :  { %6446 = vst [vmem:[#allocation23_spill] sm:$0xff] %v4264_v53  ;;  %3609 = vmatmul.mubr.f32.gmra.mxu0 %v4264_v53  ;;  %3821 = vmatprep.subr.mxu0 %v4169_v16  ;;  %v4278_v56 = vpop.trf.xlu1 }
  0xaa   :  { %3822 = vmatpush3.msra.mxu0 %v4169_v16  ;;  %6449 = vst [vmem:[#allocation26_spill] sm:$0xff] %v4278_v56 }
  0xab   :  { %3823 = vmatprep.subr.mxu0 %v4176_v18 }
  0xac   :  { %v4273_v55 = vpop.trf.xlu0  ;;  %3824 = vmatpush3.msra.mxu0 %v4176_v18 }
  0xad   :  { %6448 = vst [vmem:[#allocation25_spill] sm:$0xff] %v4273_v55  ;;  %3611 = vmatprep.mubr.f32.mxu0 %v4273_v55  ;;  %3825 = vmatprep.subr.mxu0 %v4179_v20  ;;  %v4291_v59 = vpop.trf.xlu1 }
  0xae   :  { %3826 = vmatpush3.msra.mxu0 %v4179_v20  ;;  %6452 = vst [vmem:[#allocation29_spill] sm:$0xff] %v4291_v59 }
  0xaf   :  { %3827 = vmatprep.subr.mxu0 %v4185_v23 }
  0xb0   :  { %v4282_v57 = vpop.trf.xlu0  ;;  %3828 = vmatpush3.msra.mxu0 %v4185_v23 }
  0xb1   :  { %6450 = vst [vmem:[#allocation27_spill] sm:$0xff] %v4282_v57  ;;  %3612 = vmatmul.mubr.f32.gmra.mxu0 %v4282_v57  ;;  %3829 = vmatprep.subr.mxu0 %v4192_v25  ;;  %v4303_v61 = vpop.trf.xlu1 }
  0xb2   :  { %3830 = vmatpush3.msra.mxu0 %v4192_v25  ;;  %6454 = vst [vmem:[#allocation31_spill] sm:$0xff] %v4303_v61 }
  0xb3   :  { %3831 = vmatprep.subr.mxu0 %v4195_v27 }
  0xb4   :  { %v4289_v58 = vpop.trf.xlu0  ;;  %3832 = vmatpush3.msra.mxu0 %v4195_v27 }
  0xb5   :  { %6451 = vst [vmem:[#allocation28_spill] sm:$0xff] %v4289_v58  ;;  %3614 = vmatprep.mubr.f32.mxu0 %v4289_v58  ;;  %3833 = vmatprep.subr.mxu0 %v4201_v30  ;;  %v4316_v0 = vpop.trf.xlu1 }
  0xb6   :  { %3834 = vmatpush3.msra.mxu0 %v4201_v30  ;;  %6457 = vst [vmem:[#allocation34_spill] sm:$0xff] %v4316_v0 }
  0xb7   :  { %3835 = vmatprep.subr.mxu0 %v4208_v32 }
  0xb8   :  { %v4298_v60 = vpop.trf.xlu0  ;;  %3836 = vmatpush3.msra.mxu0 %v4208_v32 }
  0xb9   :  { %6453 = vst [vmem:[#allocation30_spill] sm:$0xff] %v4298_v60  ;;  %3615 = vmatmul.mubr.f32.gmra.mxu0 %v4298_v60  ;;  %3837 = vmatprep.subr.mxu0 %v4211_v34  ;;  %v4323_v2 = vpop.trf.xlu1 }
  0xba   :  { %3838 = vmatpush3.msra.mxu0 %v4211_v34  ;;  %6459 = vst [vmem:[#allocation36_spill] sm:$0xff] %v4323_v2 }
  0xbb   :  { %3839 = vmatprep.subr.mxu0 %v4217_v37 }
  0xbc   :  { %v4307_v62 = vpop.trf.xlu0  ;;  %3840 = vmatpush3.msra.mxu0 %v4217_v37 }
  0xbd   :  { %6455 = vst [vmem:[#allocation32_spill] sm:$0xff] %v4307_v62  ;;  %3617 = vmatprep.mubr.f32.mxu0 %v4307_v62  ;;  %3841 = vmatprep.subr.mxu0 %v4224_v39  ;;  %v4330_v5 = vpop.trf.xlu1 }
  0xbe   :  { %3842 = vmatpush3.msra.mxu0 %v4224_v39  ;;  %6462 = vst [vmem:[#allocation39_spill] sm:$0xff] %v4330_v5 }
  0xbf   :  { %3843 = vmatprep.subr.mxu0 %v4227_v41 }
  0xc0   :  { %v4314_v63 = vpop.trf.xlu0  ;;  %3844 = vmatpush3.msra.mxu0 %v4227_v41 }
  0xc1   :  { %6456 = vst [vmem:[#allocation33_spill] sm:$0xff] %v4314_v63  ;;  %3618 = vmatmul.mubr.f32.gmra.mxu0 %v4314_v63  ;;  %v4336_v7 = vpop.trf.xlu1 }
  0xc2   :  { %6464 = vst [vmem:[#allocation41_spill] sm:$0xff] %v4336_v7 }
  0xc4   :  { %v4320_v1 = vpop.trf.xlu0 }
  0xc5   :  { %6458 = vst [vmem:[#allocation35_spill] sm:$0xff] %v4320_v1  ;;  %3620 = vmatprep.mubr.f32.mxu0 %v4320_v1  ;;  %v4343_v10 = vpop.trf.xlu1 }
  0xc6   :  { %6467 = vst [vmem:[#allocation44_spill] sm:$0xff] %v4343_v10 }
  0xc8   :  { %v4325_v3 = vpop.trf.xlu0 }
  0xc9   :  { %6460 = vst [vmem:[#allocation37_spill] sm:$0xff] %v4325_v3  ;;  %3621 = vmatmul.mubr.f32.gmra.mxu0 %v4325_v3  ;;  %v4349_v11 = vpop.trf.xlu1 }
  0xca   :  { %6468 = vst [vmem:[#allocation45_spill] sm:$0xff] %v4349_v11 }
  0xcc   :  { %v4328_v4 = vpop.trf.xlu0 }
  0xcd   :  { %6461 = vst [vmem:[#allocation38_spill] sm:$0xff] %v4328_v4  ;;  %3623 = vmatprep.mubr.f32.mxu0 %v4328_v4  ;;  %v4353_v12 = vpop.trf.xlu1 }
  0xce   :  { %6469 = vst [vmem:[#allocation46_spill] sm:$0xff] %v4353_v12 }
  0xd0   :  { %v4333_v6 = vpop.trf.xlu0 }
  0xd1   :  { %6463 = vst [vmem:[#allocation40_spill] sm:$0xff] %v4333_v6  ;;  %3624 = vmatmul.mubr.f32.gmra.mxu0 %v4333_v6  ;;  %v4359_v13 = vpop.trf.xlu1 }
  0xd2   :  { %6470 = vst [vmem:[#allocation47_spill] sm:$0xff] %v4359_v13 }
  0xd4   :  { %v4338_v8 = vpop.trf.xlu0 }
  0xd5   :  { %6465 = vst [vmem:[#allocation42_spill] sm:$0xff] %v4338_v8  ;;  %3626 = vmatprep.mubr.f32.mxu0 %v4338_v8  ;;  %v4363_v14 = vpop.trf.xlu1 }
  0xd6   :  { %6471 = vst [vmem:[#allocation48_spill] sm:$0xff] %v4363_v14 }
  0xd8   :  { %v4341_v9 = vpop.trf.xlu0 }
  0xd9   :  { %6466 = vst [vmem:[#allocation43_spill] sm:$0xff] %v4341_v9  ;;  %3627 = vmatmul.mubr.f32.gmra.mxu0 %v4341_v9  ;;  %v4369_v15 = vpop.trf.xlu1 }
  0xda   :  { %3629 = vmatprep.mubr.f32.mxu0 %v4248_v49  ;;  %6472 = vst [vmem:[#allocation49_spill] sm:$0xff] %v4369_v15 }
  0xdd   :  { %3630 = vmatmul.mubr.f32.gmra.mxu0 %v4253_v51 }
  0xde   :  { %3632 = vmatprep.mubr.f32.mxu0 %v4266_v54 }
  0xe1   :  { %3633 = vmatmul.mubr.f32.gmra.mxu0 %v4278_v56 }
  0xe2   :  { %3635 = vmatprep.mubr.f32.mxu0 %v4291_v59 }
  0xe5   :  { %3636 = vmatmul.mubr.f32.gmra.mxu0 %v4303_v61 }
  0xe6   :  { %3638 = vmatprep.mubr.f32.mxu0 %v4316_v0 }
  0xe9   :  { %3639 = vmatmul.mubr.f32.gmra.mxu0 %v4323_v2 }
  0xea   :  { %3641 = vmatprep.mubr.f32.mxu0 %v4330_v5 }
  0xed   :  { %3642 = vmatmul.mubr.f32.gmra.mxu0 %v4336_v7 }
  0xee   :  { %3644 = vmatprep.mubr.f32.mxu0 %v4343_v10 }
  0xf1   :  { %3645 = vmatmul.mubr.f32.gmra.mxu0 %v4349_v11 }
  0xf2   :  { %3647 = vmatprep.mubr.f32.mxu0 %v4353_v12 }
  0xf5   :  { %3648 = vmatmul.mubr.f32.gmra.mxu0 %v4359_v13 }
  0xf6   :  { %3650 = vmatprep.mubr.f32.mxu0 %v4363_v14 }
  0xf9   :  { %3651 = vmatmul.mubr.f32.gmra.mxu0 %v4369_v15 }
 0x161   :  { %v3607_v16 = vpop.f32.mrf.mxu0 }
 0x162   :  { %v388_v18 = vmul.f32 2.0, %v3607_v16 }
 0x163   :  { %v228_v19 = vpop.f32.mrf.mxu0 }
 0x164   :  { %v387_v20 = vmul.f32 2.0, %v228_v19  ;;  %v4378_v21 = vsub.f32 %v4375_v17, %v388_v18 }
 0x166   :  { %459 = vmin.xlane.f32.xlu1 %v4378_v21  ;;  %v4382_v22 = vsub.f32 %v4375_v17, %v387_v20 }
 0x168   :  { %457 = vmin.xlane.f32.xlu0 %v4382_v22 }
 0x169   :  { %v3610_v23 = vpop.f32.mrf.mxu0 }
 0x16a   :  { %v390_v24 = vmul.f32 2.0, %v3610_v23 }
 0x16b   :  { %v238_v25 = vpop.f32.mrf.mxu0 }
 0x16c   :  { %v389_v26 = vmul.f32 2.0, %v238_v25  ;;  %v4386_v27 = vsub.f32 %v4375_v17, %v390_v24 }
 0x16e   :  { %463 = vmin.xlane.f32.xlu1 %v4386_v27  ;;  %v4390_v28 = vsub.f32 %v4375_v17, %v389_v26 }
 0x171   :  { %v3613_v29 = vpop.f32.mrf.mxu0 }
 0x172   :  { %v392_v30 = vmul.f32 2.0, %v3613_v29  ;;  %461 = vmin.xlane.f32.xlu1 %v4390_v28 }
 0x173   :  { %v248_v31 = vpop.f32.mrf.mxu0 }
 0x174   :  { %v391_v32 = vmul.f32 2.0, %v248_v31  ;;  %v4394_v33 = vsub.f32 %v4375_v17, %v392_v30 }
 0x176   :  { %467 = vmin.xlane.f32.xlu1 %v4394_v33  ;;  %v4398_v34 = vsub.f32 %v4375_v17, %v391_v32 }
 0x178   :  { %465 = vmin.xlane.f32.xlu0 %v4398_v34 }
 0x179   :  { %v3616_v35 = vpop.f32.mrf.mxu0 }
 0x17a   :  { %v394_v36 = vmul.f32 2.0, %v3616_v35 }
 0x17b   :  { %v258_v37 = vpop.f32.mrf.mxu0 }
 0x17c   :  { %v393_v38 = vmul.f32 2.0, %v258_v37  ;;  %v4402_v39 = vsub.f32 %v4375_v17, %v394_v36 }
 0x17e   :  { %471 = vmin.xlane.f32.xlu1 %v4402_v39  ;;  %v4406_v40 = vsub.f32 %v4375_v17, %v393_v38 }
 0x180   :  { %469 = vmin.xlane.f32.xlu0 %v4406_v40 }
 0x181   :  { %v3619_v41 = vpop.f32.mrf.mxu0 }
 0x182   :  { %v396_v42 = vmul.f32 2.0, %v3619_v41 }
 0x183   :  { %v268_v43 = vpop.f32.mrf.mxu0 }
 0x184   :  { %v395_v44 = vmul.f32 2.0, %v268_v43  ;;  %v4410_v45 = vsub.f32 %v4375_v17, %v396_v42 }
 0x186   :  { %475 = vmin.xlane.f32.xlu1 %v4410_v45  ;;  %v4414_v46 = vsub.f32 %v4375_v17, %v395_v44 }
 0x188   :  { %473 = vmin.xlane.f32.xlu0 %v4414_v46 }
 0x189   :  { %v3622_v47 = vpop.f32.mrf.mxu0 }
 0x18a   :  { %v398_v16 = vmul.f32 2.0, %v3622_v47 }
 0x18b   :  { %v278_v18 = vpop.f32.mrf.mxu0 }
 0x18c   :  { %v397_v19 = vmul.f32 2.0, %v278_v18  ;;  %v4418_v20 = vsub.f32 %v4375_v17, %v398_v16 }
 0x18e   :  { %479 = vmin.xlane.f32.xlu1 %v4418_v20  ;;  %v4422_v23 = vsub.f32 %v4375_v17, %v397_v19 }
 0x190   :  { %477 = vmin.xlane.f32.xlu0 %v4422_v23 }
 0x191   :  { %v3625_v24 = vpop.f32.mrf.mxu0 }
 0x192   :  { %v400_v25 = vmul.f32 2.0, %v3625_v24 }
 0x193   :  { %v288_v26 = vpop.f32.mrf.mxu0 }
 0x194   :  { %v399_v29 = vmul.f32 2.0, %v288_v26  ;;  %v4426_v30 = vsub.f32 %v4375_v17, %v400_v25 }
 0x196   :  { %483 = vmin.xlane.f32.xlu1 %v4426_v30  ;;  %v4430_v31 = vsub.f32 %v4375_v17, %v399_v29 }
 0x198   :  { %481 = vmin.xlane.f32.xlu0 %v4430_v31 }
 0x199   :  { %v3628_v32 = vpop.f32.mrf.mxu0 }
 0x19a   :  { %v402_v35 = vmul.f32 2.0, %v3628_v32 }
 0x19b   :  { %v298_v36 = vpop.f32.mrf.mxu0 }
 0x19c   :  { %v401_v37 = vmul.f32 2.0, %v298_v36  ;;  %v4434_v38 = vsub.f32 %v4375_v17, %v402_v35 }
 0x19d   :  { %v3631_v41 = vpop.f32.mrf.mxu0 }
 0x19e   :  { %v404_v42 = vmul.f32 2.0, %v3631_v41  ;;  %487 = vmin.xlane.f32.xlu1 %v4434_v38  ;;  %v4438_v43 = vsub.f32 %v4375_v17, %v401_v37 }
 0x19f   :  { %v308_v44 = vpop.f32.mrf.mxu0 }
 0x1a0   :  { %v403_v47 = vmul.f32 2.0, %v308_v44  ;;  %485 = vmin.xlane.f32.xlu0 %v4438_v43  ;;  %v4442_v16 = vsub.f32 %v4375_v17, %v404_v42 }
 0x1a1   :  { %v3634_v18 = vpop.f32.mrf.mxu0 }
 0x1a2   :  { %v406_v19 = vmul.f32 2.0, %v3634_v18  ;;  %491 = vmin.xlane.f32.xlu1 %v4442_v16  ;;  %v4446_v24 = vsub.f32 %v4375_v17, %v403_v47 }
 0x1a3   :  { %v318_v25 = vpop.f32.mrf.mxu0 }
 0x1a4   :  { %v405_v26 = vmul.f32 2.0, %v318_v25  ;;  %489 = vmin.xlane.f32.xlu0 %v4446_v24  ;;  %v4450_v29 = vsub.f32 %v4375_v17, %v406_v19 }
 0x1a5   :  { %v3637_v32 = vpop.f32.mrf.mxu0 }
 0x1a6   :  { %v408_v35 = vmul.f32 2.0, %v3637_v32  ;;  %495 = vmin.xlane.f32.xlu1 %v4450_v29  ;;  %v4454_v36 = vsub.f32 %v4375_v17, %v405_v26 }
 0x1a7   :  { %v328_v37 = vpop.f32.mrf.mxu0 }
 0x1a8   :  { %v407_v41 = vmul.f32 2.0, %v328_v37  ;;  %493 = vmin.xlane.f32.xlu0 %v4454_v36  ;;  %v4458_v42 = vsub.f32 %v4375_v17, %v408_v35 }
 0x1a9   :  { %v3640_v44 = vpop.f32.mrf.mxu0 }
 0x1aa   :  { %v410_v47 = vmul.f32 2.0, %v3640_v44  ;;  %499 = vmin.xlane.f32.xlu1 %v4458_v42  ;;  %v4462_v18 = vsub.f32 %v4375_v17, %v407_v41 }
 0x1ab   :  { %v338_v19 = vpop.f32.mrf.mxu0 }
 0x1ac   :  { %v409_v25 = vmul.f32 2.0, %v338_v19  ;;  %497 = vmin.xlane.f32.xlu0 %v4462_v18  ;;  %v4466_v26 = vsub.f32 %v4375_v17, %v410_v47 }
 0x1ad   :  { %v3643_v32 = vpop.f32.mrf.mxu0 }
 0x1ae   :  { %v412_v37 = vmul.f32 2.0, %v3643_v32  ;;  %503 = vmin.xlane.f32.xlu1 %v4466_v26  ;;  %v4470_v35 = vsub.f32 %v4375_v17, %v409_v25 }
 0x1af   :  { %v348_v44 = vpop.f32.mrf.mxu0 }
 0x1b0   :  { %v411_v15 = vmul.f32 2.0, %v348_v44  ;;  %501 = vmin.xlane.f32.xlu0 %v4470_v35  ;;  %v4474_v41 = vsub.f32 %v4375_v17, %v412_v37 }
 0x1b1   :  { %v3646_v19 = vpop.f32.mrf.mxu0 }
 0x1b2   :  { %v414_v14 = vmul.f32 2.0, %v3646_v19  ;;  %507 = vmin.xlane.f32.xlu1 %v4474_v41  ;;  %v4478_v47 = vsub.f32 %v4375_v17, %v411_v15 }
 0x1b3   :  { %v358_v32 = vpop.f32.mrf.mxu0 }
 0x1b4   :  { %v413_v13 = vmul.f32 2.0, %v358_v32  ;;  %505 = vmin.xlane.f32.xlu0 %v4478_v47  ;;  %v4482_v25 = vsub.f32 %v4375_v17, %v414_v14 }
 0x1b5   :  { %v3649_v44 = vpop.f32.mrf.mxu0 }
 0x1b6   :  { %v416_v12 = vmul.f32 2.0, %v3649_v44  ;;  %511 = vmin.xlane.f32.xlu1 %v4482_v25  ;;  %v4486_v37 = vsub.f32 %v4375_v17, %v413_v13 }
 0x1b7   :  { %v368_v19 = vpop.f32.mrf.mxu0 }
 0x1b8   :  { %v415_v11 = vmul.f32 2.0, %v368_v19  ;;  %509 = vmin.xlane.f32.xlu0 %v4486_v37  ;;  %v4490_v15 = vsub.f32 %v4375_v17, %v416_v12  ;;  %v6303_v12 = vlaneseq }
 0x1b9   :  { %v3652_v32 = vpop.f32.mrf.mxu0 }
 0x1ba   :  { %v418_v10 = vmul.f32 2.0, %v3652_v32  ;;  %515 = vmin.xlane.f32.xlu1 %v4490_v15  ;;  %v4494_v14 = vsub.f32 %v4375_v17, %v415_v11  ;;  %v4506_v32 = vand.u32 127, %v6303_v12 }
 0x1bb   :  { %v378_v44 = vpop.f32.mrf.mxu0 }
 0x1bc   :  { %v417_v7 = vmul.f32 2.0, %v378_v44  ;;  %513 = vmin.xlane.f32.xlu0 %v4494_v14  ;;  %v4498_v13 = vsub.f32 %v4375_v17, %v418_v10  ;;  %6473 = vst [vmem:[#allocation50_spill] sm:$0xff] %v4506_v32 }
 0x1be   :  { %519 = vmin.xlane.f32.xlu1 %v4498_v13  ;;  %v4502_v19 = vsub.f32 %v4375_v17, %v417_v7 }
 0x1c0   :  { %517 = vmin.xlane.f32.xlu0 %v4502_v19 }
 0x1ef   :  { %v460_v11 = vpop.xlane.xlu1 %459 }
 0x1f0   :  { %vm524_vm0 = vcmp.eq.f32.partialorder %v4378_v21, %v460_v11 }
 0x1f1   :  { %v4510_v44 = vsel %vm524_vm0, %v4506_v32, 128  ;;  %v458_v5 = vpop.xlane.xlu0 %457 }
 0x1f2   :  { %vm523_vm1 = vcmp.eq.f32.partialorder %v4382_v22, %v458_v5  ;;  %v602_v10 = vshra.s32 %v4510_v44, 16 }
 0x1f3   :  { %v4515_v7 = vsel %vm523_vm1, %v4506_v32, 128 }
 0x1f4   :  { %v4517_v17 = vcvt.s32.f32 %v602_v10  ;;  %v588_v2 = vshra.s32 %v4515_v7, 16 }
 0x1f6   :  { %605 = vmin.xlane.f32.xlu1 %v4517_v17  ;;  %v4521_v12 = vcvt.s32.f32 %v588_v2 }
 0x1f7   :  { %v464_v21 = vpop.xlane.xlu1 %463 }
 0x1f8   :  { %vm526_vm2 = vcmp.eq.f32.partialorder %v4386_v27, %v464_v21  ;;  %591 = vmin.xlane.f32.xlu0 %v4521_v12 }
 0x1f9   :  { %v4526_v5 = vsel %vm526_vm2, %v4506_v32, 128 }
 0x1fa   :  { %v630_v22 = vshra.s32 %v4526_v5, 16 }
 0x1fb   :  { %v462_v11 = vpop.xlane.xlu1 %461 }
 0x1fc   :  { %vm525_vm3 = vcmp.eq.f32.partialorder %v4390_v28, %v462_v11  ;;  %v4530_v10 = vcvt.s32.f32 %v630_v22 }
 0x1fd   :  { %v4533_v0 = vsel %vm525_vm3, %v4506_v32, 128 }
 0x1fe   :  { %633 = vmin.xlane.f32.xlu1 %v4530_v10  ;;  %v616_v2 = vshra.s32 %v4533_v0, 16 }
 0x1ff   :  { %v468_v27 = vpop.xlane.xlu1 %467 }
 0x200   :  { %vm528_vm4 = vcmp.eq.f32.partialorder %v4394_v33, %v468_v27  ;;  %v4538_v21 = vcvt.s32.f32 %v616_v2 }
 0x201   :  { %v4541_v61 = vsel %vm528_vm4, %v4506_v32, 128  ;;  %v466_v59 = vpop.xlane.xlu0 %465 }
 0x202   :  { %vm527_vm5 = vcmp.eq.f32.partialorder %v4398_v34, %v466_v59  ;;  %619 = vmin.xlane.f32.xlu0 %v4538_v21  ;;  %v658_v28 = vshra.s32 %v4541_v61, 16 }
 0x203   :  { %v4547_v22 = vsel %vm527_vm5, %v4506_v32, 128 }
 0x204   :  { %v4549_v11 = vcvt.s32.f32 %v658_v28  ;;  %v644_v56 = vshra.s32 %v4547_v22, 16 }
 0x206   :  { %661 = vmin.xlane.f32.xlu1 %v4549_v11  ;;  %v4553_v33 = vcvt.s32.f32 %v644_v56 }
 0x207   :  { %v472_v2 = vpop.xlane.xlu1 %471 }
 0x208   :  { %vm530_vm6 = vcmp.eq.f32.partialorder %v4402_v39, %v472_v2  ;;  %647 = vmin.xlane.f32.xlu0 %v4553_v33 }
 0x209   :  { %v4558_v59 = vsel %vm530_vm6, %v4506_v32, 128  ;;  %v470_v34 = vpop.xlane.xlu0 %469 }
 0x20a   :  { %vm529_vm7 = vcmp.eq.f32.partialorder %v4406_v40, %v470_v34  ;;  %v686_v27 = vshra.s32 %v4558_v59, 16 }
 0x20b   :  { %v4563_v28 = vsel %vm529_vm7, %v4506_v32, 128 }
 0x20c   :  { %v4565_v54 = vcvt.s32.f32 %v686_v27  ;;  %v672_v56 = vshra.s32 %v4563_v28, 16 }
 0x20e   :  { %689 = vmin.xlane.f32.xlu1 %v4565_v54  ;;  %v4569_v39 = vcvt.s32.f32 %v672_v56 }
 0x20f   :  { %v476_v2 = vpop.xlane.xlu1 %475 }
 0x210   :  { %vm532_vm8 = vcmp.eq.f32.partialorder %v4410_v45, %v476_v2  ;;  %675 = vmin.xlane.f32.xlu0 %v4569_v39 }
 0x211   :  { %v4574_v40 = vsel %vm532_vm8, %v4506_v32, 128  ;;  %v474_v34 = vpop.xlane.xlu0 %473 }
 0x212   :  { %vm531_vm9 = vcmp.eq.f32.partialorder %v4414_v46, %v474_v34  ;;  %v714_v27 = vshra.s32 %v4574_v40, 16 }
 0x213   :  { %v4579_v51 = vsel %vm531_vm9, %v4506_v32, 128 }
 0x214   :  { %v4581_v49 = vcvt.s32.f32 %v714_v27  ;;  %v700_v56 = vshra.s32 %v4579_v51, 16 }
 0x216   :  { %717 = vmin.xlane.f32.xlu1 %v4581_v49  ;;  %v4585_v45 = vcvt.s32.f32 %v700_v56 }
 0x217   :  { %v480_v2 = vpop.xlane.xlu1 %479 }
 0x218   :  { %vm534_vm10 = vcmp.eq.f32.partialorder %v4418_v20, %v480_v2  ;;  %703 = vmin.xlane.f32.xlu0 %v4585_v45 }
 0x219   :  { %v4590_v46 = vsel %vm534_vm10, %v4506_v32, 128  ;;  %v478_v34 = vpop.xlane.xlu0 %477 }
 0x21a   :  { %vm533_vm11 = vcmp.eq.f32.partialorder %v4422_v23, %v478_v34  ;;  %v742_v27 = vshra.s32 %v4590_v46, 16 }
 0x21b   :  { %v4595_v9 = vsel %vm533_vm11, %v4506_v32, 128 }
 0x21c   :  { %v4597_v8 = vcvt.s32.f32 %v742_v27  ;;  %v728_v56 = vshra.s32 %v4595_v9, 16 }
 0x21e   :  { %745 = vmin.xlane.f32.xlu1 %v4597_v8  ;;  %v4601_v20 = vcvt.s32.f32 %v728_v56 }
 0x21f   :  { %v484_v2 = vpop.xlane.xlu1 %483 }
 0x220   :  { %vm536_vm12 = vcmp.eq.f32.partialorder %v4426_v30, %v484_v2  ;;  %731 = vmin.xlane.f32.xlu0 %v4601_v20 }
 0x221   :  { %v4606_v23 = vsel %vm536_vm12, %v4506_v32, 128  ;;  %v482_v34 = vpop.xlane.xlu0 %481 }
 0x222   :  { %vm535_vm13 = vcmp.eq.f32.partialorder %v4430_v31, %v482_v34  ;;  %v770_v27 = vshra.s32 %v4606_v23, 16 }
 0x223   :  { %v4611_v6 = vsel %vm535_vm13, %v4506_v32, 128 }
 0x224   :  { %v4613_v4 = vcvt.s32.f32 %v770_v27  ;;  %v756_v56 = vshra.s32 %v4611_v6, 16 }
 0x226   :  { %773 = vmin.xlane.f32.xlu1 %v4613_v4  ;;  %v4617_v30 = vcvt.s32.f32 %v756_v56 }
 0x227   :  { %v488_v2 = vpop.xlane.xlu1 %487 }
 0x228   :  { %vm538_vm14 = vcmp.eq.f32.partialorder %v4434_v38, %v488_v2  ;;  %759 = vmin.xlane.f32.xlu0 %v4617_v30 }
 0x229   :  { %v4622_v31 = vsel %vm538_vm14, %v4506_v32, 128  ;;  %v486_v34 = vpop.xlane.xlu0 %485 }
 0x22a   :  { %vm537_vm15 = vcmp.eq.f32.partialorder %v4438_v43, %v486_v34  ;;  %v798_v27 = vshra.s32 %v4622_v31, 16 }
 0x22b   :  { %v4627_v3 = vsel %vm537_vm15, %v4506_v32, 128  ;;  %v492_v1 = vpop.xlane.xlu1 %491 }
 0x22c   :  { %vm540_vm0 = vcmp.eq.f32.partialorder %v4442_v16, %v492_v1  ;;  %v4630_v56 = vcvt.s32.f32 %v798_v27  ;;  %v784_v63 = vshra.s32 %v4627_v3, 16 }
 0x22d   :  { %v4633_v38 = vsel %vm540_vm0, %v4506_v32, 128  ;;  %v490_v2 = vpop.xlane.xlu0 %489 }
 0x22e   :  { %vm539_vm1 = vcmp.eq.f32.partialorder %v4446_v24, %v490_v2  ;;  %801 = vmin.xlane.f32.xlu1 %v4630_v56  ;;  %v826_v43 = vshra.s32 %v4633_v38, 16  ;;  %v4642_v60 = vcvt.s32.f32 %v784_v63 }
 0x22f   :  { %v4640_v34 = vsel %vm539_vm1, %v4506_v32, 128  ;;  %v496_v62 = vpop.xlane.xlu1 %495 }
 0x230   :  { %vm542_vm2 = vcmp.eq.f32.partialorder %v4450_v29, %v496_v62  ;;  %v4645_v1 = vcvt.s32.f32 %v826_v43  ;;  %787 = vmin.xlane.f32.xlu0 %v4642_v60  ;;  %v812_v27 = vshra.s32 %v4640_v34, 16 }
 0x231   :  { %v4648_v16 = vsel %vm542_vm2, %v4506_v32, 128  ;;  %v494_v24 = vpop.xlane.xlu0 %493 }
 0x232   :  { %vm541_vm3 = vcmp.eq.f32.partialorder %v4454_v36, %v494_v24  ;;  %829 = vmin.xlane.f32.xlu1 %v4645_v1  ;;  %v854_v2 = vshra.s32 %v4648_v16, 16  ;;  %v4658_v29 = vcvt.s32.f32 %v812_v27 }
 0x233   :  { %v4656_v63 = vsel %vm541_vm3, %v4506_v32, 128  ;;  %v500_v62 = vpop.xlane.xlu1 %499 }
 0x234   :  { %vm544_vm4 = vcmp.eq.f32.partialorder %v4458_v42, %v500_v62  ;;  %v4661_v43 = vcvt.s32.f32 %v854_v2  ;;  %815 = vmin.xlane.f32.xlu0 %v4658_v29  ;;  %v840_v24 = vshra.s32 %v4656_v63, 16 }
 0x235   :  { %v4664_v58 = vsel %vm544_vm4, %v4506_v32, 128  ;;  %v498_v36 = vpop.xlane.xlu0 %497 }
 0x236   :  { %vm543_vm5 = vcmp.eq.f32.partialorder %v4462_v18, %v498_v36  ;;  %857 = vmin.xlane.f32.xlu1 %v4661_v43  ;;  %v882_v57 = vshra.s32 %v4664_v58, 16  ;;  %v4674_v2 = vcvt.s32.f32 %v840_v24 }
 0x237   :  { %v4672_v27 = vsel %vm543_vm5, %v4506_v32, 128  ;;  %v504_v42 = vpop.xlane.xlu1 %503 }
 0x238   :  { %vm546_vm6 = vcmp.eq.f32.partialorder %v4466_v26, %v504_v42  ;;  %v4677_v62 = vcvt.s32.f32 %v882_v57  ;;  %843 = vmin.xlane.f32.xlu0 %v4674_v2  ;;  %v868_v36 = vshra.s32 %v4672_v27, 16 }
 0x239   :  { %v4680_v55 = vsel %vm546_vm6, %v4506_v32, 128  ;;  %v502_v18 = vpop.xlane.xlu0 %501 }
 0x23a   :  { %vm545_vm7 = vcmp.eq.f32.partialorder %v4470_v35, %v502_v18  ;;  %885 = vmin.xlane.f32.xlu1 %v4677_v62  ;;  %v910_v53 = vshra.s32 %v4680_v55, 16  ;;  %v4690_v57 = vcvt.s32.f32 %v868_v36 }
 0x23b   :  { %v4688_v24 = vsel %vm545_vm7, %v4506_v32, 128  ;;  %v508_v26 = vpop.xlane.xlu1 %507 }
 0x23c   :  { %vm548_vm8 = vcmp.eq.f32.partialorder %v4474_v41, %v508_v26  ;;  %v4693_v42 = vcvt.s32.f32 %v910_v53  ;;  %871 = vmin.xlane.f32.xlu0 %v4690_v57  ;;  %v896_v18 = vshra.s32 %v4688_v24, 16 }
 0x23d   :  { %v4696_v52 = vsel %vm548_vm8, %v4506_v32, 128  ;;  %v506_v35 = vpop.xlane.xlu0 %505 }
 0x23e   :  { %6474 = vst [vmem:[#allocation51_spill] sm:$0xff] %v4693_v42  ;;  %vm547_vm9 = vcmp.eq.f32.partialorder %v4478_v47, %v506_v35  ;;  %913 = vmin.xlane.f32.xlu1 %v4693_v42  ;;  %v938_v50 = vshra.s32 %v4696_v52, 16  ;;  %v4706_v53 = vcvt.s32.f32 %v896_v18 }
 0x23f   :  { %v4704_v36 = vsel %vm547_vm9, %v4506_v32, 128  ;;  %v512_v41 = vpop.xlane.xlu1 %511 }
 0x240   :  { %6475 = vst [vmem:[#allocation52_spill] sm:$0xff] %v4706_v53  ;;  %vm550_vm10 = vcmp.eq.f32.partialorder %v4482_v25, %v512_v41  ;;  %v4709_v26 = vcvt.s32.f32 %v938_v50  ;;  %899 = vmin.xlane.f32.xlu0 %v4706_v53  ;;  %v924_v35 = vshra.s32 %v4704_v36, 16 }
 0x241   :  { %v4712_v48 = vsel %vm550_vm10, %v4506_v32, 128  ;;  %v510_v47 = vpop.xlane.xlu0 %509 }
 0x242   :  { %6476 = vst [vmem:[#allocation53_spill] sm:$0xff] %v4709_v26  ;;  %vm549_vm11 = vcmp.eq.f32.partialorder %v4486_v37, %v510_v47  ;;  %941 = vmin.xlane.f32.xlu1 %v4709_v26  ;;  %v966_v42 = vshra.s32 %v4712_v48, 16  ;;  %v4722_v50 = vcvt.s32.f32 %v924_v35 }
 0x243   :  { %v4720_v18 = vsel %vm549_vm11, %v4506_v32, 128  ;;  %v516_v25 = vpop.xlane.xlu1 %515 }
 0x244   :  { %6477 = vst [vmem:[#allocation54_spill] sm:$0xff] %v4720_v18  ;;  %6478 = vst [vmem:[#allocation55_spill] sm:$0xff] %v4722_v50  ;;  %vm552_vm12 = vcmp.eq.f32.partialorder %v4490_v15, %v516_v25  ;;  %v4725_v41 = vcvt.s32.f32 %v966_v42  ;;  %927 = vmin.xlane.f32.xlu0 %v4722_v50  ;;  %v952_v47 = vshra.s32 %v4720_v18, 16 }
 0x245   :  { %v4728_v53 = vsel %vm552_vm12, %v4506_v32, 128  ;;  %v514_v37 = vpop.xlane.xlu0 %513 }
 0x246   :  { %vm551_vm13 = vcmp.eq.f32.partialorder %v4494_v14, %v514_v37  ;;  %969 = vmin.xlane.f32.xlu1 %v4725_v41  ;;  %v994_v26 = vshra.s32 %v4728_v53, 16  ;;  %v4738_v42 = vcvt.s32.f32 %v952_v47 }
 0x247   :  { %v4736_v35 = vsel %vm551_vm13, %v4506_v32, 128  ;;  %v520_v15 = vpop.xlane.xlu1 %519 }
 0x248   :  { %6479 = vst [vmem:[#allocation56_spill] sm:$0xff] %v4738_v42  ;;  %vm554_vm14 = vcmp.eq.f32.partialorder %v4498_v13, %v520_v15  ;;  %v4741_v25 = vcvt.s32.f32 %v994_v26  ;;  %v980_v50 = vshra.s32 %v4736_v35, 16  ;;  %955 = vmin.xlane.f32.xlu0 %v4738_v42 }
 0x249   :  { %v4745_v18 = vsel %vm554_vm14, %v4506_v32, 128  ;;  %v518_v14 = vpop.xlane.xlu0 %517 }
 0x24a   :  { %6480 = vst [vmem:[#allocation57_spill] sm:$0xff] %v4741_v25  ;;  %vm553_vm15 = vcmp.eq.f32.partialorder %v4502_v19, %v518_v14  ;;  %997 = vmin.xlane.f32.xlu1 %v4741_v25  ;;  %v4750_v37 = vcvt.s32.f32 %v980_v50  ;;  %v1022_v47 = vshra.s32 %v4745_v18, 16  ;;  %v601_v19 = vand.u32 65535, %v4510_v44 }
 0x24b   :  { %v4754_v13 = vsel %vm553_vm15, %v4506_v32, 128  ;;  %v587_v50 = vand.u32 65535, %v4515_v7  ;;  %v615_v7 = vand.u32 65535, %v4533_v0 }
 0x24c   :  { %6481 = vst [vmem:[#allocation58_spill] sm:$0xff] %v4750_v37  ;;  %v4756_v26 = vcvt.s32.f32 %v1022_v47  ;;  %v1008_v15 = vshra.s32 %v4754_v13, 16  ;;  %983 = vmin.xlane.f32.xlu0 %v4750_v37  ;;  %v603_v14 = vcvt.s32.f32 %v601_v19 }
 0x24d   :  { %v589_v37 = vcvt.s32.f32 %v587_v50  ;;  %v657_v50 = vand.u32 65535, %v4541_v61 }
 0x24e   :  { %1025 = vmin.xlane.f32.xlu1 %v4756_v26  ;;  %v4761_v42 = vcvt.s32.f32 %v1008_v15  ;;  %v629_v15 = vand.u32 65535, %v4526_v5 }
 0x24f   :  { %v659_v0 = vcvt.s32.f32 %v657_v50 }
 0x250   :  { %6482 = vst [vmem:[#allocation59_spill] sm:$0xff] %v4761_v42  ;;  %1011 = vmin.xlane.f32.xlu0 %v4761_v42  ;;  %v631_v44 = vcvt.s32.f32 %v629_v15 }
 0x27f   :  { %v4766_v25 = vpop.xlane.xlu1 %605 }
 0x280   :  { %vm607_vm0 = vcmp.eq.f32.partialorder %v4517_v17, %v4766_v25 }
 0x281   :  { %v4770_v47 = vpop.xlane.xlu0 %591  ;;  %v608_v32 = vsel %vm607_vm0, %v603_v14, inf  ;;  %v617_v14 = vcvt.s32.f32 %v615_v7 }
 0x282   :  { %609 = vmin.xlane.f32.xlu1 %v608_v32  ;;  %vm593_vm1 = vcmp.eq.f32.partialorder %v4521_v12, %v4770_v47  ;;  %v643_v12 = vand.u32 65535, %v4547_v22  ;;  %v671_v22 = vand.u32 65535, %v4563_v28  ;;  %v699_v28 = vand.u32 65535, %v4579_v51 }
 0x283   :  { %v594_v42 = vsel %vm593_vm1, %v589_v37, inf  ;;  %v727_v51 = vand.u32 65535, %v4595_v9  ;;  %v755_v9 = vand.u32 65535, %v4611_v6  ;;  %v783_v6 = vand.u32 65535, %v4627_v3 }
 0x284   :  { %595 = vmin.xlane.f32.xlu0 %v594_v42 }
 0x287   :  { %v4776_v19 = vpop.xlane.xlu1 %633 }
 0x288   :  { %vm635_vm2 = vcmp.eq.f32.partialorder %v4530_v10, %v4776_v19  ;;  %v645_v10 = vcvt.s32.f32 %v643_v12 }
 0x289   :  { %v636_v17 = vsel %vm635_vm2, %v631_v44, inf }
 0x28a   :  { %637 = vmin.xlane.f32.xlu1 %v636_v17 }
 0x28b   :  { %v4781_v32 = vpop.xlane.xlu0 %619 }
 0x28c   :  { %vm621_vm3 = vcmp.eq.f32.partialorder %v4538_v21, %v4781_v32  ;;  %v685_v21 = vand.u32 65535, %v4558_v59 }
 0x28d   :  { %v622_v5 = vsel %vm621_vm3, %v617_v14, inf }
 0x28e   :  { %623 = vmin.xlane.f32.xlu0 %v622_v5  ;;  %v687_v44 = vcvt.s32.f32 %v685_v21 }
 0x28f   :  { %v4786_v42 = vpop.xlane.xlu1 %661 }
 0x290   :  { %vm663_vm4 = vcmp.eq.f32.partialorder %v4549_v11, %v4786_v42  ;;  %v673_v11 = vcvt.s32.f32 %v671_v22 }
 0x291   :  { %v4790_v37 = vpop.xlane.xlu0 %647  ;;  %v664_v61 = vsel %vm663_vm4, %v659_v0, inf }
 0x292   :  { %665 = vmin.xlane.f32.xlu1 %v664_v61  ;;  %vm649_vm5 = vcmp.eq.f32.partialorder %v4553_v33, %v4790_v37  ;;  %v713_v33 = vand.u32 65535, %v4574_v40 }
 0x293   :  { %v650_v15 = vsel %vm649_vm5, %v645_v10, inf }
 0x294   :  { %651 = vmin.xlane.f32.xlu0 %v650_v15  ;;  %v715_v14 = vcvt.s32.f32 %v713_v33 }
 0x297   :  { %v4796_v7 = vpop.xlane.xlu1 %689 }
 0x298   :  { %vm691_vm6 = vcmp.eq.f32.partialorder %v4565_v54, %v4796_v7  ;;  %v701_v54 = vcvt.s32.f32 %v699_v28 }
 0x299   :  { %v4800_v17 = vpop.xlane.xlu0 %675  ;;  %v692_v50 = vsel %vm691_vm6, %v687_v44, inf }
 0x29a   :  { %693 = vmin.xlane.f32.xlu1 %v692_v50  ;;  %vm677_vm7 = vcmp.eq.f32.partialorder %v4569_v39, %v4800_v17  ;;  %v741_v39 = vand.u32 65535, %v4590_v46 }
 0x29b   :  { %v678_v59 = vsel %vm677_vm7, %v673_v11, inf }
 0x29c   :  { %679 = vmin.xlane.f32.xlu0 %v678_v59  ;;  %v743_v10 = vcvt.s32.f32 %v741_v39  ;;  %v825_v59 = vand.u32 65535, %v4633_v38 }
 0x29f   :  { %v4806_v12 = vpop.xlane.xlu1 %717 }
 0x2a0   :  { %vm719_vm8 = vcmp.eq.f32.partialorder %v4581_v49, %v4806_v12  ;;  %v729_v49 = vcvt.s32.f32 %v727_v51 }
 0x2a1   :  { %v4810_v5 = vpop.xlane.xlu0 %703  ;;  %v720_v0 = vsel %vm719_vm8, %v715_v14, inf  ;;  %v785_v14 = vcvt.s32.f32 %v783_v6 }
 0x2a2   :  { %721 = vmin.xlane.f32.xlu1 %v720_v0  ;;  %vm705_vm9 = vcmp.eq.f32.partialorder %v4585_v45, %v4810_v5  ;;  %v769_v45 = vand.u32 65535, %v4606_v23 }
 0x2a3   :  { %v706_v40 = vsel %vm705_vm9, %v701_v54, inf  ;;  %v811_v54 = vand.u32 65535, %v4640_v34  ;;  %v839_v34 = vand.u32 65535, %v4656_v63  ;;  %v867_v63 = vand.u32 65535, %v4672_v27 }
 0x2a4   :  { %707 = vmin.xlane.f32.xlu0 %v706_v40  ;;  %v771_v22 = vcvt.s32.f32 %v769_v45  ;;  %v895_v27 = vand.u32 65535, %v4688_v24  ;;  %v923_v24 = vand.u32 65535, %v4704_v36 }
 0x2a5   :  { %v813_v38 = vcvt.s32.f32 %v811_v54 }
 0x2a7   :  { %v4816_v61 = vpop.xlane.xlu1 %745 }
 0x2a8   :  { %vm747_vm10 = vcmp.eq.f32.partialorder %v4597_v8, %v4816_v61  ;;  %v757_v8 = vcvt.s32.f32 %v755_v9  ;;  %v869_v9 = vcvt.s32.f32 %v867_v63  ;;  %v1021_v63 = vand.u32 65535, %v4745_v18  ;;  %v6490_v18 = vld [vmem:[#allocation58_spill] sm:$0xff] }
 0x2a9   :  { %v4820_v21 = vpop.xlane.xlu0 %731  ;;  %v748_v15 = vsel %vm747_vm10, %v743_v10, inf }
 0x2aa   :  { %749 = vmin.xlane.f32.xlu1 %v748_v15  ;;  %vm733_vm11 = vcmp.eq.f32.partialorder %v4601_v20, %v4820_v21  ;;  %v797_v20 = vand.u32 65535, %v4622_v31  ;;  %v853_v31 = vand.u32 65535, %v4648_v16  ;;  %v881_v16 = vand.u32 65535, %v4664_v58 }
 0x2ab   :  { %v734_v46 = vsel %vm733_vm11, %v729_v49, inf  ;;  %v841_v49 = vcvt.s32.f32 %v839_v34  ;;  %v909_v58 = vand.u32 65535, %v4680_v55  ;;  %v937_v55 = vand.u32 65535, %v4696_v52  ;;  %v6487_v34 = vld [vmem:[#allocation55_spill] sm:$0xff] }
 0x2ac   :  { %735 = vmin.xlane.f32.xlu0 %v734_v46  ;;  %v799_v33 = vcvt.s32.f32 %v797_v20  ;;  %v855_v51 = vcvt.s32.f32 %v853_v31  ;;  %v883_v45 = vcvt.s32.f32 %v881_v16  ;;  %v6483_v20 = vld [vmem:[#allocation51_spill] sm:$0xff]  ;;  %v965_v52 = vand.u32 65535, %v4712_v48  ;;  %v6486_v31 = vld [vmem:[#allocation54_spill] sm:$0xff] }
 0x2ad   :  { %v951_v36 = vand.u32 65535, %v6486_v31  ;;  %v993_v48 = vand.u32 65535, %v4728_v53 }
 0x2af   :  { %v4826_v44 = vpop.xlane.xlu1 %773 }
 0x2b0   :  { %vm775_vm12 = vcmp.eq.f32.partialorder %v4613_v4, %v4826_v44 }
 0x2b1   :  { %v4830_v11 = vpop.xlane.xlu0 %759  ;;  %v776_v50 = vsel %vm775_vm12, %v771_v22, inf }
 0x2b2   :  { %777 = vmin.xlane.f32.xlu1 %v776_v50  ;;  %vm761_vm13 = vcmp.eq.f32.partialorder %v4617_v30, %v4830_v11  ;;  %v827_v30 = vcvt.s32.f32 %v825_v59 }
 0x2b3   :  { %v762_v23 = vsel %vm761_vm13, %v757_v8, inf  ;;  %v911_v8 = vcvt.s32.f32 %v909_v58  ;;  %v995_v58 = vcvt.s32.f32 %v993_v48 }
 0x2b4   :  { %763 = vmin.xlane.f32.xlu0 %v762_v23  ;;  %v897_v23 = vcvt.s32.f32 %v895_v27 }
 0x2b7   :  { %v4837_v28 = vpop.xlane.xlu1 %801 }
 0x2b8   :  { %vm803_vm14 = vcmp.eq.f32.partialorder %v4630_v56, %v4837_v28 }
 0x2b9   :  { %v804_v4 = vsel %vm803_vm14, %v799_v33, inf  ;;  %v4842_v0 = vpop.xlane.xlu0 %787  ;;  %v939_v33 = vcvt.s32.f32 %v937_v55  ;;  %v1023_v55 = vcvt.s32.f32 %v1021_v63  ;;  %v1633_v63 = vld [vmem:[#allocation2 + $0x128] sm:$0xff] }
 0x2ba   :  { %805 = vmin.xlane.f32.xlu1 %v804_v4  ;;  %vm789_vm15 = vcmp.eq.f32.partialorder %v4642_v60, %v4842_v0  ;;  %v6484_v4 = vld [vmem:[#allocation52_spill] sm:$0xff] }
 0x2bb   :  { %v4845_v39 = vpop.xlane.xlu1 %829  ;;  %v790_v3 = vsel %vm789_vm15, %v785_v14, inf  ;;  %v6485_v14 = vld [vmem:[#allocation53_spill] sm:$0xff] }
 0x2bc   :  { %vm831_vm0 = vcmp.eq.f32.partialorder %v4645_v1, %v4845_v39  ;;  %791 = vmin.xlane.f32.xlu0 %v790_v3 }
 0x2bd   :  { %v832_v56 = vsel %vm831_vm0, %v827_v30, inf  ;;  %v4852_v40 = vpop.xlane.xlu0 %815  ;;  %v925_v30 = vcvt.s32.f32 %v923_v24 }
 0x2be   :  { %833 = vmin.xlane.f32.xlu1 %v832_v56  ;;  %vm817_vm1 = vcmp.eq.f32.partialorder %v4658_v29, %v4852_v40  ;;  %v967_v56 = vcvt.s32.f32 %v965_v52  ;;  %v612_v52 = vcvt.f32.s32 %v4766_v25  ;;  %v6492_v25 = vld [vmem:[#allocation50_spill] sm:$0xff] }
 0x2bf   :  { %v4855_v10 = vpop.xlane.xlu1 %857  ;;  %v818_v60 = vsel %vm817_vm1, %v813_v38, inf }
 0x2c0   :  { %vm859_vm2 = vcmp.eq.f32.partialorder %v4661_v43, %v4855_v10  ;;  %819 = vmin.xlane.f32.xlu0 %v818_v60  ;;  %v953_v60 = vcvt.s32.f32 %v951_v36 }
 0x2c1   :  { %v860_v1 = vsel %vm859_vm2, %v855_v51, inf  ;;  %v4862_v15 = vpop.xlane.xlu0 %843 }
 0x2c2   :  { %861 = vmin.xlane.f32.xlu1 %v860_v1  ;;  %vm845_vm3 = vcmp.eq.f32.partialorder %v4674_v2, %v4862_v15  ;;  %v979_v1 = vand.u32 65535, %v4736_v35 }
 0x2c3   :  { %v4865_v46 = vpop.xlane.xlu1 %885  ;;  %v846_v29 = vsel %vm845_vm3, %v841_v49, inf }
 0x2c4   :  { %vm887_vm4 = vcmp.eq.f32.partialorder %v4677_v62, %v4865_v46  ;;  %847 = vmin.xlane.f32.xlu0 %v846_v29  ;;  %v981_v27 = vcvt.s32.f32 %v979_v1 }
 0x2c5   :  { %v888_v43 = vsel %vm887_vm4, %v883_v45, inf  ;;  %v4872_v22 = vpop.xlane.xlu0 %871  ;;  %v6488_v45 = vld [vmem:[#allocation56_spill] sm:$0xff] }
 0x2c6   :  { %889 = vmin.xlane.f32.xlu1 %v888_v43  ;;  %vm873_vm5 = vcmp.eq.f32.partialorder %v4690_v57, %v4872_v22  ;;  %v6489_v43 = vld [vmem:[#allocation57_spill] sm:$0xff] }
 0x2c7   :  { %v4875_v50 = vpop.xlane.xlu1 %913  ;;  %v874_v2 = vsel %vm873_vm5, %v869_v9, inf  ;;  %v1007_v9 = vand.u32 65535, %v4754_v13 }
 0x2c8   :  { %vm915_vm6 = vcmp.eq.f32.partialorder %v6483_v20, %v4875_v50  ;;  %875 = vmin.xlane.f32.xlu0 %v874_v2 }
 0x2c9   :  { %v916_v62 = vsel %vm915_vm6, %v911_v8, inf  ;;  %v4882_v6 = vpop.xlane.xlu0 %899  ;;  %v1009_v13 = vcvt.s32.f32 %v1007_v9 }
 0x2ca   :  { %917 = vmin.xlane.f32.xlu1 %v916_v62  ;;  %vm901_vm7 = vcmp.eq.f32.partialorder %v6484_v4, %v4882_v6  ;;  %v598_v4 = vcvt.f32.s32 %v4770_v47  ;;  %v6340_v47 = vmov 0.0  }
 0x2cb   :  { %v4885_v59 = vpop.xlane.xlu1 %941  ;;  %v902_v57 = vsel %vm901_vm7, %v897_v23, inf  ;;  %v6491_v23 = vld [vmem:[#allocation59_spill] sm:$0xff] }
 0x2cc   :  { %vm943_vm8 = vcmp.eq.f32.partialorder %v6485_v14, %v4885_v59  ;;  %903 = vmin.xlane.f32.xlu0 %v902_v57  ;;  %v1629_v57 = vld [vmem:[#allocation2 + $0x108] sm:$0xff]  ;;  %v599_v36 = vshll.u32 %v598_v4, 16  ;;  %v654_v4 = vcvt.f32.s32 %v4790_v37 }
 0x2cd   :  { %v944_v54 = vsel %vm943_vm8, %v939_v33, inf  ;;  %v4892_v3 = vpop.xlane.xlu0 %927  ;;  %v1628_v33 = vld [vmem:[#allocation2 + $0x100] sm:$0xff] }
 0x2ce   :  { %945 = vmin.xlane.f32.xlu1 %v944_v54  ;;  %vm929_vm9 = vcmp.eq.f32.partialorder %v6487_v34, %v4892_v3  ;;  %v613_v54 = vshll.u32 %v612_v52, 16  ;;  %v1631_v34 = vld [vmem:[#allocation2 + $0x118] sm:$0xff]  ;;  %v655_v37 = vshll.u32 %v654_v4, 16 }
 0x2cf   :  { %v4895_v38 = vpop.xlane.xlu1 %969  ;;  %v930_v51 = vsel %vm929_vm9, %v925_v30, inf  ;;  %v1643_v4 = vld [vmem:[#allocation2 + $0x178] sm:$0xff] }
 0x2d0   :  { %vm971_vm10 = vcmp.eq.f32.partialorder %v4725_v41, %v4895_v38  ;;  %931 = vmin.xlane.f32.xlu0 %v930_v51  ;;  %v1632_v51 = vld [vmem:[#allocation2 + $0x120] sm:$0xff] }
 0x2d1   :  { %v972_v16 = vsel %vm971_vm10, %v967_v56, inf  ;;  %v4902_v49 = vpop.xlane.xlu0 %955 }
 0x2d2   :  { %973 = vmin.xlane.f32.xlu1 %v972_v16  ;;  %vm957_vm11 = vcmp.eq.f32.partialorder %v6488_v45, %v4902_v49  ;;  %v640_v16 = vcvt.f32.s32 %v4776_v19  ;;  %v1634_v19 = vld [vmem:[#allocation2 + $0x130] sm:$0xff] }
 0x2d3   :  { %v4905_v53 = vpop.xlane.xlu1 %997  ;;  %v958_v29 = vsel %vm957_vm11, %v953_v60, inf }
 0x2d4   :  { %vm999_vm12 = vcmp.eq.f32.partialorder %v6489_v43, %v4905_v53  ;;  %959 = vmin.xlane.f32.xlu0 %v958_v29  ;;  %v6338_v29 = vmov 1.0   ;;  %v641_v43 = vshll.u32 %v640_v16, 16  ;;  %v1639_v16 = vld [vmem:[#allocation2 + $0x158] sm:$0xff] }
 0x2d5   :  { %v1000_v41 = vsel %vm999_vm12, %v995_v58, inf  ;;  %v4912_v35 = vpop.xlane.xlu0 %983 }
 0x2d6   :  { %1001 = vmin.xlane.f32.xlu1 %v1000_v41  ;;  %vm985_vm13 = vcmp.eq.f32.partialorder %v6490_v18, %v4912_v35  ;;  %v626_v41 = vcvt.f32.s32 %v4781_v32  ;;  %v4938_v18 = vld [vmem:[#allocation5 + $0x78] sm:$0xff] }
 0x2d7   :  { %v4914_v8 = vpop.xlane.xlu1 %1025  ;;  %v986_v2 = vsel %vm985_vm13, %v981_v27, inf }
 0x2d8   :  { %vm1027_vm14 = vcmp.eq.f32.partialorder %v4756_v26, %v4914_v8  ;;  %987 = vmin.xlane.f32.xlu0 %v986_v2  ;;  %v1630_v26 = vld [vmem:[#allocation2 + $0x110] sm:$0xff]  ;;  %v1635_v2 = vld [vmem:[#allocation2 + $0x138] sm:$0xff] }
 0x2d9   :  { %v1028_v20 = vsel %vm1027_vm14, %v1023_v55, inf  ;;  %v4920_v62 = vpop.xlane.xlu0 %1011 }
 0x2da   :  { %1029 = vmin.xlane.f32.xlu1 %v1028_v20  ;;  %vm1013_vm15 = vcmp.eq.f32.partialorder %v6491_v23, %v4920_v62  ;;  %v4941_v20 = vld [vmem:[#allocation5 + $0x70] sm:$0xff]  ;;  %v627_v23 = vshll.u32 %v626_v41, 16 }
 0x2db   :  { %v1014_v24 = vsel %vm1013_vm15, %v1009_v13, inf  ;;  %v1636_v13 = vld [vmem:[#allocation2 + $0x140] sm:$0xff] }
 0x2dc   :  { %1015 = vmin.xlane.f32.xlu0 %v1014_v24  ;;  %v668_v24 = vcvt.f32.s32 %v4786_v42 }
 0x309   :  { %1660 = vxpose.xlu0.b32.start [1/16] %v1628_v33, 128 }
 0x30b   :  { %v610_v14 = vpop.xlane.xlu1 %609 }
 0x30c   :  { %v611_v30 = vcvt.f32.s32 %v610_v14  ;;  %v1637_v14 = vld [vmem:[#allocation2 + $0x148] sm:$0xff] }
 0x30d   :  { %v596_v31 = vpop.xlane.xlu0 %595  ;;  %1692 = vxpose.xlu1.b32.start [1/16] %v1629_v57, 128  ;;  %1661 = vxpose.xlu0.b32.cont [2/16] %v1630_v26, 128  ;;  %v4951_v26 = vld [vmem:[#allocation5 + $0x68] sm:$0xff] }
 0x30e   :  { %v614_v56 = vadd.s32 %v613_v54, %v611_v30  ;;  %v597_v48 = vcvt.f32.s32 %v596_v31  ;;  %v1638_v54 = vld [vmem:[#allocation2 + $0x150] sm:$0xff]  ;;  %v669_v30 = vshll.u32 %v668_v24, 16 }
 0x310   :  { %v600_v60 = vadd.s32 %v599_v36, %v597_v48  ;;  %vm1036_vm0 = vcmp.eq.s32.totalorder %v6492_v25, %v614_v56 }
 0x311   :  { %v3254_v1 = vsel %vm1036_vm0, 1.0, %v6340_v47  ;;  %1693 = vxpose.xlu1.b32.cont [2/16] %v1631_v34, 128  ;;  %1662 = vxpose.xlu0.b32.cont [3/16] %v1632_v51, 128 }
 0x312   :  { %vm1035_vm1 = vcmp.eq.s32.totalorder %v6492_v25, %v600_v60  ;;  %1132 = vst [vmem:[#allocation8 + $0x8] sm:$0xff] %v3254_v1  ;;  %v1640_v60 = vld [vmem:[#allocation2 + $0x160] sm:$0xff] }
 0x313   :  { %v638_v45 = vpop.xlane.xlu1 %637  ;;  %v3253_v58 = vsel %vm1035_vm1, 1.0, %v6340_v47  ;;  %3685 = vmatprep.mubr.msk.f32.mxu1 %vm1035_vm1, %v6338_v29 }
 0x314   :  { %v639_v9 = vcvt.f32.s32 %v638_v45  ;;  %1131 = vst [vmem:[#allocation8] sm:$0xff] %v3253_v58  ;;  %v1589_v27 = vadd.f32 %v3254_v1, %v3253_v58  ;;  %3686 = vmatmul.mubr.msk.f32.vlgmr.msra.gmra.mxu1 %vm1036_vm0, %v6338_v29  ;;  %v696_v1 = vcvt.f32.s32 %v4796_v7  ;;  %v4963_v58 = vld [vmem:[#allocation5 + $0x60] sm:$0xff]  ;;  %v1641_v7 = vld [vmem:[#allocation2 + $0x168] sm:$0xff] }
 0x315   :  { %1694 = vxpose.xlu1.b32.cont [3/16] %v1633_v63, 128  ;;  %3734 = vmatpush3.xpose.msra.mxu1 %v4938_v18 }
 0x316   :  { %v642_v55 = vadd.s32 %v641_v43, %v639_v9  ;;  %1663 = vxpose.xlu0.b32.cont [4/16] %v1634_v19, 128  ;;  %3735 = vmatprep.subr.mxu1 %v4941_v20  ;;  %v682_v43 = vcvt.f32.s32 %v4800_v17  ;;  %v4977_v17 = vld [vmem:[#allocation5 + $0x58] sm:$0xff] }
 0x317   :  { %v624_v32 = vpop.xlane.xlu0 %623 }
 0x318   :  { %v625_v33 = vcvt.f32.s32 %v624_v32  ;;  %vm1038_vm2 = vcmp.eq.s32.totalorder %v6492_v25, %v642_v55  ;;  %v697_v55 = vshll.u32 %v696_v1, 16 }
 0x319   :  { %v3256_v52 = vsel %vm1038_vm2, 1.0, %v6340_v47  ;;  %1695 = vxpose.xlu1.b32.cont [4/16] %v1635_v2, 128  ;;  %3736 = vmatpush3.xpose.msra.mxu1 %v4941_v20 }
 0x31a   :  { %v628_v57 = vadd.s32 %v627_v23, %v625_v33  ;;  %1664 = vxpose.xlu0.b32.cont [5/16] %v1636_v13, 128  ;;  %1134 = vst [vmem:[#allocation8 + $0x18] sm:$0xff] %v3256_v52  ;;  %3737 = vmatprep.subr.mxu1 %v4951_v26  ;;  %v683_v23 = vshll.u32 %v682_v43, 16  ;;  %v1648_v43 = vld [vmem:[#allocation2 + $0x1a0] sm:$0xff] }
 0x31b   :  { %v666_v42 = vpop.xlane.xlu1 %665 }
 0x31c   :  { %v667_v31 = vcvt.f32.s32 %v666_v42  ;;  %vm1037_vm3 = vcmp.eq.s32.totalorder %v6492_v25, %v628_v57  ;;  %v1644_v57 = vld [vmem:[#allocation2 + $0x180] sm:$0xff] }
 0x31d   :  { %v3255_v36 = vsel %vm1037_vm3, 1.0, %v6340_v47  ;;  %3688 = vmatprep.mubr.msk.f32.mxu1 %vm1037_vm3, %v6338_v29  ;;  %v652_v56 = vpop.xlane.xlu0 %651  ;;  %1696 = vxpose.xlu1.b32.cont [5/16] %v1637_v14, 128  ;;  %v724_v14 = vcvt.f32.s32 %v4806_v12 }
 0x31e   :  { %v670_v48 = vadd.s32 %v669_v30, %v667_v31  ;;  %1665 = vxpose.xlu0.b32.cont [6/16] %v1638_v54, 128  ;;  %1133 = vst [vmem:[#allocation8 + $0x10] sm:$0xff] %v3255_v36  ;;  %v1590_v34 = vadd.f32 %v3255_v36, %v1589_v27  ;;  %v653_v51 = vcvt.f32.s32 %v652_v56  ;;  %3689 = vmatmul.mubr.msk.f32.gmra.mxu1 %vm1038_vm2, %v6338_v29  ;;  %v1642_v27 = vld [vmem:[#allocation2 + $0x170] sm:$0xff]  ;;  %v710_v31 = vcvt.f32.s32 %v4810_v5  ;;  %v1645_v36 = vld [vmem:[#allocation2 + $0x188] sm:$0xff] }
 0x31f   :  { %3738 = vmatpush3.xpose.msra.mxu1 %v4951_v26  ;;  %v4983_v54 = vld [vmem:[#allocation5 + $0x50] sm:$0xff]  ;;  %v4997_v5 = vld [vmem:[#allocation5 + $0x48] sm:$0xff] }
 0x320   :  { %v656_v63 = vadd.s32 %v655_v37, %v653_v51  ;;  %v1591_v45 = vadd.f32 %v3256_v52, %v1590_v34  ;;  %vm1040_vm4 = vcmp.eq.s32.totalorder %v6492_v25, %v670_v48  ;;  %3739 = vmatprep.subr.mxu1 %v4963_v58  ;;  %v1646_v37 = vld [vmem:[#allocation2 + $0x190] sm:$0xff]  ;;  %v725_v48 = vshll.u32 %v724_v14, 16 }
 0x321   :  { %v3258_v19 = vsel %vm1040_vm4, 1.0, %v6340_v47  ;;  %1697 = vxpose.xlu1.b32.cont [6/16] %v1639_v16, 128 }
 0x322   :  { %1666 = vxpose.xlu0.b32.cont [7/16] %v1640_v60, 128  ;;  %vm1039_vm5 = vcmp.eq.s32.totalorder %v6492_v25, %v656_v63  ;;  %1136 = vst [vmem:[#allocation8 + $0x28] sm:$0xff] %v3258_v19  ;;  %v711_v60 = vshll.u32 %v710_v31, 16  ;;  %v1652_v31 = vld [vmem:[#allocation2 + $0x1c0] sm:$0xff] }
 0x323   :  { %v694_v41 = vpop.xlane.xlu1 %693  ;;  %v3257_v9 = vsel %vm1039_vm5, 1.0, %v6340_v47  ;;  %3691 = vmatprep.mubr.msk.f32.mxu1 %vm1039_vm5, %v6338_v29  ;;  %3740 = vmatpush3.xpose.msra.mxu1 %v4963_v58 }
 0x324   :  { %v695_v2 = vcvt.f32.s32 %v694_v41  ;;  %1135 = vst [vmem:[#allocation8 + $0x20] sm:$0xff] %v3257_v9  ;;  %v1592_v32 = vadd.f32 %v3257_v9, %v1591_v45  ;;  %3692 = vmatmul.mubr.msk.f32.gmra.mxu1 %vm1040_vm4, %v6338_v29  ;;  %3741 = vmatprep.subr.mxu1 %v4977_v17  ;;  %v5003_v9 = vld [vmem:[#allocation5 + $0x40] sm:$0xff] }
 0x325   :  { %v680_v13 = vpop.xlane.xlu0 %679  ;;  %1698 = vxpose.xlu1.b32.cont [7/16] %v1641_v7, 128  ;;  %v752_v7 = vcvt.f32.s32 %v4816_v61 }
 0x326   :  { %v698_v24 = vadd.s32 %v697_v55, %v695_v2  ;;  %v1593_v33 = vadd.f32 %v3258_v19, %v1592_v32  ;;  %1667 = vxpose.xlu0.b32.cont [8/16] %v1642_v27, 128  ;;  %v681_v52 = vcvt.f32.s32 %v680_v13  ;;  %v1647_v19 = vld [vmem:[#allocation2 + $0x198] sm:$0xff]  ;;  %v738_v55 = vcvt.f32.s32 %v4820_v21  ;;  %v1649_v2 = vld [vmem:[#allocation2 + $0x1a8] sm:$0xff]  ;;  %v1650_v13 = vld [vmem:[#allocation2 + $0x1b0] sm:$0xff] }
 0x327   :  { %3742 = vmatpush3.xpose.msra.mxu1 %v4977_v17  ;;  %v5017_v21 = vld [vmem:[#allocation5 + $0x38] sm:$0xff] }
 0x328   :  { %v684_v42 = vadd.s32 %v683_v23, %v681_v52  ;;  %vm1042_vm6 = vcmp.eq.s32.totalorder %v6492_v25, %v698_v24  ;;  %3743 = vmatprep.subr.mxu1 %v4983_v54  ;;  %v753_v23 = vshll.u32 %v752_v7, 16 }
 0x329   :  { %v3260_v30 = vsel %vm1042_vm6, 1.0, %v6340_v47  ;;  %1699 = vxpose.xlu1.b32.cont [8/16] %v1643_v4, 128  ;;  %v739_v4 = vshll.u32 %v738_v55, 16  ;;  %v1656_v55 = vld [vmem:[#allocation2 + $0x1e0] sm:$0xff] }
 0x32a   :  { %1668 = vxpose.xlu0.b32.cont [9/16] %v1644_v57, 128  ;;  %vm1041_vm7 = vcmp.eq.s32.totalorder %v6492_v25, %v684_v42  ;;  %1138 = vst [vmem:[#allocation8 + $0x38] sm:$0xff] %v3260_v30 }
 0x32b   :  { %v722_v12 = vpop.xlane.xlu1 %721  ;;  %v3259_v56 = vsel %vm1041_vm7, 1.0, %v6340_v47  ;;  %3694 = vmatprep.mubr.msk.f32.mxu1 %vm1041_vm7, %v6338_v29  ;;  %3744 = vmatpush3.xpose.msra.mxu1 %v4983_v54 }
 0x32c   :  { %v723_v34 = vcvt.f32.s32 %v722_v12  ;;  %1137 = vst [vmem:[#allocation8 + $0x30] sm:$0xff] %v3259_v56  ;;  %v1594_v51 = vadd.f32 %v3259_v56, %v1593_v33  ;;  %3695 = vmatmul.mubr.msk.f32.gmra.mxu1 %vm1042_vm6, %v6338_v29  ;;  %3745 = vmatprep.subr.mxu1 %v4997_v5  ;;  %v5023_v56 = vld [vmem:[#allocation5 + $0x30] sm:$0xff] }
 0x32d   :  { %v708_v16 = vpop.xlane.xlu0 %707  ;;  %1700 = vxpose.xlu1.b32.cont [9/16] %v1645_v36, 128  ;;  %v780_v36 = vcvt.f32.s32 %v4826_v44 }
 0x32e   :  { %v726_v1 = vadd.s32 %v725_v48, %v723_v34  ;;  %v1595_v63 = vadd.f32 %v3260_v30, %v1594_v51  ;;  %1669 = vxpose.xlu0.b32.cont [10/16] %v1646_v37, 128  ;;  %v709_v45 = vcvt.f32.s32 %v708_v16  ;;  %v1651_v30 = vld [vmem:[#allocation2 + $0x1b8] sm:$0xff]  ;;  %v766_v48 = vcvt.f32.s32 %v4830_v11  ;;  %v1653_v34 = vld [vmem:[#allocation2 + $0x1c8] sm:$0xff]  ;;  %v1654_v16 = vld [vmem:[#allocation2 + $0x1d0] sm:$0xff] }
 0x32f   :  { %3746 = vmatpush3.xpose.msra.mxu1 %v4997_v5  ;;  %v5037_v11 = vld [vmem:[#allocation5 + $0x28] sm:$0xff] }
 0x330   :  { %v712_v41 = vadd.s32 %v711_v60, %v709_v45  ;;  %vm1044_vm8 = vcmp.eq.s32.totalorder %v6492_v25, %v726_v1  ;;  %3747 = vmatprep.subr.mxu1 %v5003_v9  ;;  %v781_v60 = vshll.u32 %v780_v36, 16 }
 0x331   :  { %v3262_v27 = vsel %vm1044_vm8, 1.0, %v6340_v47  ;;  %1701 = vxpose.xlu1.b32.cont [10/16] %v1647_v19, 128  ;;  %v767_v19 = vshll.u32 %v766_v48, 16 }
 0x332   :  { %1670 = vxpose.xlu0.b32.cont [11/16] %v1648_v43, 128  ;;  %vm1043_vm9 = vcmp.eq.s32.totalorder %v6492_v25, %v712_v41  ;;  %1140 = vst [vmem:[#allocation8 + $0x48] sm:$0xff] %v3262_v27 }
 0x333   :  { %v750_v61 = vpop.xlane.xlu1 %749  ;;  %v3261_v32 = vsel %vm1043_vm9, 1.0, %v6340_v47  ;;  %3697 = vmatprep.mubr.msk.f32.mxu1 %vm1043_vm9, %v6338_v29  ;;  %3748 = vmatpush3.xpose.msra.mxu1 %v5003_v9 }
 0x334   :  { %v751_v24 = vcvt.f32.s32 %v750_v61  ;;  %1139 = vst [vmem:[#allocation8 + $0x40] sm:$0xff] %v3261_v32  ;;  %v1596_v33 = vadd.f32 %v3261_v32, %v1595_v63  ;;  %3698 = vmatmul.mubr.msk.f32.gmra.mxu1 %vm1044_vm8, %v6338_v29  ;;  %3749 = vmatprep.subr.mxu1 %v5017_v21  ;;  %v5043_v32 = vld [vmem:[#allocation5 + $0x20] sm:$0xff] }
 0x335   :  { %v736_v52 = vpop.xlane.xlu0 %735  ;;  %1702 = vxpose.xlu1.b32.cont [11/16] %v1649_v2, 128  ;;  %v808_v2 = vcvt.f32.s32 %v4837_v28 }
 0x336   :  { %v754_v57 = vadd.s32 %v753_v23, %v751_v24  ;;  %v1597_v14 = vadd.f32 %v3262_v27, %v1596_v33  ;;  %1671 = vxpose.xlu0.b32.cont [12/16] %v1650_v13, 128  ;;  %v737_v42 = vcvt.f32.s32 %v736_v52  ;;  %v1655_v27 = vld [vmem:[#allocation2 + $0x1d8] sm:$0xff]  ;;  %v1657_v23 = vld [vmem:[#allocation2 + $0x1e8] sm:$0xff]  ;;  %v794_v24 = vcvt.f32.s32 %v4842_v0  ;;  %v1658_v52 = vld [vmem:[#allocation2 + $0x1f0] sm:$0xff] }
 0x337   :  { %3750 = vmatpush3.xpose.msra.mxu1 %v5017_v21 }
 0x338   :  { %v740_v12 = vadd.s32 %v739_v4, %v737_v42  ;;  %vm1046_vm10 = vcmp.eq.s32.totalorder %v6492_v25, %v754_v57  ;;  %3751 = vmatprep.subr.mxu1 %v5023_v56  ;;  %v809_v4 = vshll.u32 %v808_v2, 16  ;;  %v836_v57 = vcvt.f32.s32 %v4845_v39 }
 0x339   :  { %v3264_v37 = vsel %vm1046_vm10, 1.0, %v6340_v47  ;;  %1703 = vxpose.xlu1.b32.cont [12/16] %v1651_v30, 128  ;;  %v5058_v30 = vld [vmem:[#allocation5 + $0x18] sm:$0xff]  ;;  %v822_v39 = vcvt.f32.s32 %v4852_v40  ;;  %v850_v40 = vcvt.f32.s32 %v4862_v15  ;;  %v5078_v15 = vld [vmem:[#allocation5 + $0x8] sm:$0xff] }
 0x33a   :  { %1672 = vxpose.xlu0.b32.cont [13/16] %v1652_v31, 128  ;;  %vm1045_vm11 = vcmp.eq.s32.totalorder %v6492_v25, %v740_v12  ;;  %1142 = vst [vmem:[#allocation8 + $0x58] sm:$0xff] %v3264_v37  ;;  %v1659_v12 = vld [vmem:[#allocation2 + $0x1f8] sm:$0xff] }
 0x33b   :  { %v778_v44 = vpop.xlane.xlu1 %777  ;;  %v3263_v51 = vsel %vm1045_vm11, 1.0, %v6340_v47  ;;  %3700 = vmatprep.mubr.msk.f32.mxu1 %vm1045_vm11, %v6338_v29  ;;  %3752 = vmatpush3.xpose.msra.mxu1 %v5023_v56 }
 0x33c   :  { %v779_v1 = vcvt.f32.s32 %v778_v44  ;;  %1141 = vst [vmem:[#allocation8 + $0x50] sm:$0xff] %v3263_v51  ;;  %v1598_v63 = vadd.f32 %v3263_v51, %v1597_v14  ;;  %3701 = vmatmul.mubr.msk.f32.gmra.mxu1 %vm1046_vm10, %v6338_v29  ;;  %3753 = vmatprep.subr.mxu1 %v5037_v11  ;;  %v837_v44 = vshll.u32 %v836_v57, 16  ;;  %v864_v51 = vcvt.f32.s32 %v4855_v10 }
 0x33d   :  { %v764_v45 = vpop.xlane.xlu0 %763  ;;  %1704 = vxpose.xlu1.b32.cont [13/16] %v1653_v34, 128  ;;  %v892_v10 = vcvt.f32.s32 %v4865_v46 }
 0x33e   :  { %v782_v43 = vadd.s32 %v781_v60, %v779_v1  ;;  %v1599_v7 = vadd.f32 %v3264_v37, %v1598_v63  ;;  %1673 = vxpose.xlu0.b32.cont [14/16] %v1654_v16, 128  ;;  %v765_v41 = vcvt.f32.s32 %v764_v45  ;;  %v795_v37 = vshll.u32 %v794_v24, 16  ;;  %v5065_v60 = vld [vmem:[#allocation5 + $0x10] sm:$0xff] }
 0x33f   :  { %3754 = vmatpush3.xpose.msra.mxu1 %v5037_v11  ;;  %v878_v24 = vcvt.f32.s32 %v4872_v22  ;;  %v5094_v22 = vld [vmem:[#allocation5] sm:$0xff] }
 0x340   :  { %v768_v61 = vadd.s32 %v767_v19, %v765_v41  ;;  %vm1048_vm12 = vcmp.eq.s32.totalorder %v6492_v25, %v782_v43  ;;  %3755 = vmatprep.subr.mxu1 %v5043_v32  ;;  %v823_v43 = vshll.u32 %v822_v39, 16  ;;  %v906_v39 = vcvt.f32.s32 %v4882_v6 }
 0x341   :  { %v3266_v13 = vsel %vm1048_vm12, 1.0, %v6340_v47  ;;  %1705 = vxpose.xlu1.b32.cont [14/16] %v1655_v27, 128  ;;  %v865_v27 = vshll.u32 %v864_v51, 16 }
 0x342   :  { %1674 = vxpose.xlu0.b32.cont [15/16] %v1656_v55, 128  ;;  %vm1047_vm13 = vcmp.eq.s32.totalorder %v6492_v25, %v768_v61  ;;  %1144 = vst [vmem:[#allocation8 + $0x68] sm:$0xff] %v3266_v13 }
 0x343   :  { %v806_v28 = vpop.xlane.xlu1 %805  ;;  %v3265_v33 = vsel %vm1047_vm13, 1.0, %v6340_v47  ;;  %3703 = vmatprep.mubr.msk.f32.mxu1 %vm1047_vm13, %v6338_v29  ;;  %3756 = vmatpush3.xpose.msra.mxu1 %v5043_v32 }
 0x344   :  { %v807_v14 = vcvt.f32.s32 %v806_v28  ;;  %1143 = vst [vmem:[#allocation8 + $0x60] sm:$0xff] %v3265_v33  ;;  %v1600_v42 = vadd.f32 %v3265_v33, %v1599_v7  ;;  %3704 = vmatmul.mubr.msk.f32.gmra.mxu1 %vm1048_vm12, %v6338_v29  ;;  %3757 = vmatprep.subr.mxu1 %v5058_v30 }
 0x345   :  { %1706 = vxpose.xlu1.b32.cont [15/16] %v1657_v23, 128  ;;  %v792_v36 = vpop.xlane.xlu0 %791  ;;  %v851_v23 = vshll.u32 %v850_v40, 16 }
 0x346   :  { %v810_v0 = vadd.s32 %v809_v4, %v807_v14  ;;  %v1601_v31 = vadd.f32 %v3266_v13, %v1600_v42  ;;  %1675 = vxpose.xlu0.b32.end [16/16] %v1658_v52, 128  ;;  %v793_v48 = vcvt.f32.s32 %v792_v36  ;;  %v893_v52 = vshll.u32 %v892_v10, 16 }
 0x347   :  { %v834_v34 = vpop.xlane.xlu1 %833  ;;  %3758 = vmatpush3.xpose.msra.mxu1 %v5058_v30  ;;  %v920_v42 = vcvt.f32.s32 %v4875_v50  ;;  %v934_v10 = vcvt.f32.s32 %v4892_v3 }
 0x348   :  { %v835_v16 = vcvt.f32.s32 %v834_v34  ;;  %vm1050_vm14 = vcmp.eq.s32.totalorder %v6492_v25, %v810_v0  ;;  %3759 = vmatprep.subr.mxu1 %v5065_v60  ;;  %v796_v1 = vadd.s32 %v795_v37, %v793_v48  ;;  %v879_v37 = vshll.u32 %v878_v24, 16 }
 0x349   :  { %v3268_v63 = vsel %vm1050_vm14, 1.0, %v6340_v47  ;;  %1707 = vxpose.xlu1.b32.end [16/16] %v1659_v12, 128  ;;  %v820_v19 = vpop.xlane.xlu0 %819 }
 0x34a   :  { %v838_v45 = vadd.s32 %v837_v44, %v835_v16  ;;  %1146 = vst [vmem:[#allocation8 + $0x78] sm:$0xff] %v3268_v63  ;;  %v821_v7 = vcvt.f32.s32 %v820_v19  ;;  %vm1049_vm15 = vcmp.eq.s32.totalorder %v6492_v25, %v796_v1  ;;  %v948_v44 = vcvt.f32.s32 %v4885_v59 }
 0x34b   :  { %v862_v41 = vpop.xlane.xlu1 %861  ;;  %3760 = vmatpush3.xpose.msra.mxu1 %v5065_v60  ;;  %v3267_v2 = vsel %vm1049_vm15, 1.0, %v6340_v47  ;;  %3706 = vmatprep.mubr.msk.f32.mxu1 %vm1049_vm15, %v6338_v29 }
 0x34c   :  { %v863_v55 = vcvt.f32.s32 %v862_v41  ;;  %vm1052_vm0 = vcmp.eq.s32.totalorder %v6492_v25, %v838_v45  ;;  %3761 = vmatprep.subr.mxu1 %v5078_v15  ;;  %v824_v61 = vadd.s32 %v823_v43, %v821_v7  ;;  %1145 = vst [vmem:[#allocation8 + $0x70] sm:$0xff] %v3267_v2  ;;  %v1602_v46 = vadd.f32 %v3267_v2, %v1601_v31 }
 0x34d   :  { %3707 = vmatmul.mubr.msk.f32.gmra.mxu1 %vm1050_vm14, %v6338_v29  ;;  %v3270_v13 = vsel %vm1052_vm0, 1.0, %v6340_v47  ;;  %v848_v33 = vpop.xlane.xlu0 %847  ;;  %v907_v43 = vshll.u32 %v906_v39, 16  ;;  %v990_v39 = vcvt.f32.s32 %v4912_v35 }
 0x34e   :  { %v866_v28 = vadd.s32 %v865_v27, %v863_v55  ;;  %1148 = vst [vmem:[#allocation8 + $0x88] sm:$0xff] %v3270_v13  ;;  %v1603_v4 = vadd.f32 %v3268_v63, %v1602_v46  ;;  %v849_v57 = vcvt.f32.s32 %v848_v33  ;;  %vm1051_vm1 = vcmp.eq.s32.totalorder %v6492_v25, %v824_v61 }
 0x34f   :  { %v890_v14 = vpop.xlane.xlu1 %889  ;;  %3762 = vmatpush3.xpose.msra.mxu1 %v5078_v15  ;;  %v3269_v31 = vsel %vm1051_vm1, 1.0, %v6340_v47  ;;  %3709 = vmatprep.mubr.msk.f32.mxu1 %vm1051_vm1, %v6338_v29  ;;  %v921_v63 = vshll.u32 %v920_v42, 16  ;;  %v949_v27 = vshll.u32 %v948_v44, 16  ;;  %v976_v46 = vcvt.f32.s32 %v4895_v38 }
 0x350   :  { %v891_v0 = vcvt.f32.s32 %v890_v14  ;;  %vm1054_vm2 = vcmp.eq.s32.totalorder %v6492_v25, %v866_v28  ;;  %3763 = vmatprep.subr.mxu1 %v5094_v22  ;;  %v852_v36 = vadd.s32 %v851_v23, %v849_v57  ;;  %1147 = vst [vmem:[#allocation8 + $0x80] sm:$0xff] %v3269_v31  ;;  %v1604_v12 = vadd.f32 %v3269_v31, %v1603_v4 }
 0x351   :  { %3710 = vmatmul.mubr.msk.f32.gmra.mxu1 %vm1052_vm0, %v6338_v29  ;;  %v3272_v50 = vsel %vm1054_vm2, 1.0, %v6340_v47  ;;  %v876_v34 = vpop.xlane.xlu0 %875  ;;  %v935_v33 = vshll.u32 %v934_v10, 16  ;;  %v962_v38 = vcvt.f32.s32 %v4902_v49  ;;  %v1004_v57 = vcvt.f32.s32 %v4905_v53 }
 0x352   :  { %v894_v48 = vadd.s32 %v893_v52, %v891_v0  ;;  %1150 = vst [vmem:[#allocation8 + $0x98] sm:$0xff] %v3272_v50  ;;  %v1605_v51 = vadd.f32 %v3270_v13, %v1604_v12  ;;  %v877_v16 = vcvt.f32.s32 %v876_v34  ;;  %vm1053_vm3 = vcmp.eq.s32.totalorder %v6492_v25, %v852_v36 }
 0x353   :  { %v918_v1 = vpop.xlane.xlu1 %917  ;;  %3764 = vmatpush3.xpose.msra.mxu1 %v5094_v22  ;;  %v3271_v45 = vsel %vm1053_vm3, 1.0, %v6340_v47  ;;  %3712 = vmatprep.mubr.msk.f32.mxu1 %vm1053_vm3, %v6338_v29  ;;  %v977_v31 = vshll.u32 %v976_v46, 16  ;;  %v1005_v44 = vshll.u32 %v1004_v57, 16  ;;  %v1018_v10 = vcvt.f32.s32 %v4920_v62 }
 0x354   :  { %v919_v40 = vcvt.f32.s32 %v918_v1  ;;  %vm1056_vm4 = vcmp.eq.s32.totalorder %v6492_v25, %v894_v48  ;;  %3893 = vmatprep.subr.mxu1 %v4938_v18  ;;  %v880_v6 = vadd.s32 %v879_v37, %v877_v16  ;;  %1149 = vst [vmem:[#allocation8 + $0x90] sm:$0xff] %v3271_v45  ;;  %v1606_v59 = vadd.f32 %v3271_v45, %v1605_v51 }
 0x355   :  { %3713 = vmatmul.mubr.msk.f32.gmra.mxu1 %vm1054_vm2, %v6338_v29  ;;  %v3274_v19 = vsel %vm1056_vm4, 1.0, %v6340_v47  ;;  %v904_v41 = vpop.xlane.xlu0 %903  ;;  %v963_v37 = vshll.u32 %v962_v38, 16 }
 0x356   :  { %v922_v7 = vadd.s32 %v921_v63, %v919_v40  ;;  %1152 = vst [vmem:[#allocation8 + $0xa8] sm:$0xff] %v3274_v19  ;;  %v1607_v55 = vadd.f32 %v3272_v50, %v1606_v59  ;;  %v905_v2 = vcvt.f32.s32 %v904_v41  ;;  %vm1055_vm5 = vcmp.eq.s32.totalorder %v6492_v25, %v880_v6 }
 0x357   :  { %v946_v61 = vpop.xlane.xlu1 %945  ;;  %v3273_v23 = vsel %vm1055_vm5, 1.0, %v6340_v47  ;;  %3715 = vmatprep.mubr.msk.f32.mxu1 %vm1055_vm5, %v6338_v29  ;;  %v1032_v63 = vcvt.f32.s32 %v4914_v8 }
 0x358   :  { %v947_v13 = vcvt.f32.s32 %v946_v61  ;;  %vm1058_vm6 = vcmp.eq.s32.totalorder %v6492_v25, %v922_v7  ;;  %v908_v24 = vadd.s32 %v907_v43, %v905_v2  ;;  %1151 = vst [vmem:[#allocation8 + $0xa0] sm:$0xff] %v3273_v23  ;;  %v1608_v3 = vadd.f32 %v3273_v23, %v1607_v55 }
 0x359   :  { %3716 = vmatmul.mubr.msk.f32.gmra.mxu1 %vm1056_vm4, %v6338_v29  ;;  %v3276_v28 = vsel %vm1058_vm6, 1.0, %v6340_v47  ;;  %v932_v4 = vpop.xlane.xlu0 %931  ;;  %v1033_v55 = vshll.u32 %v1032_v63, 16 }
 0x35a   :  { %v950_v52 = vadd.s32 %v949_v27, %v947_v13  ;;  %1154 = vst [vmem:[#allocation8 + $0xb8] sm:$0xff] %v3276_v28  ;;  %v1609_v14 = vadd.f32 %v3274_v19, %v1608_v3  ;;  %v933_v42 = vcvt.f32.s32 %v932_v4  ;;  %vm1057_vm7 = vcmp.eq.s32.totalorder %v6492_v25, %v908_v24 }
 0x35b   :  { %v974_v0 = vpop.xlane.xlu1 %973  ;;  %v3275_v12 = vsel %vm1057_vm7, 1.0, %v6340_v47  ;;  %3718 = vmatprep.mubr.msk.f32.mxu1 %vm1057_vm7, %v6338_v29  ;;  %v991_v19 = vshll.u32 %v990_v39, 16  ;;  %v1019_v3 = vshll.u32 %v1018_v10, 16 }
 0x35c   :  { %v975_v36 = vcvt.f32.s32 %v974_v0  ;;  %vm1060_vm8 = vcmp.eq.s32.totalorder %v6492_v25, %v950_v52  ;;  %v936_v50 = vadd.s32 %v935_v33, %v933_v42  ;;  %1153 = vst [vmem:[#allocation8 + $0xb0] sm:$0xff] %v3275_v12  ;;  %v1610_v49 = vadd.f32 %v3275_v12, %v1609_v14 }
 0x35d   :  { %3719 = vmatmul.mubr.msk.f32.gmra.mxu1 %vm1058_vm6, %v6338_v29  ;;  %v3278_v53 = vsel %vm1060_vm8, 1.0, %v6340_v47  ;;  %v960_v34 = vpop.xlane.xlu0 %959 }
 0x35e   :  { %v978_v48 = vadd.s32 %v977_v31, %v975_v36  ;;  %1156 = vst [vmem:[#allocation8 + $0xc8] sm:$0xff] %v3278_v53  ;;  %v1611_v51 = vadd.f32 %v3276_v28, %v1610_v49  ;;  %v961_v16 = vcvt.f32.s32 %v960_v34  ;;  %vm1059_vm9 = vcmp.eq.s32.totalorder %v6492_v25, %v936_v50 }
 0x35f   :  { %v1002_v1 = vpop.xlane.xlu1 %1001  ;;  %v3277_v45 = vsel %vm1059_vm9, 1.0, %v6340_v47  ;;  %3721 = vmatprep.mubr.msk.f32.mxu1 %vm1059_vm9, %v6338_v29 }
 0x360   :  { %v1003_v40 = vcvt.f32.s32 %v1002_v1  ;;  %vm1062_vm10 = vcmp.eq.s32.totalorder %v6492_v25, %v978_v48  ;;  %v964_v6 = vadd.s32 %v963_v37, %v961_v16  ;;  %1155 = vst [vmem:[#allocation8 + $0xc0] sm:$0xff] %v3277_v45  ;;  %v1612_v35 = vadd.f32 %v3277_v45, %v1611_v51 }
 0x361   :  { %3722 = vmatmul.mubr.msk.f32.gmra.mxu1 %vm1060_vm8, %v6338_v29  ;;  %v3280_v59 = vsel %vm1062_vm10, 1.0, %v6340_v47  ;;  %v988_v43 = vpop.xlane.xlu0 %987 }
 0x362   :  { %v1006_v8 = vadd.s32 %v1005_v44, %v1003_v40  ;;  %1158 = vst [vmem:[#allocation8 + $0xd8] sm:$0xff] %v3280_v59  ;;  %v1613_v7 = vadd.f32 %v3278_v53, %v1612_v35  ;;  %v989_v41 = vcvt.f32.s32 %v988_v43  ;;  %vm1061_vm11 = vcmp.eq.s32.totalorder %v6492_v25, %v964_v6 }
 0x363   :  { %v1030_v27 = vpop.xlane.xlu1 %1029  ;;  %v3279_v61 = vsel %vm1061_vm11, 1.0, %v6340_v47  ;;  %3724 = vmatprep.mubr.msk.f32.mxu1 %vm1061_vm11, %v6338_v29 }
 0x364   :  { %v1031_v2 = vcvt.f32.s32 %v1030_v27  ;;  %vm1064_vm12 = vcmp.eq.s32.totalorder %v6492_v25, %v1006_v8  ;;  %v992_v46 = vadd.s32 %v991_v19, %v989_v41  ;;  %1157 = vst [vmem:[#allocation8 + $0xd0] sm:$0xff] %v3279_v61  ;;  %v1614_v13 = vadd.f32 %v3279_v61, %v1613_v7 }
 0x365   :  { %3725 = vmatmul.mubr.msk.f32.gmra.mxu1 %vm1062_vm10, %v6338_v29  ;;  %v3282_v62 = vsel %vm1064_vm12, 1.0, %v6340_v47  ;;  %v1016_v24 = vpop.xlane.xlu0 %1015 }
 0x366   :  { %v1034_v23 = vadd.s32 %v1033_v55, %v1031_v2  ;;  %1160 = vst [vmem:[#allocation8 + $0xe8] sm:$0xff] %v3282_v62  ;;  %v1615_v28 = vadd.f32 %v3280_v59, %v1614_v13  ;;  %v1017_v33 = vcvt.f32.s32 %v1016_v24  ;;  %vm1063_vm13 = vcmp.eq.s32.totalorder %v6492_v25, %v992_v46 }
 0x367   :  { %v3281_v38 = vsel %vm1063_vm13, 1.0, %v6340_v47  ;;  %3727 = vmatprep.mubr.msk.f32.mxu1 %vm1063_vm13, %v6338_v29 }
 0x368   :  { %vm1066_vm14 = vcmp.eq.s32.totalorder %v6492_v25, %v1034_v23  ;;  %v1020_v52 = vadd.s32 %v1019_v3, %v1017_v33  ;;  %1159 = vst [vmem:[#allocation8 + $0xe0] sm:$0xff] %v3281_v38  ;;  %v1616_v4 = vadd.f32 %v3281_v38, %v1615_v28 }
 0x369   :  { %3728 = vmatmul.mubr.msk.f32.gmra.mxu1 %vm1064_vm12, %v6338_v29  ;;  %v3284_v57 = vsel %vm1066_vm14, 1.0, %v6340_v47 }
 0x36a   :  { %1162 = vst [vmem:[#allocation8 + $0xf8] sm:$0xff] %v3284_v57  ;;  %v1617_v14 = vadd.f32 %v3282_v62, %v1616_v4  ;;  %vm1065_vm15 = vcmp.eq.s32.totalorder %v6492_v25, %v1020_v52 }
 0x36b   :  { %v3283_v42 = vsel %vm1065_vm15, 1.0, %v6340_v47  ;;  %3730 = vmatprep.mubr.msk.f32.mxu1 %vm1065_vm15, %v6338_v29 }
 0x36c   :  { %1161 = vst [vmem:[#allocation8 + $0xf0] sm:$0xff] %v3283_v42  ;;  %v1618_v0 = vadd.f32 %v3283_v42, %v1617_v14 }
 0x36d   :  { %3731 = vmatmul.mubr.msk.f32.gmra.mxu1 %vm1066_vm14, %v6338_v29 }
 0x36e   :  { %v5176_v31 = vadd.f32 %v3284_v57, %v1618_v0 }
 0x370   :  { %6493 = vst [vmem:[#allocation51_spill] sm:$0xff] %v5176_v31 }
 0x386   :  { %v5178_v36 = vpop.trf.xlu0 }
 0x387   :  { %6494 = vst [vmem:[#allocation52_spill] sm:$0xff] %v5178_v36  ;;  %3765 = vmatprep.mubr.f32.mxu1 %v5178_v36 }
 0x389   :  { %v5181_v12 = vpop.trf.xlu1 }
 0x38a   :  { %6495 = vst [vmem:[#allocation53_spill] sm:$0xff] %v5181_v12  ;;  %v5183_v50 = vpop.trf.xlu0 }
 0x38b   :  { %6496 = vst [vmem:[#allocation54_spill] sm:$0xff] %v5183_v50  ;;  %3766 = vmatmul.mubr.f32.vlgmr.msra.gmra.mxu1 %v5183_v50 }
 0x38c   :  { %3909 = vmatpush3.msra.mxu1 %v4938_v18 }
 0x38d   :  { %v5187_v49 = vpop.trf.xlu1  ;;  %3894 = vmatprep.subr.mxu1 %v4941_v20 }
 0x38e   :  { %6497 = vst [vmem:[#allocation55_spill] sm:$0xff] %v5187_v49  ;;  %v5190_v53 = vpop.trf.xlu0  ;;  %3910 = vmatpush3.msra.mxu1 %v4941_v20 }
 0x38f   :  { %6498 = vst [vmem:[#allocation56_spill] sm:$0xff] %v5190_v53  ;;  %3768 = vmatprep.mubr.f32.mxu1 %v5190_v53  ;;  %3895 = vmatprep.subr.mxu1 %v4951_v26 }
 0x390   :  { %3911 = vmatpush3.msra.mxu1 %v4951_v26 }
 0x391   :  { %3896 = vmatprep.subr.mxu1 %v4963_v58  ;;  %v5199_v39 = vpop.trf.xlu1 }
 0x392   :  { %v5197_v37 = vpop.trf.xlu0  ;;  %6500 = vst [vmem:[#allocation58_spill] sm:$0xff] %v5199_v39  ;;  %3912 = vmatpush3.msra.mxu1 %v4963_v58 }
 0x393   :  { %6499 = vst [vmem:[#allocation57_spill] sm:$0xff] %v5197_v37  ;;  %3769 = vmatmul.mubr.f32.gmra.mxu1 %v5197_v37  ;;  %3897 = vmatprep.subr.mxu1 %v4977_v17 }
 0x394   :  { %3913 = vmatpush3.msra.mxu1 %v4977_v17 }
 0x395   :  { %3898 = vmatprep.subr.mxu1 %v4983_v54  ;;  %v5211_v20 = vpop.trf.xlu1 }
 0x396   :  { %v5206_v18 = vpop.trf.xlu0  ;;  %3914 = vmatpush3.msra.mxu1 %v4983_v54  ;;  %6502 = vst [vmem:[#allocation60_spill] sm:$0xff] %v5211_v20 }
 0x397   :  { %6501 = vst [vmem:[#allocation59_spill] sm:$0xff] %v5206_v18  ;;  %3771 = vmatprep.mubr.f32.mxu1 %v5206_v18  ;;  %3899 = vmatprep.subr.mxu1 %v4997_v5 }
 0x398   :  { %3915 = vmatpush3.msra.mxu1 %v4997_v5 }
 0x399   :  { %3900 = vmatprep.subr.mxu1 %v5003_v9  ;;  %v5224_v17 = vpop.trf.xlu1 }
 0x39a   :  { %v5215_v26 = vpop.trf.xlu0  ;;  %3916 = vmatpush3.msra.mxu1 %v5003_v9  ;;  %6505 = vst [vmem:[#allocation63_spill] sm:$0xff] %v5224_v17 }
 0x39b   :  { %6503 = vst [vmem:[#allocation61_spill] sm:$0xff] %v5215_v26  ;;  %3772 = vmatmul.mubr.f32.gmra.mxu1 %v5215_v26  ;;  %3901 = vmatprep.subr.mxu1 %v5017_v21 }
 0x39c   :  { %3917 = vmatpush3.msra.mxu1 %v5017_v21 }
 0x39d   :  { %3902 = vmatprep.subr.mxu1 %v5023_v56  ;;  %v5236_v5 = vpop.trf.xlu1 }
 0x39e   :  { %v5222_v58 = vpop.trf.xlu0  ;;  %3918 = vmatpush3.msra.mxu1 %v5023_v56  ;;  %6507 = vst [vmem:[#allocation65_spill] sm:$0xff] %v5236_v5 }
 0x39f   :  { %6504 = vst [vmem:[#allocation62_spill] sm:$0xff] %v5222_v58  ;;  %3774 = vmatprep.mubr.f32.mxu1 %v5222_v58  ;;  %3903 = vmatprep.subr.mxu1 %v5037_v11 }
 0x3a0   :  { %3919 = vmatpush3.msra.mxu1 %v5037_v11 }
 0x3a1   :  { %3904 = vmatprep.subr.mxu1 %v5043_v32  ;;  %v5249_v56 = vpop.trf.xlu1 }
 0x3a2   :  { %v5231_v54 = vpop.trf.xlu0  ;;  %3920 = vmatpush3.msra.mxu1 %v5043_v32  ;;  %6510 = vst [vmem:[#allocation68_spill] sm:$0xff] %v5249_v56 }
 0x3a3   :  { %6506 = vst [vmem:[#allocation64_spill] sm:$0xff] %v5231_v54  ;;  %3775 = vmatmul.mubr.f32.gmra.mxu1 %v5231_v54  ;;  %3905 = vmatprep.subr.mxu1 %v5058_v30 }
 0x3a4   :  { %3921 = vmatpush3.msra.mxu1 %v5058_v30 }
 0x3a5   :  { %3906 = vmatprep.subr.mxu1 %v5065_v60  ;;  %v5256_v32 = vpop.trf.xlu1 }
 0x3a6   :  { %v5240_v9 = vpop.trf.xlu0  ;;  %3922 = vmatpush3.msra.mxu1 %v5065_v60  ;;  %6512 = vst [vmem:[#allocation70_spill] sm:$0xff] %v5256_v32 }
 0x3a7   :  { %6508 = vst [vmem:[#allocation66_spill] sm:$0xff] %v5240_v9  ;;  %3777 = vmatprep.mubr.f32.mxu1 %v5240_v9  ;;  %3907 = vmatprep.subr.mxu1 %v5078_v15 }
 0x3a8   :  { %3923 = vmatpush3.msra.mxu1 %v5078_v15 }
 0x3a9   :  { %3908 = vmatprep.subr.mxu1 %v5094_v22  ;;  %v5263_v15 = vpop.trf.xlu1 }
 0x3aa   :  { %v5247_v21 = vpop.trf.xlu0  ;;  %3924 = vmatpush3.msra.mxu1 %v5094_v22  ;;  %6515 = vst [vmem:[#allocation73_spill] sm:$0xff] %v5263_v15 }
 0x3ab   :  { %6509 = vst [vmem:[#allocation67_spill] sm:$0xff] %v5247_v21  ;;  %3778 = vmatmul.mubr.f32.gmra.mxu1 %v5247_v21 }
 0x3ad   :  { %v5269_v22 = vpop.trf.xlu1 }
 0x3ae   :  { %v5253_v11 = vpop.trf.xlu0  ;;  %6517 = vst [vmem:[#allocation75_spill] sm:$0xff] %v5269_v22 }
 0x3af   :  { %6511 = vst [vmem:[#allocation69_spill] sm:$0xff] %v5253_v11  ;;  %3780 = vmatprep.mubr.f32.mxu1 %v5253_v11 }
 0x3b1   :  { %v5276_v51 = vpop.trf.xlu1 }
 0x3b2   :  { %v5258_v30 = vpop.trf.xlu0  ;;  %6520 = vst [vmem:[#allocation78_spill] sm:$0xff] %v5276_v51 }
 0x3b3   :  { %6513 = vst [vmem:[#allocation71_spill] sm:$0xff] %v5258_v30  ;;  %3781 = vmatmul.mubr.f32.gmra.mxu1 %v5258_v30 }
 0x3b5   :  { %v5282_v16 = vpop.trf.xlu1 }
 0x3b6   :  { %v5261_v60 = vpop.trf.xlu0  ;;  %6521 = vst [vmem:[#allocation79_spill] sm:$0xff] %v5282_v16 }
 0x3b7   :  { %6514 = vst [vmem:[#allocation72_spill] sm:$0xff] %v5261_v60  ;;  %3783 = vmatprep.mubr.f32.mxu1 %v5261_v60 }
 0x3b9   :  { %v5286_v1 = vpop.trf.xlu1 }
 0x3ba   :  { %v5266_v48 = vpop.trf.xlu0  ;;  %6522 = vst [vmem:[#allocation80_spill] sm:$0xff] %v5286_v1 }
 0x3bb   :  { %6516 = vst [vmem:[#allocation74_spill] sm:$0xff] %v5266_v48  ;;  %3784 = vmatmul.mubr.f32.gmra.mxu1 %v5266_v48 }
 0x3bd   :  { %v5292_v63 = vpop.trf.xlu1 }
 0x3be   :  { %v5271_v34 = vpop.trf.xlu0  ;;  %6523 = vst [vmem:[#allocation81_spill] sm:$0xff] %v5292_v63 }
 0x3bf   :  { %6518 = vst [vmem:[#allocation76_spill] sm:$0xff] %v5271_v34  ;;  %3786 = vmatprep.mubr.f32.mxu1 %v5271_v34 }
 0x3c1   :  { %v5296_v40 = vpop.trf.xlu1 }
 0x3c2   :  { %v5274_v44 = vpop.trf.xlu0  ;;  %6524 = vst [vmem:[#allocation82_spill] sm:$0xff] %v5296_v40 }
 0x3c3   :  { %6519 = vst [vmem:[#allocation77_spill] sm:$0xff] %v5274_v44  ;;  %3787 = vmatmul.mubr.f32.gmra.mxu1 %v5274_v44 }
 0x3c4   :  { %3789 = vmatprep.mubr.f32.mxu1 %v5181_v12 }
 0x3c5   :  { %v5302_v45 = vpop.trf.xlu1 }
 0x3c6   :  { %6525 = vst [vmem:[#allocation83_spill] sm:$0xff] %v5302_v45 }
 0x3c7   :  { %3790 = vmatmul.mubr.f32.gmra.mxu1 %v5187_v49 }
 0x3c8   :  { %3792 = vmatprep.mubr.f32.mxu1 %v5199_v39 }
 0x3cb   :  { %3793 = vmatmul.mubr.f32.gmra.mxu1 %v5211_v20 }
 0x3cc   :  { %3795 = vmatprep.mubr.f32.mxu1 %v5224_v17 }
 0x3cf   :  { %3796 = vmatmul.mubr.f32.gmra.mxu1 %v5236_v5 }
 0x3d0   :  { %3798 = vmatprep.mubr.f32.mxu1 %v5249_v56 }
 0x3d3   :  { %3799 = vmatmul.mubr.f32.gmra.mxu1 %v5256_v32 }
 0x3d4   :  { %3801 = vmatprep.mubr.f32.mxu1 %v5263_v15  ;;  %v5304_v6 = vpop.f32.mrf.mxu1 }
 0x3d5   :  { %6526 = vst [vmem:[#allocation84_spill] sm:$0xff] %v5304_v6 }
 0x3d6   :  { %v5307_v35 = vpop.f32.mrf.mxu1 }
 0x3d7   :  { %3802 = vmatmul.mubr.f32.gmra.mxu1 %v5269_v22  ;;  %6527 = vst [vmem:[#allocation85_spill] sm:$0xff] %v5307_v35 }
 0x3d8   :  { %3804 = vmatprep.mubr.f32.mxu1 %v5276_v51 }
 0x3db   :  { %3805 = vmatmul.mubr.f32.gmra.mxu1 %v5282_v16  ;;  %v5372_v16 = vld [vmem:[%s6289_s2] ss:$0 sm:$0xff]  ;;  %s4096_s2 = smov [#allocation8]  }
 0x3dc   :  { %3807 = vmatprep.mubr.f32.mxu1 %v5286_v1  ;;  %s3208_s13 = sshll.u32 %s4096_s2, 4  ;;  %s3209_s13 = int_to_ptr.vmem [resolvable:$true] %s3208_s13 }
 0x3dd   :  { %s3998_s14 = scalar_lea.vmem %s3209_s13, 8192  ;;  %p4003_p11 = scmp.lt.s32.totalorder %s3209_s13, %s3209_s13 }
 0x3de   :  { %v5309_v59 = vpop.f32.mrf.mxu1  ;;  %p3999_p10 = scmp.ne.s32.totalorder %s3209_s13, %s3998_s14  ;;  %p4004_p12 = scmp.lt.s32.totalorder %s3998_s14, %s3998_s14 }
 0x3df   :  { %3808 = vmatmul.mubr.f32.gmra.mxu1 %v5292_v63  ;;  %6528 = vst [vmem:[#allocation86_spill] sm:$0xff] %v5309_v59 }
 0x3e0   :  { %3810 = vmatprep.mubr.f32.mxu1 %v5296_v40  ;;  %v5311_v19 = vpop.f32.mrf.mxu1  ;;  %p4005_p13 = por %p4004_p12, %p4003_p11 }
 0x3e2   :  { %p4006_p0 = pnand %p4005_p13, %p3999_p10 }
 0x3e3   :  { %3811 = vmatmul.mubr.f32.gmra.mxu1 %v5302_v45 }
 0x3e4   :  { %v5313_v8 = vpop.f32.mrf.mxu1 }
 0x3e6   :  { %v5315_v43 = vpop.f32.mrf.mxu1 }
 0x3ec   :  { %v5317_v10 = vpop.f32.mrf.mxu1 }
 0x3ee   :  { %v5319_v7 = vpop.f32.mrf.mxu1 }
 0x3f4   :  { %v5321_v41 = vpop.f32.mrf.mxu1 }
 0x3f6   :  { %v5323_v27 = vpop.f32.mrf.mxu1 }
 0x3fc   :  { %v5325_v55 = vpop.f32.mrf.mxu1 }
 0x3fe   :  { %v5327_v2 = vpop.f32.mrf.mxu1 }
 0x404   :  { %v5329_v61 = vpop.f32.mrf.mxu1 }
 0x406   :  { %v5331_v46 = vpop.f32.mrf.mxu1 }
 0x40d   :  { %v5333_v13 = vpop.f32.mrf.mxu1 }
 0x40e   :  { %6529 = vst [vmem:[#allocation87_spill] sm:$0xff] %v5333_v13 }
 0x40f   :  { %v5335_v62 = vpop.f32.mrf.mxu1 }
 0x410   :  { %6530 = vst [vmem:[#allocation88_spill] sm:$0xff] %v5335_v62 }
 0x411   :  { %v5337_v23 = vpop.f32.mrf.mxu1 }
 0x412   :  { %6531 = vst [vmem:[#allocation89_spill] sm:$0xff] %v5337_v23 }
 0x413   :  { %v5339_v24 = vpop.f32.mrf.mxu1 }
 0x414   :  { %6532 = vst [vmem:[#allocation90_spill] sm:$0xff] %v5339_v24 }
 0x415   :  { %v5341_v3 = vpop.f32.mrf.mxu1 }
 0x416   :  { %6533 = vst [vmem:[#allocation91_spill] sm:$0xff] %v5341_v3 }
 0x417   :  { %v5343_v28 = vpop.f32.mrf.mxu1 }
 0x418   :  { %6534 = vst [vmem:[#allocation92_spill] sm:$0xff] %v5343_v28 }
 0x419   :  { %v5345_v33 = vpop.f32.mrf.mxu1 }
 0x41a   :  { %6535 = vst [vmem:[#allocation93_spill] sm:$0xff] %v5345_v33 }
 0x41b   :  { %v5347_v38 = vpop.f32.mrf.mxu1 }
 0x41c   :  { %6536 = vst [vmem:[#allocation94_spill] sm:$0xff] %v5347_v38 }
 0x41d   :  { %v5349_v52 = vpop.f32.mrf.mxu1 }
 0x41e   :  { %6537 = vst [vmem:[#allocation95_spill] sm:$0xff] %v5349_v52 }
 0x41f   :  { %v5351_v4 = vpop.f32.mrf.mxu1 }
 0x420   :  { %6538 = vst [vmem:[#allocation96_spill] sm:$0xff] %v5351_v4 }
 0x421   :  { %v5353_v57 = vpop.f32.mrf.mxu1 }
 0x422   :  { %6539 = vst [vmem:[#allocation97_spill] sm:$0xff] %v5353_v57 }
 0x423   :  { %v5355_v14 = vpop.f32.mrf.mxu1 }
 0x424   :  { %6540 = vst [vmem:[#allocation98_spill] sm:$0xff] %v5355_v14 }
 0x425   :  { %v5357_v42 = vpop.f32.mrf.mxu1 }
 0x426   :  { %6541 = vst [vmem:[#allocation99_spill] sm:$0xff] %v5357_v42 }
 0x427   :  { %v5359_v0 = vpop.f32.mrf.mxu1 }
 0x428   :  { %6542 = vst [vmem:[#allocation100_spill] sm:$0xff] %v5359_v0 }
 0x429   :  { %v5361_v29 = vpop.f32.mrf.mxu1 }
 0x42a   :  { %6543 = vst [vmem:[#allocation101_spill] sm:$0xff] %v5361_v29 }
 0x42b   :  { %v5363_v47 = vpop.f32.mrf.mxu1 }
 0x42c   :  { %6544 = vst [vmem:[#allocation102_spill] sm:$0xff] %v5363_v47 }
 0x42d   :  { %v5365_v40 = vpop.f32.mrf.mxu1 }
 0x42e   :  { %6545 = vst [vmem:[#allocation103_spill] sm:$0xff] %v5365_v40 }
 0x42f   :  { %v5367_v45 = vpop.f32.mrf.mxu1 }
 0x430   :  { %6546 = vst [vmem:[#allocation104_spill] sm:$0xff] %v5367_v45 }
 0x44b   :  { %v3767_v1 = vpop.f32.mrf.mxu1 }
 0x44c   :  { %v1950_v63 = vmul.f32 2.0, %v3767_v1 }
 0x44d   :  { %v1790_v51 = vpop.f32.mrf.mxu1 }
 0x44e   :  { %v5375_v15 = vsub.f32 %v5372_v16, %v1950_v63  ;;  %v1949_v22 = vmul.f32 2.0, %v1790_v51 }
 0x450   :  { %v5378_v56 = vsub.f32 %v5372_v16, %v1949_v22  ;;  %2015 = vmin.xlane.f32.xlu1 %v5375_v15 }
 0x452   :  { %2013 = vmin.xlane.f32.xlu0 %v5378_v56 }
 0x453   :  { %v3770_v32 = vpop.f32.mrf.mxu1 }
 0x454   :  { %v1952_v17 = vmul.f32 2.0, %v3770_v32 }
 0x455   :  { %v1800_v1 = vpop.f32.mrf.mxu1 }
 0x456   :  { %v5383_v5 = vsub.f32 %v5372_v16, %v1952_v17  ;;  %v1951_v39 = vmul.f32 2.0, %v1800_v1 }
 0x458   :  { %v5386_v20 = vsub.f32 %v5372_v16, %v1951_v39  ;;  %2019 = vmin.xlane.f32.xlu1 %v5383_v5 }
 0x45a   :  { %2017 = vmin.xlane.f32.xlu0 %v5386_v20 }
 0x45b   :  { %v3773_v22 = vpop.f32.mrf.mxu1 }
 0x45c   :  { %v1954_v51 = vmul.f32 2.0, %v3773_v22 }
 0x45d   :  { %v1810_v63 = vpop.f32.mrf.mxu1 }
 0x45e   :  { %v5391_v12 = vsub.f32 %v5372_v16, %v1954_v51  ;;  %v1953_v49 = vmul.f32 2.0, %v1810_v63 }
 0x460   :  { %v5394_v32 = vsub.f32 %v5372_v16, %v1953_v49  ;;  %2023 = vmin.xlane.f32.xlu1 %v5391_v12 }
 0x462   :  { %2021 = vmin.xlane.f32.xlu0 %v5394_v32 }
 0x463   :  { %v3776_v39 = vpop.f32.mrf.mxu1 }
 0x464   :  { %v1956_v17 = vmul.f32 2.0, %v3776_v39 }
 0x465   :  { %v1820_v1 = vpop.f32.mrf.mxu1 }
 0x466   :  { %v5399_v34 = vsub.f32 %v5372_v16, %v1956_v17  ;;  %v1955_v44 = vmul.f32 2.0, %v1820_v1 }
 0x468   :  { %v5402_v22 = vsub.f32 %v5372_v16, %v1955_v44  ;;  %2027 = vmin.xlane.f32.xlu1 %v5399_v34 }
 0x46a   :  { %2025 = vmin.xlane.f32.xlu0 %v5402_v22 }
 0x46b   :  { %v3779_v49 = vpop.f32.mrf.mxu1 }
 0x46c   :  { %v1958_v51 = vmul.f32 2.0, %v3779_v49 }
 0x46d   :  { %v1830_v63 = vpop.f32.mrf.mxu1 }
 0x46e   :  { %v5407_v48 = vsub.f32 %v5372_v16, %v1958_v51  ;;  %v1957_v60 = vmul.f32 2.0, %v1830_v63 }
 0x470   :  { %v5410_v39 = vsub.f32 %v5372_v16, %v1957_v60  ;;  %2031 = vmin.xlane.f32.xlu1 %v5407_v48 }
 0x472   :  { %2029 = vmin.xlane.f32.xlu0 %v5410_v39 }
 0x473   :  { %v3782_v44 = vpop.f32.mrf.mxu1 }
 0x474   :  { %v1960_v17 = vmul.f32 2.0, %v3782_v44 }
 0x475   :  { %v1840_v1 = vpop.f32.mrf.mxu1 }
 0x476   :  { %v5415_v30 = vsub.f32 %v5372_v16, %v1960_v17  ;;  %v1959_v11 = vmul.f32 2.0, %v1840_v1 }
 0x478   :  { %v5418_v49 = vsub.f32 %v5372_v16, %v1959_v11  ;;  %2035 = vmin.xlane.f32.xlu1 %v5415_v30 }
 0x47a   :  { %2033 = vmin.xlane.f32.xlu0 %v5418_v49 }
 0x47b   :  { %v3785_v60 = vpop.f32.mrf.mxu1 }
 0x47c   :  { %v1962_v51 = vmul.f32 2.0, %v3785_v60 }
 0x47d   :  { %v1850_v63 = vpop.f32.mrf.mxu1 }
 0x47e   :  { %v5423_v21 = vsub.f32 %v5372_v16, %v1962_v51  ;;  %v1961_v9 = vmul.f32 2.0, %v1850_v63 }
 0x480   :  { %v5426_v44 = vsub.f32 %v5372_v16, %v1961_v9  ;;  %2039 = vmin.xlane.f32.xlu1 %v5423_v21 }
 0x482   :  { %2037 = vmin.xlane.f32.xlu0 %v5426_v44 }
 0x483   :  { %v3788_v11 = vpop.f32.mrf.mxu1 }
 0x484   :  { %v1964_v17 = vmul.f32 2.0, %v3788_v11 }
 0x485   :  { %v1860_v1 = vpop.f32.mrf.mxu1 }
 0x486   :  { %v5431_v54 = vsub.f32 %v5372_v16, %v1964_v17  ;;  %v1963_v58 = vmul.f32 2.0, %v1860_v1 }
 0x487   :  { %v3791_v60 = vpop.f32.mrf.mxu1 }
 0x488   :  { %v5434_v26 = vsub.f32 %v5372_v16, %v1963_v58  ;;  %v1966_v51 = vmul.f32 2.0, %v3791_v60  ;;  %2043 = vmin.xlane.f32.xlu1 %v5431_v54 }
 0x489   :  { %v1870_v9 = vpop.f32.mrf.mxu1 }
 0x48a   :  { %v5438_v63 = vsub.f32 %v5372_v16, %v1966_v51  ;;  %v1965_v18 = vmul.f32 2.0, %v1870_v9  ;;  %2041 = vmin.xlane.f32.xlu0 %v5434_v26 }
 0x48b   :  { %v3794_v11 = vpop.f32.mrf.mxu1 }
 0x48c   :  { %v5442_v37 = vsub.f32 %v5372_v16, %v1965_v18  ;;  %v1968_v17 = vmul.f32 2.0, %v3794_v11  ;;  %2047 = vmin.xlane.f32.xlu1 %v5438_v63 }
 0x48d   :  { %v1880_v1 = vpop.f32.mrf.mxu1 }
 0x48e   :  { %v5446_v58 = vsub.f32 %v5372_v16, %v1968_v17  ;;  %v1967_v60 = vmul.f32 2.0, %v1880_v1  ;;  %2045 = vmin.xlane.f32.xlu0 %v5442_v37 }
 0x48f   :  { %v3797_v53 = vpop.f32.mrf.mxu1 }
 0x490   :  { %v5450_v51 = vsub.f32 %v5372_v16, %v1967_v60  ;;  %v1970_v9 = vmul.f32 2.0, %v3797_v53  ;;  %2051 = vmin.xlane.f32.xlu1 %v5446_v58 }
 0x491   :  { %v1890_v50 = vpop.f32.mrf.mxu1 }
 0x492   :  { %v5454_v18 = vsub.f32 %v5372_v16, %v1970_v9  ;;  %v1969_v11 = vmul.f32 2.0, %v1890_v50  ;;  %2049 = vmin.xlane.f32.xlu0 %v5450_v51 }
 0x493   :  { %v3800_v36 = vpop.f32.mrf.mxu1 }
 0x494   :  { %v5458_v17 = vsub.f32 %v5372_v16, %v1969_v11  ;;  %v1972_v1 = vmul.f32 2.0, %v3800_v36  ;;  %2055 = vmin.xlane.f32.xlu1 %v5454_v18 }
 0x495   :  { %v1900_v31 = vpop.f32.mrf.mxu1 }
 0x496   :  { %v5462_v60 = vsub.f32 %v5372_v16, %v1972_v1  ;;  %v1971_v53 = vmul.f32 2.0, %v1900_v31  ;;  %2053 = vmin.xlane.f32.xlu0 %v5458_v17 }
 0x497   :  { %v3803_v40 = vpop.f32.mrf.mxu1 }
 0x498   :  { %v5466_v9 = vsub.f32 %v5372_v16, %v1971_v53  ;;  %v1974_v50 = vmul.f32 2.0, %v3803_v40  ;;  %2059 = vmin.xlane.f32.xlu1 %v5462_v60 }
 0x499   :  { %v1910_v45 = vpop.f32.mrf.mxu1 }
 0x49a   :  { %v5470_v11 = vsub.f32 %v5372_v16, %v1974_v50  ;;  %v1973_v36 = vmul.f32 2.0, %v1910_v45  ;;  %2057 = vmin.xlane.f32.xlu0 %v5466_v9 }
 0x49b   :  { %v3806_v29 = vpop.f32.mrf.mxu1 }
 0x49c   :  { %v5474_v1 = vsub.f32 %v5372_v16, %v1973_v36  ;;  %v1976_v31 = vmul.f32 2.0, %v3806_v29  ;;  %2063 = vmin.xlane.f32.xlu1 %v5470_v11 }
 0x49d   :  { %v1920_v47 = vpop.f32.mrf.mxu1 }
 0x49e   :  { %v5478_v53 = vsub.f32 %v5372_v16, %v1976_v31  ;;  %v1975_v40 = vmul.f32 2.0, %v1920_v47  ;;  %2061 = vmin.xlane.f32.xlu0 %v5474_v1 }
 0x49f   :  { %v3809_v42 = vpop.f32.mrf.mxu1 }
 0x4a0   :  { %v5482_v50 = vsub.f32 %v5372_v16, %v1975_v40  ;;  %v1978_v45 = vmul.f32 2.0, %v3809_v42  ;;  %2067 = vmin.xlane.f32.xlu1 %v5478_v53 }
 0x4a1   :  { %v1930_v0 = vpop.f32.mrf.mxu1 }
 0x4a2   :  { %v5486_v36 = vsub.f32 %v5372_v16, %v1978_v45  ;;  %v1977_v29 = vmul.f32 2.0, %v1930_v0  ;;  %2065 = vmin.xlane.f32.xlu0 %v5482_v50 }
 0x4a3   :  { %v3812_v57 = vpop.f32.mrf.mxu1 }
 0x4a4   :  { %v5490_v31 = vsub.f32 %v5372_v16, %v1977_v29  ;;  %v1980_v47 = vmul.f32 2.0, %v3812_v57  ;;  %2071 = vmin.xlane.f32.xlu1 %v5486_v36 }
 0x4a5   :  { %v1940_v14 = vpop.f32.mrf.mxu1 }
 0x4a6   :  { %v5494_v40 = vsub.f32 %v5372_v16, %v1980_v47  ;;  %v1979_v42 = vmul.f32 2.0, %v1940_v14  ;;  %2069 = vmin.xlane.f32.xlu0 %v5490_v31 }
 0x4a8   :  { %v5498_v45 = vsub.f32 %v5372_v16, %v1979_v42  ;;  %2075 = vmin.xlane.f32.xlu1 %v5494_v40 }
 0x4aa   :  { %2073 = vmin.xlane.f32.xlu0 %v5498_v45 }
 0x4d9   :  { %v2016_v0 = vpop.xlane.xlu1 %2015 }
 0x4da   :  { %vm2078_vm0 = vcmp.eq.f32.partialorder %v5375_v15, %v2016_v0 }
 0x4db   :  { %v5504_v57 = vsel %vm2078_vm0, %v6492_v25, 128  ;;  %v2014_v29 = vpop.xlane.xlu0 %2013 }
 0x4dc   :  { %v2156_v47 = vshra.s32 %v5504_v57, 16  ;;  %vm2077_vm1 = vcmp.eq.f32.partialorder %v5378_v56, %v2014_v29 }
 0x4dd   :  { %v5509_v14 = vsel %vm2077_vm1, %v6492_v25, 128 }
 0x4de   :  { %v5511_v16 = vcvt.s32.f32 %v2156_v47  ;;  %v2142_v42 = vshra.s32 %v5509_v14, 16 }
 0x4e0   :  { %v5514_v52 = vcvt.s32.f32 %v2142_v42  ;;  %2159 = vmin.xlane.f32.xlu1 %v5511_v16 }
 0x4e1   :  { %v2020_v15 = vpop.xlane.xlu1 %2019 }
 0x4e2   :  { %vm2080_vm2 = vcmp.eq.f32.partialorder %v5383_v5, %v2020_v15  ;;  %2145 = vmin.xlane.f32.xlu0 %v5514_v52 }
 0x4e3   :  { %v5520_v0 = vsel %vm2080_vm2, %v6492_v25, 128  ;;  %v2018_v56 = vpop.xlane.xlu0 %2017 }
 0x4e4   :  { %v2184_v29 = vshra.s32 %v5520_v0, 16  ;;  %vm2079_vm3 = vcmp.eq.f32.partialorder %v5386_v20, %v2018_v56 }
 0x4e5   :  { %v5525_v47 = vsel %vm2079_vm3, %v6492_v25, 128 }
 0x4e6   :  { %v5527_v42 = vcvt.s32.f32 %v2184_v29  ;;  %v2170_v4 = vshra.s32 %v5525_v47, 16 }
 0x4e8   :  { %v5530_v33 = vcvt.s32.f32 %v2170_v4  ;;  %2187 = vmin.xlane.f32.xlu1 %v5527_v42 }
 0x4e9   :  { %v2024_v5 = vpop.xlane.xlu1 %2023 }
 0x4ea   :  { %vm2082_vm4 = vcmp.eq.f32.partialorder %v5391_v12, %v2024_v5  ;;  %2173 = vmin.xlane.f32.xlu0 %v5530_v33 }
 0x4eb   :  { %v5536_v15 = vsel %vm2082_vm4, %v6492_v25, 128  ;;  %v2022_v20 = vpop.xlane.xlu0 %2021 }
 0x4ec   :  { %v2212_v56 = vshra.s32 %v5536_v15, 16  ;;  %vm2081_vm5 = vcmp.eq.f32.partialorder %v5394_v32, %v2022_v20 }
 0x4ed   :  { %v5541_v29 = vsel %vm2081_vm5, %v6492_v25, 128 }
 0x4ee   :  { %v5543_v4 = vcvt.s32.f32 %v2212_v56  ;;  %v2198_v38 = vshra.s32 %v5541_v29, 16 }
 0x4f0   :  { %v5546_v3 = vcvt.s32.f32 %v2198_v38  ;;  %2215 = vmin.xlane.f32.xlu1 %v5543_v4 }
 0x4f1   :  { %v2028_v12 = vpop.xlane.xlu1 %2027 }
 0x4f2   :  { %vm2084_vm6 = vcmp.eq.f32.partialorder %v5399_v34, %v2028_v12  ;;  %2201 = vmin.xlane.f32.xlu0 %v5546_v3 }
 0x4f3   :  { %v5552_v5 = vsel %vm2084_vm6, %v6492_v25, 128  ;;  %v2026_v32 = vpop.xlane.xlu0 %2025 }
 0x4f4   :  { %v2240_v20 = vshra.s32 %v5552_v5, 16  ;;  %vm2083_vm7 = vcmp.eq.f32.partialorder %v5402_v22, %v2026_v32 }
 0x4f5   :  { %v5557_v56 = vsel %vm2083_vm7, %v6492_v25, 128 }
 0x4f6   :  { %v5559_v38 = vcvt.s32.f32 %v2240_v20  ;;  %v2226_v28 = vshra.s32 %v5557_v56, 16 }
 0x4f8   :  { %v5562_v23 = vcvt.s32.f32 %v2226_v28  ;;  %2243 = vmin.xlane.f32.xlu1 %v5559_v38 }
 0x4f9   :  { %v2032_v34 = vpop.xlane.xlu1 %2031 }
 0x4fa   :  { %vm2086_vm8 = vcmp.eq.f32.partialorder %v5407_v48, %v2032_v34  ;;  %2229 = vmin.xlane.f32.xlu0 %v5562_v23 }
 0x4fb   :  { %v5568_v12 = vsel %vm2086_vm8, %v6492_v25, 128  ;;  %v2030_v22 = vpop.xlane.xlu0 %2029 }
 0x4fc   :  { %v2268_v32 = vshra.s32 %v5568_v12, 16  ;;  %vm2085_vm9 = vcmp.eq.f32.partialorder %v5410_v39, %v2030_v22 }
 0x4fd   :  { %v5573_v20 = vsel %vm2085_vm9, %v6492_v25, 128 }
 0x4fe   :  { %6547 = vst [vmem:[#allocation105_spill] sm:$0xff] %v5573_v20  ;;  %v5575_v28 = vcvt.s32.f32 %v2268_v32  ;;  %v2254_v24 = vshra.s32 %v5573_v20, 16 }
 0x500   :  { %6548 = vst [vmem:[#allocation106_spill] sm:$0xff] %v5575_v28  ;;  %v5578_v13 = vcvt.s32.f32 %v2254_v24  ;;  %2271 = vmin.xlane.f32.xlu1 %v5575_v28 }
 0x501   :  { %v2036_v48 = vpop.xlane.xlu1 %2035 }
 0x502   :  { %vm2088_vm10 = vcmp.eq.f32.partialorder %v5415_v30, %v2036_v48  ;;  %2257 = vmin.xlane.f32.xlu0 %v5578_v13 }
 0x503   :  { %v5584_v34 = vsel %vm2088_vm10, %v6492_v25, 128  ;;  %v2034_v39 = vpop.xlane.xlu0 %2033 }
 0x504   :  { %v2296_v22 = vshra.s32 %v5584_v34, 16  ;;  %vm2087_vm11 = vcmp.eq.f32.partialorder %v5418_v49, %v2034_v39 }
 0x505   :  { %v5589_v32 = vsel %vm2087_vm11, %v6492_v25, 128 }
 0x506   :  { %6549 = vst [vmem:[#allocation107_spill] sm:$0xff] %v5589_v32  ;;  %v5591_v24 = vcvt.s32.f32 %v2296_v22  ;;  %v2282_v28 = vshra.s32 %v5589_v32, 16 }
 0x508   :  { %6550 = vst [vmem:[#allocation108_spill] sm:$0xff] %v5591_v24  ;;  %v5594_v20 = vcvt.s32.f32 %v2282_v28  ;;  %2299 = vmin.xlane.f32.xlu1 %v5591_v24 }
 0x509   :  { %v2040_v30 = vpop.xlane.xlu1 %2039 }
 0x50a   :  { %vm2090_vm12 = vcmp.eq.f32.partialorder %v5423_v21, %v2040_v30  ;;  %2285 = vmin.xlane.f32.xlu0 %v5594_v20 }
 0x50b   :  { %v5600_v48 = vsel %vm2090_vm12, %v6492_v25, 128  ;;  %v2038_v49 = vpop.xlane.xlu0 %2037 }
 0x50c   :  { %v2324_v39 = vshra.s32 %v5600_v48, 16  ;;  %vm2089_vm13 = vcmp.eq.f32.partialorder %v5426_v44, %v2038_v49 }
 0x50d   :  { %v5605_v22 = vsel %vm2089_vm13, %v6492_v25, 128 }
 0x50e   :  { %6551 = vst [vmem:[#allocation109_spill] sm:$0xff] %v5605_v22  ;;  %v5607_v28 = vcvt.s32.f32 %v2324_v39  ;;  %v2310_v24 = vshra.s32 %v5605_v22, 16 }
 0x510   :  { %6552 = vst [vmem:[#allocation110_spill] sm:$0xff] %v5607_v28  ;;  %v5610_v32 = vcvt.s32.f32 %v2310_v24  ;;  %2327 = vmin.xlane.f32.xlu1 %v5607_v28 }
 0x511   :  { %v2044_v21 = vpop.xlane.xlu1 %2043 }
 0x512   :  { %6553 = vst [vmem:[#allocation111_spill] sm:$0xff] %v5610_v32  ;;  %vm2092_vm14 = vcmp.eq.f32.partialorder %v5431_v54, %v2044_v21  ;;  %2313 = vmin.xlane.f32.xlu0 %v5610_v32 }
 0x513   :  { %v5616_v30 = vsel %vm2092_vm14, %v6492_v25, 128  ;;  %v2042_v44 = vpop.xlane.xlu0 %2041 }
 0x514   :  { %v2352_v49 = vshra.s32 %v5616_v30, 16  ;;  %vm2091_vm15 = vcmp.eq.f32.partialorder %v5434_v26, %v2042_v44 }
 0x515   :  { %v5621_v39 = vsel %vm2091_vm15, %v6492_v25, 128  ;;  %v2048_v24 = vpop.xlane.xlu1 %2047 }
 0x516   :  { %6554 = vst [vmem:[#allocation112_spill] sm:$0xff] %v5621_v39  ;;  %v5623_v22 = vcvt.s32.f32 %v2352_v49  ;;  %v2338_v28 = vshra.s32 %v5621_v39, 16  ;;  %vm2094_vm0 = vcmp.eq.f32.partialorder %v5438_v63, %v2048_v24 }
 0x517   :  { %v2046_v54 = vpop.xlane.xlu0 %2045  ;;  %v5630_v32 = vsel %vm2094_vm0, %v6492_v25, 128 }
 0x518   :  { %6555 = vst [vmem:[#allocation113_spill] sm:$0xff] %v5623_v22  ;;  %v5627_v21 = vcvt.s32.f32 %v2338_v28  ;;  %vm2093_vm1 = vcmp.eq.f32.partialorder %v5442_v37, %v2046_v54  ;;  %2355 = vmin.xlane.f32.xlu1 %v5623_v22  ;;  %v2380_v26 = vshra.s32 %v5630_v32, 16 }
 0x519   :  { %v5636_v44 = vsel %vm2093_vm1, %v6492_v25, 128  ;;  %v2052_v49 = vpop.xlane.xlu1 %2051 }
 0x51a   :  { %6556 = vst [vmem:[#allocation114_spill] sm:$0xff] %v5636_v44  ;;  %v2366_v39 = vshra.s32 %v5636_v44, 16  ;;  %vm2096_vm2 = vcmp.eq.f32.partialorder %v5446_v58, %v2052_v49  ;;  %2341 = vmin.xlane.f32.xlu0 %v5627_v21  ;;  %v5641_v63 = vcvt.s32.f32 %v2380_v26 }
 0x51b   :  { %v5644_v28 = vsel %vm2096_vm2, %v6492_v25, 128  ;;  %v2050_v37 = vpop.xlane.xlu0 %2049 }
 0x51c   :  { %v5646_v24 = vcvt.s32.f32 %v2366_v39  ;;  %v2408_v54 = vshra.s32 %v5644_v28, 16  ;;  %vm2095_vm3 = vcmp.eq.f32.partialorder %v5450_v51, %v2050_v37  ;;  %2383 = vmin.xlane.f32.xlu1 %v5641_v63 }
 0x51d   :  { %v2056_v22 = vpop.xlane.xlu1 %2055  ;;  %v5654_v58 = vsel %vm2095_vm3, %v6492_v25, 128 }
 0x51e   :  { %6557 = vst [vmem:[#allocation115_spill] sm:$0xff] %v5646_v24  ;;  %v5651_v44 = vcvt.s32.f32 %v2408_v54  ;;  %6558 = vst [vmem:[#allocation116_spill] sm:$0xff] %v5654_v58  ;;  %vm2098_vm4 = vcmp.eq.f32.partialorder %v5454_v18, %v2056_v22  ;;  %2369 = vmin.xlane.f32.xlu0 %v5646_v24  ;;  %v2394_v26 = vshra.s32 %v5654_v58, 16 }
 0x51f   :  { %v5660_v39 = vsel %vm2098_vm4, %v6492_v25, 128  ;;  %v2054_v49 = vpop.xlane.xlu0 %2053 }
 0x520   :  { %6559 = vst [vmem:[#allocation117_spill] sm:$0xff] %v5660_v39  ;;  %v2436_v51 = vshra.s32 %v5660_v39, 16  ;;  %vm2097_vm5 = vcmp.eq.f32.partialorder %v5458_v17, %v2054_v49  ;;  %v5664_v37 = vcvt.s32.f32 %v2394_v26  ;;  %2411 = vmin.xlane.f32.xlu1 %v5651_v44 }
 0x521   :  { %v5667_v54 = vsel %vm2097_vm5, %v6492_v25, 128  ;;  %v2060_v18 = vpop.xlane.xlu1 %2059 }
 0x522   :  { %v5670_v22 = vcvt.s32.f32 %v2436_v51  ;;  %v2422_v24 = vshra.s32 %v5667_v54, 16  ;;  %vm2100_vm6 = vcmp.eq.f32.partialorder %v5462_v60, %v2060_v18  ;;  %2397 = vmin.xlane.f32.xlu0 %v5664_v37 }
 0x523   :  { %v2058_v58 = vpop.xlane.xlu0 %2057  ;;  %v5678_v17 = vsel %vm2100_vm6, %v6492_v25, 128 }
 0x524   :  { %6560 = vst [vmem:[#allocation118_spill] sm:$0xff] %v5670_v22  ;;  %v5675_v39 = vcvt.s32.f32 %v2422_v24  ;;  %6561 = vst [vmem:[#allocation119_spill] sm:$0xff] %v5678_v17  ;;  %vm2099_vm7 = vcmp.eq.f32.partialorder %v5466_v9, %v2058_v58  ;;  %v2464_v26 = vshra.s32 %v5678_v17, 16  ;;  %2439 = vmin.xlane.f32.xlu1 %v5670_v22 }
 0x525   :  { %v5683_v49 = vsel %vm2099_vm7, %v6492_v25, 128  ;;  %v2064_v51 = vpop.xlane.xlu1 %2063 }
 0x526   :  { %6562 = vst [vmem:[#allocation120_spill] sm:$0xff] %v5683_v49  ;;  %v2450_v60 = vshra.s32 %v5683_v49, 16  ;;  %vm2102_vm8 = vcmp.eq.f32.partialorder %v5470_v11, %v2064_v51  ;;  %v5688_v18 = vcvt.s32.f32 %v2464_v26  ;;  %2425 = vmin.xlane.f32.xlu0 %v5675_v39 }
 0x527   :  { %v5691_v24 = vsel %vm2102_vm8, %v6492_v25, 128  ;;  %v2062_v9 = vpop.xlane.xlu0 %2061 }
 0x528   :  { %v5694_v58 = vcvt.s32.f32 %v2450_v60  ;;  %v2492_v17 = vshra.s32 %v5691_v24, 16  ;;  %vm2101_vm9 = vcmp.eq.f32.partialorder %v5474_v1, %v2062_v9  ;;  %2467 = vmin.xlane.f32.xlu1 %v5688_v18 }
 0x529   :  { %v2068_v22 = vpop.xlane.xlu1 %2067  ;;  %v5702_v11 = vsel %vm2101_vm9, %v6492_v25, 128 }
 0x52a   :  { %6563 = vst [vmem:[#allocation121_spill] sm:$0xff] %v5694_v58  ;;  %v5699_v49 = vcvt.s32.f32 %v2492_v17  ;;  %6565 = vst [vmem:[#allocation123_spill] sm:$0xff] %v5702_v11  ;;  %vm2104_vm10 = vcmp.eq.f32.partialorder %v5478_v53, %v2068_v22  ;;  %v2478_v26 = vshra.s32 %v5702_v11, 16  ;;  %2453 = vmin.xlane.f32.xlu0 %v5694_v58 }
 0x52b   :  { %v5707_v51 = vsel %vm2104_vm10, %v6492_v25, 128  ;;  %v2066_v60 = vpop.xlane.xlu0 %2065 }
 0x52c   :  { %6564 = vst [vmem:[#allocation122_spill] sm:$0xff] %v5699_v49  ;;  %6566 = vst [vmem:[#allocation124_spill] sm:$0xff] %v5707_v51  ;;  %v2520_v1 = vshra.s32 %v5707_v51, 16  ;;  %vm2103_vm11 = vcmp.eq.f32.partialorder %v5482_v50, %v2066_v60  ;;  %v5712_v9 = vcvt.s32.f32 %v2478_v26  ;;  %2495 = vmin.xlane.f32.xlu1 %v5699_v49 }
 0x52d   :  { %v5715_v17 = vsel %vm2103_vm11, %v6492_v25, 128  ;;  %v2072_v53 = vpop.xlane.xlu1 %2071 }
 0x52e   :  { %6567 = vst [vmem:[#allocation125_spill] sm:$0xff] %v5712_v9  ;;  %6568 = vst [vmem:[#allocation126_spill] sm:$0xff] %v5715_v17  ;;  %v5718_v22 = vcvt.s32.f32 %v2520_v1  ;;  %v2506_v11 = vshra.s32 %v5715_v17, 16  ;;  %vm2106_vm12 = vcmp.eq.f32.partialorder %v5486_v36, %v2072_v53  ;;  %2481 = vmin.xlane.f32.xlu0 %v5712_v9 }
 0x52f   :  { %v2070_v58 = vpop.xlane.xlu0 %2069  ;;  %v5726_v50 = vsel %vm2106_vm12, %v6492_v25, 128 }
 0x530   :  { %6569 = vst [vmem:[#allocation127_spill] sm:$0xff] %v5718_v22  ;;  %v5723_v51 = vcvt.s32.f32 %v2506_v11  ;;  %6571 = vst [vmem:[#allocation129_spill] sm:$0xff] %v5726_v50  ;;  %vm2105_vm13 = vcmp.eq.f32.partialorder %v5490_v31, %v2070_v58  ;;  %v2548_v26 = vshra.s32 %v5726_v50, 16  ;;  %2523 = vmin.xlane.f32.xlu1 %v5718_v22 }
 0x531   :  { %v5731_v60 = vsel %vm2105_vm13, %v6492_v25, 128  ;;  %v2076_v1 = vpop.xlane.xlu1 %2075 }
 0x532   :  { %6570 = vst [vmem:[#allocation128_spill] sm:$0xff] %v5723_v51  ;;  %6572 = vst [vmem:[#allocation130_spill] sm:$0xff] %v5731_v60  ;;  %v2534_v36 = vshra.s32 %v5731_v60, 16  ;;  %vm2108_vm14 = vcmp.eq.f32.partialorder %v5494_v40, %v2076_v1  ;;  %2509 = vmin.xlane.f32.xlu0 %v5723_v51  ;;  %v5740_v9 = vcvt.s32.f32 %v2548_v26 }
 0x533   :  { %v5737_v11 = vsel %vm2108_vm14, %v6492_v25, 128  ;;  %v2074_v53 = vpop.xlane.xlu0 %2073 }
 0x534   :  { %6573 = vst [vmem:[#allocation131_spill] sm:$0xff] %v5737_v11  ;;  %6574 = vst [vmem:[#allocation132_spill] sm:$0xff] %v5740_v9  ;;  %v5742_v31 = vcvt.s32.f32 %v2534_v36  ;;  %v2576_v58 = vshra.s32 %v5737_v11, 16  ;;  %vm2107_vm15 = vcmp.eq.f32.partialorder %v5498_v45, %v2074_v53  ;;  %2551 = vmin.xlane.f32.xlu1 %v5740_v9  ;;  %v6579_v36 = vld [vmem:[#allocation18_spill] sm:$0xff]  ;;  %v6580_v53 = vld [vmem:[#allocation20_spill] sm:$0xff] }
 0x535   :  { %v5748_v60 = vsel %vm2107_vm15, %v6492_v25, 128  ;;  %v1484_v45 = vsub.f32 %v5307_v35, %v6579_v36  ;;  %v1485_v9 = vsub.f32 %v5304_v6, %v6580_v53  ;;  %v6581_v25 = vld [vmem:[#allocation22_spill] sm:$0xff]  ;;  %v6584_v36 = vld [vmem:[#allocation27_spill] sm:$0xff]  ;;  %v6585_v6 = vld [vmem:[#allocation28_spill] sm:$0xff] }
 0x536   :  { %6575 = vst [vmem:[#allocation133_spill] sm:$0xff] %v5742_v31  ;;  %6576 = vst [vmem:[#allocation134_spill] sm:$0xff] %v5748_v60  ;;  %v5750_v40 = vcvt.s32.f32 %v2576_v58  ;;  %v2562_v1 = vshra.s32 %v5748_v60, 16  ;;  %2537 = vmin.xlane.f32.xlu0 %v5742_v31  ;;  %v1486_v58 = vsub.f32 %v5311_v19, %v6581_v25  ;;  %v6582_v31 = vld [vmem:[#allocation23_spill] sm:$0xff]  ;;  %v1489_v35 = vsub.f32 %v5313_v8, %v6584_v36 }
 0x537   :  { %v1516_v11 = vmul.f32 %v1484_v45, %v1484_v45  ;;  %v1517_v51 = vmul.f32 %v1485_v9, %v1485_v9  ;;  %v1490_v25 = vsub.f32 %v5319_v7, %v6585_v6  ;;  %v2155_v9 = vand.u32 65535, %v5504_v57 }
 0x538   :  { %6577 = vst [vmem:[#allocation135_spill] sm:$0xff] %v5750_v40  ;;  %2579 = vmin.xlane.f32.xlu1 %v5750_v40  ;;  %v5755_v26 = vcvt.s32.f32 %v2562_v1  ;;  %v1518_v60 = vmul.f32 %v1486_v58, %v1486_v58  ;;  %v1487_v40 = vsub.f32 %v5309_v59, %v6582_v31  ;;  %v6583_v1 = vld [vmem:[#allocation25_spill] sm:$0xff] }
 0x539   :  { %v1548_v22 = vadd.f32 %v1517_v51, %v1516_v11  ;;  %v1488_v50 = vsub.f32 %v5315_v43, %v6583_v1  ;;  %v2141_v51 = vand.u32 65535, %v5509_v14  ;;  %v1521_v11 = vmul.f32 %v1489_v35, %v1489_v35 }
 0x53a   :  { %6578 = vst [vmem:[#allocation136_spill] sm:$0xff] %v5755_v26  ;;  %2565 = vmin.xlane.f32.xlu0 %v5755_v26  ;;  %v1519_v17 = vmul.f32 %v1487_v40, %v1487_v40  ;;  %v1522_v31 = vmul.f32 %v1490_v25, %v1490_v25  ;;  %v2157_v58 = vcvt.s32.f32 %v2155_v9  ;;  %v2183_v14 = vand.u32 65535, %v5520_v0 }
 0x53b   :  { %v1549_v26 = vadd.f32 %v1548_v22, %v1518_v60  ;;  %v1520_v49 = vmul.f32 %v1488_v50, %v1488_v50  ;;  %v6586_v22 = vld [vmem:[#allocation30_spill] sm:$0xff]  ;;  %v6587_v60 = vld [vmem:[#allocation32_spill] sm:$0xff]  ;;  %v2143_v40 = vcvt.s32.f32 %v2141_v51 }
 0x53c   :  { %v1491_v50 = vsub.f32 %v5317_v10, %v6586_v22  ;;  %v1492_v6 = vsub.f32 %v5323_v27, %v6587_v60 }
 0x53d   :  { %v1550_v53 = vadd.f32 %v1549_v26, %v1519_v17 }
 0x53e   :  { %v1523_v1 = vmul.f32 %v1491_v50, %v1491_v50  ;;  %v1524_v36 = vmul.f32 %v1492_v6, %v1492_v6  ;;  %v6590_v6 = vld [vmem:[#allocation37_spill] sm:$0xff] }
 0x53f   :  { %v1551_v45 = vadd.f32 %v1550_v53, %v1520_v49  ;;  %v6588_v53 = vld [vmem:[#allocation33_spill] sm:$0xff] }
 0x540   :  { %v1493_v25 = vsub.f32 %v5321_v41, %v6588_v53 }
 0x541   :  { %v1552_v17 = vadd.f32 %v1551_v45, %v1521_v11  ;;  %v6589_v45 = vld [vmem:[#allocation35_spill] sm:$0xff]  ;;  %v2185_v11 = vcvt.s32.f32 %v2183_v14  ;;  %v2197_v14 = vand.u32 65535, %v5541_v29 }
 0x542   :  { %v1494_v51 = vsub.f32 %v5327_v2, %v6589_v45 }
 0x543   :  { %v1553_v35 = vadd.f32 %v1552_v17, %v1522_v31  ;;  %v2211_v17 = vand.u32 65535, %v5536_v15 }
 0x544   :  { %v1526_v50 = vmul.f32 %v1494_v51, %v1494_v51  ;;  %v6593_v51 = vld [vmem:[#allocation42_spill] sm:$0xff] }
 0x545   :  { %v1554_v9 = vadd.f32 %v1553_v35, %v1523_v1  ;;  %v2213_v1 = vcvt.s32.f32 %v2211_v17 }
 0x569   :  { %v5774_v59 = vpop.xlane.xlu1 %2159 }
 0x56a   :  { %vm2161_vm0 = vcmp.eq.f32.partialorder %v5511_v16, %v5774_v59  ;;  %v2169_v16 = vand.u32 65535, %v5525_v47  ;;  %v1525_v47 = vmul.f32 %v1493_v25, %v1493_v25 }
 0x56b   :  { %v5782_v57 = vpop.xlane.xlu0 %2145  ;;  %v2162_v49 = vsel %vm2161_vm0, %v2157_v58, inf }
 0x56c   :  { %vm2147_vm1 = vcmp.eq.f32.partialorder %v5514_v52, %v5782_v57  ;;  %2163 = vmin.xlane.f32.xlu1 %v2162_v49  ;;  %v1555_v52 = vadd.f32 %v1554_v9, %v1524_v36  ;;  %v2171_v0 = vcvt.s32.f32 %v2169_v16  ;;  %v2199_v16 = vcvt.s32.f32 %v2197_v14  ;;  %v6592_v9 = vld [vmem:[#allocation40_spill] sm:$0xff]  ;;  %v6596_v14 = vld [vmem:[#allocation19_spill] sm:$0xff] }
 0x56d   :  { %v2148_v26 = vsel %vm2147_vm1, %v2143_v40, inf  ;;  %v1495_v40 = vsub.f32 %v5325_v55, %v6590_v6  ;;  %v1497_v45 = vsub.f32 %v5329_v61, %v6592_v9  ;;  %v6595_v6 = vld [vmem:[#allocation87_spill] sm:$0xff] }
 0x56e   :  { %2149 = vmin.xlane.f32.xlu0 %v2148_v26  ;;  %v1556_v49 = vadd.f32 %v1555_v52, %v1525_v47  ;;  %v2239_v52 = vand.u32 65535, %v5552_v5 }
 0x56f   :  { %v1529_v47 = vmul.f32 %v1497_v45, %v1497_v45 }
 0x570   :  { %v1557_v26 = vadd.f32 %v1556_v49, %v1526_v50  ;;  %v2241_v17 = vcvt.s32.f32 %v2239_v52  ;;  %v6601_v52 = vld [vmem:[#allocation89_spill] sm:$0xff] }
 0x571   :  { %v5792_v58 = vpop.xlane.xlu1 %2187 }
 0x572   :  { %vm2189_vm2 = vcmp.eq.f32.partialorder %v5527_v42, %v5792_v58  ;;  %v6591_v42 = vld [vmem:[#allocation38_spill] sm:$0xff] }
 0x573   :  { %v5796_v31 = vpop.xlane.xlu0 %2173  ;;  %v2190_v22 = vsel %vm2189_vm2, %v2185_v11, inf  ;;  %v1496_v35 = vsub.f32 %v5331_v46, %v6591_v42  ;;  %v1498_v11 = vsub.f32 %v5335_v62, %v6593_v51 }
 0x574   :  { %vm2175_vm3 = vcmp.eq.f32.partialorder %v5530_v33, %v5796_v31  ;;  %2191 = vmin.xlane.f32.xlu1 %v2190_v22  ;;  %v1527_v33 = vmul.f32 %v1495_v40, %v1495_v40  ;;  %v2225_v22 = vand.u32 65535, %v5557_v56 }
 0x575   :  { %v2176_v60 = vsel %vm2175_vm3, %v2171_v0, inf  ;;  %v1528_v15 = vmul.f32 %v1496_v35, %v1496_v35  ;;  %v1530_v50 = vmul.f32 %v1498_v11, %v1498_v11  ;;  %v6599_v11 = vld [vmem:[#allocation106_spill] sm:$0xff] }
 0x576   :  { %2177 = vmin.xlane.f32.xlu0 %v2176_v60  ;;  %v1558_v29 = vadd.f32 %v1557_v26, %v1527_v33  ;;  %v2227_v42 = vcvt.s32.f32 %v2225_v22  ;;  %v6597_v26 = vld [vmem:[#allocation90_spill] sm:$0xff]  ;;  %v2267_v33 = vand.u32 65535, %v5568_v12 }
 0x578   :  { %v1559_v0 = vadd.f32 %v1558_v29, %v1528_v15  ;;  %v2269_v29 = vcvt.s32.f32 %v2267_v33 }
 0x579   :  { %v5806_v36 = vpop.xlane.xlu1 %2215 }
 0x57a   :  { %vm2217_vm4 = vcmp.eq.f32.partialorder %v5543_v4, %v5806_v36  ;;  %v1560_v49 = vadd.f32 %v1559_v0, %v1529_v47 }
 0x57b   :  { %v5810_v53 = vpop.xlane.xlu0 %2201  ;;  %v2218_v25 = vsel %vm2217_vm4, %v2213_v1, inf  ;;  %v1500_v1 = vsub.f32 %v6597_v26, %v6596_v14 }
 0x57c   :  { %vm2203_vm5 = vcmp.eq.f32.partialorder %v5546_v3, %v5810_v53  ;;  %2219 = vmin.xlane.f32.xlu1 %v2218_v25  ;;  %v6594_v3 = vld [vmem:[#allocation43_spill] sm:$0xff]  ;;  %v1561_v56 = vadd.f32 %v1560_v49, %v1530_v50  ;;  %v6602_v50 = vld [vmem:[#allocation24_spill] sm:$0xff] }
 0x57d   :  { %v2204_v4 = vsel %vm2203_vm5, %v2199_v16, inf  ;;  %v1499_v40 = vsub.f32 %v6595_v6, %v6594_v3  ;;  %v6598_v16 = vld [vmem:[#allocation105_spill] sm:$0xff]  ;;  %v1532_v9 = vmul.f32 %v1500_v1, %v1500_v1 }
 0x57e   :  { %2205 = vmin.xlane.f32.xlu0 %v2204_v4  ;;  %v2253_v25 = vand.u32 65535, %v6598_v16  ;;  %v6607_v16 = vld [vmem:[#allocation91_spill] sm:$0xff] }
 0x580   :  { %v2255_v0 = vcvt.s32.f32 %v2253_v25 }
 0x581   :  { %v5820_v60 = vpop.xlane.xlu1 %2243 }
 0x582   :  { %vm2245_vm6 = vcmp.eq.f32.partialorder %v5559_v38, %v5820_v60  ;;  %v1531_v38 = vmul.f32 %v1499_v40, %v1499_v40  ;;  %v2295_v40 = vand.u32 65535, %v5584_v34 }
 0x583   :  { %v5826_v35 = vpop.xlane.xlu0 %2229  ;;  %v2246_v5 = vsel %vm2245_vm6, %v2241_v17, inf  ;;  %v6603_v17 = vld [vmem:[#allocation92_spill] sm:$0xff] }
 0x584   :  { %vm2231_vm7 = vcmp.eq.f32.partialorder %v5562_v23, %v5826_v35  ;;  %2247 = vmin.xlane.f32.xlu1 %v2246_v5  ;;  %v1562_v45 = vadd.f32 %v1561_v56, %v1531_v38  ;;  %v6600_v23 = vld [vmem:[#allocation21_spill] sm:$0xff]  ;;  %v1502_v3 = vsub.f32 %v6603_v17, %v6602_v50  ;;  %v6604_v5 = vld [vmem:[#allocation107_spill] sm:$0xff]  ;;  %v2297_v33 = vcvt.s32.f32 %v2295_v40  ;;  %v6605_v38 = vld [vmem:[#allocation108_spill] sm:$0xff] }
 0x585   :  { %v2232_v15 = vsel %vm2231_vm7, %v2227_v42, inf  ;;  %v1501_v4 = vsub.f32 %v6601_v52, %v6600_v23  ;;  %v2281_v56 = vand.u32 65535, %v6604_v5  ;;  %v6609_v23 = vld [vmem:[#allocation94_spill] sm:$0xff]  ;;  %v6610_v50 = vld [vmem:[#allocation109_spill] sm:$0xff] }
 0x586   :  { %2233 = vmin.xlane.f32.xlu0 %v2232_v15  ;;  %v1563_v47 = vadd.f32 %v1562_v45, %v1532_v9  ;;  %v1534_v14 = vmul.f32 %v1502_v3, %v1502_v3  ;;  %v2309_v3 = vand.u32 65535, %v6610_v50 }
 0x587   :  { %v1533_v42 = vmul.f32 %v1501_v4, %v1501_v4  ;;  %v2283_v9 = vcvt.s32.f32 %v2281_v56  ;;  %v6611_v56 = vld [vmem:[#allocation110_spill] sm:$0xff] }
 0x589   :  { %v5834_v51 = vpop.xlane.xlu1 %2271  ;;  %v1564_v1 = vadd.f32 %v1563_v47, %v1533_v42 }
 0x58a   :  { %vm2273_vm8 = vcmp.eq.f32.partialorder %v6599_v11, %v5834_v51  ;;  %v6608_v11 = vld [vmem:[#allocation29_spill] sm:$0xff] }
 0x58b   :  { %v5840_v22 = vpop.xlane.xlu0 %2257  ;;  %v2274_v12 = vsel %vm2273_vm8, %v2269_v29, inf  ;;  %v1565_v29 = vadd.f32 %v1564_v1, %v1534_v14  ;;  %v1504_v4 = vsub.f32 %v6609_v23, %v6608_v11  ;;  %v6613_v14 = vld [vmem:[#allocation93_spill] sm:$0xff]  ;;  %v2351_v11 = vand.u32 65535, %v5616_v30  ;;  %v6621_v30 = vld [vmem:[#allocation114_spill] sm:$0xff] }
 0x58c   :  { %vm2259_vm9 = vcmp.eq.f32.partialorder %v5578_v13, %v5840_v22  ;;  %2275 = vmin.xlane.f32.xlu1 %v2274_v12  ;;  %v6606_v13 = vld [vmem:[#allocation26_spill] sm:$0xff] }
 0x58d   :  { %v2260_v49 = vsel %vm2259_vm9, %v2255_v0, inf  ;;  %v1503_v25 = vsub.f32 %v6607_v16, %v6606_v13  ;;  %v2323_v0 = vand.u32 65535, %v5600_v48  ;;  %v1536_v40 = vmul.f32 %v1504_v4, %v1504_v4  ;;  %v6614_v13 = vld [vmem:[#allocation111_spill] sm:$0xff] }
 0x58e   :  { %2261 = vmin.xlane.f32.xlu0 %v2260_v49 }
 0x58f   :  { %v1535_v47 = vmul.f32 %v1503_v25, %v1503_v25  ;;  %v2325_v42 = vcvt.s32.f32 %v2323_v0 }
 0x591   :  { %v5848_v15 = vpop.xlane.xlu1 %2299  ;;  %v1566_v49 = vadd.f32 %v1565_v29, %v1535_v47 }
 0x592   :  { %vm2301_vm10 = vcmp.eq.f32.partialorder %v6605_v38, %v5848_v15 }
 0x593   :  { %v5854_v45 = vpop.xlane.xlu0 %2285  ;;  %v2302_v34 = vsel %vm2301_vm10, %v2297_v33, inf  ;;  %v2311_v33 = vcvt.s32.f32 %v2309_v3  ;;  %v1567_v25 = vadd.f32 %v1566_v49, %v1536_v40  ;;  %v6619_v40 = vld [vmem:[#allocation36_spill] sm:$0xff]  ;;  %v6620_v49 = vld [vmem:[#allocation95_spill] sm:$0xff] }
 0x594   :  { %vm2287_vm11 = vcmp.eq.f32.partialorder %v5594_v20, %v5854_v45  ;;  %2303 = vmin.xlane.f32.xlu1 %v2302_v34  ;;  %v6612_v20 = vld [vmem:[#allocation31_spill] sm:$0xff]  ;;  %v6616_v34 = vld [vmem:[#allocation96_spill] sm:$0xff] }
 0x595   :  { %v2288_v12 = vsel %vm2287_vm11, %v2283_v9, inf  ;;  %v1505_v1 = vsub.f32 %v6613_v14, %v6612_v20  ;;  %v6615_v9 = vld [vmem:[#allocation34_spill] sm:$0xff] }
 0x596   :  { %2289 = vmin.xlane.f32.xlu0 %v2288_v12  ;;  %v1506_v29 = vsub.f32 %v6616_v34, %v6615_v9  ;;  %v6617_v12 = vld [vmem:[#allocation112_spill] sm:$0xff] }
 0x597   :  { %v1537_v0 = vmul.f32 %v1505_v1, %v1505_v1  ;;  %v2337_v47 = vand.u32 65535, %v6617_v12 }
 0x598   :  { %v1538_v50 = vmul.f32 %v1506_v29, %v1506_v29  ;;  %v6622_v29 = vld [vmem:[#allocation39_spill] sm:$0xff] }
 0x599   :  { %v5862_v5 = vpop.xlane.xlu1 %2327  ;;  %v1568_v3 = vadd.f32 %v1567_v25, %v1537_v0  ;;  %v2339_v9 = vcvt.s32.f32 %v2337_v47 }
 0x59a   :  { %vm2329_vm12 = vcmp.eq.f32.partialorder %v6611_v56, %v5862_v5  ;;  %v2353_v56 = vcvt.s32.f32 %v2351_v11  ;;  %v6623_v11 = vld [vmem:[#allocation98_spill] sm:$0xff] }
 0x59b   :  { %v5868_v38 = vpop.xlane.xlu0 %2313  ;;  %v2330_v48 = vsel %vm2329_vm12, %v2325_v42, inf  ;;  %v2379_v42 = vand.u32 65535, %v5630_v32  ;;  %v1569_v25 = vadd.f32 %v1568_v3, %v1538_v50  ;;  %v1508_v32 = vsub.f32 %v6623_v11, %v6622_v29  ;;  %v6626_v50 = vld [vmem:[#allocation115_spill] sm:$0xff]  ;;  %v6627_v29 = vld [vmem:[#allocation117_spill] sm:$0xff] }
 0x59c   :  { %vm2315_vm13 = vcmp.eq.f32.partialorder %v6614_v13, %v5868_v38  ;;  %2331 = vmin.xlane.f32.xlu1 %v2330_v48  ;;  %v6618_v48 = vld [vmem:[#allocation113_spill] sm:$0xff]  ;;  %v1507_v13 = vsub.f32 %v6620_v49, %v6619_v40 }
 0x59d   :  { %v2316_v4 = vsel %vm2315_vm13, %v2311_v33, inf  ;;  %v2365_v33 = vand.u32 65535, %v6621_v30  ;;  %v2381_v12 = vcvt.s32.f32 %v2379_v42 }
 0x59e   :  { %2317 = vmin.xlane.f32.xlu0 %v2316_v4  ;;  %v1539_v47 = vmul.f32 %v1507_v13, %v1507_v13 }
 0x59f   :  { %v2367_v40 = vcvt.s32.f32 %v2365_v33  ;;  %v6629_v33 = vld [vmem:[#allocation41_spill] sm:$0xff] }
 0x5a0   :  { %v1570_v42 = vadd.f32 %v1569_v25, %v1539_v47  ;;  %v6632_v47 = vld [vmem:[#allocation44_spill] sm:$0xff] }
 0x5a1   :  { %v5876_v20 = vpop.xlane.xlu1 %2355 }
 0x5a2   :  { %vm2357_vm14 = vcmp.eq.f32.partialorder %v6618_v48, %v5876_v20  ;;  %v2407_v48 = vand.u32 65535, %v5644_v28 }
 0x5a3   :  { %v5884_v4 = vpop.xlane.xlu0 %2341  ;;  %v2358_v1 = vsel %vm2357_vm14, %v2353_v56, inf }
 0x5a4   :  { %vm2343_vm15 = vcmp.eq.f32.partialorder %v5627_v21, %v5884_v4  ;;  %2359 = vmin.xlane.f32.xlu1 %v2358_v1  ;;  %v6625_v21 = vld [vmem:[#allocation116_spill] sm:$0xff]  ;;  %v2409_v1 = vcvt.s32.f32 %v2407_v48 }
 0x5a5   :  { %v2344_v0 = vsel %vm2343_vm15, %v2339_v9, inf  ;;  %v5891_v6 = vpop.xlane.xlu1 %2383  ;;  %v2393_v30 = vand.u32 65535, %v6625_v21  ;;  %v1540_v9 = vmul.f32 %v1508_v32, %v1508_v32  ;;  %v6633_v48 = vld [vmem:[#allocation100_spill] sm:$0xff] }
 0x5a6   :  { %2345 = vmin.xlane.f32.xlu0 %v2344_v0  ;;  %vm2385_vm0 = vcmp.eq.f32.partialorder %v5641_v63, %v5891_v6  ;;  %v2435_v0 = vand.u32 65535, %v6627_v29  ;;  %v6630_v63 = vld [vmem:[#allocation97_spill] sm:$0xff] }
 0x5a7   :  { %v5895_v56 = vpop.xlane.xlu0 %2369  ;;  %v2386_v3 = vsel %vm2385_vm0, %v2381_v12, inf  ;;  %v1509_v62 = vsub.f32 %v6630_v63, %v6629_v33  ;;  %v2395_v21 = vcvt.s32.f32 %v2393_v30  ;;  %v1571_v32 = vadd.f32 %v1570_v42, %v1540_v9  ;;  %v6637_v9 = vld [vmem:[#allocation120_spill] sm:$0xff] }
 0x5a8   :  { %6624 = vst [vmem:[#allocation18_spill] sm:$0xff] %v5895_v56  ;;  %vm2371_vm1 = vcmp.eq.f32.partialorder %v6626_v50, %v5895_v56  ;;  %2387 = vmin.xlane.f32.xlu1 %v2386_v3  ;;  %v2421_v50 = vand.u32 65535, %v5667_v54  ;;  %v2437_v3 = vcvt.s32.f32 %v2435_v0  ;;  %v6636_v54 = vld [vmem:[#allocation118_spill] sm:$0xff]  ;;  %v2449_v42 = vand.u32 65535, %v6637_v9 }
 0x5a9   :  { %v2372_v28 = vsel %vm2371_vm1, %v2367_v40, inf  ;;  %v5901_v13 = vpop.xlane.xlu1 %2411  ;;  %v1510_v40 = vsub.f32 %v6633_v48, %v6632_v47  ;;  %v1541_v30 = vmul.f32 %v1509_v62, %v1509_v62  ;;  %v6645_v9 = vld [vmem:[#allocation102_spill] sm:$0xff] }
 0x5aa   :  { %6628 = vst [vmem:[#allocation20_spill] sm:$0xff] %v5901_v13  ;;  %2373 = vmin.xlane.f32.xlu0 %v2372_v28  ;;  %vm2413_vm2 = vcmp.eq.f32.partialorder %v5651_v44, %v5901_v13  ;;  %v6634_v28 = vld [vmem:[#allocation119_spill] sm:$0xff] }
 0x5ab   :  { %v5908_v12 = vpop.xlane.xlu0 %2397  ;;  %v2414_v25 = vsel %vm2413_vm2, %v2409_v1, inf  ;;  %v2463_v29 = vand.u32 65535, %v6634_v28  ;;  %v2423_v1 = vcvt.s32.f32 %v2421_v50  ;;  %v1542_v56 = vmul.f32 %v1510_v40, %v1510_v40  ;;  %v6640_v28 = vld [vmem:[#allocation45_spill] sm:$0xff]  ;;  %v6642_v40 = vld [vmem:[#allocation123_spill] sm:$0xff] }
 0x5ac   :  { %6631 = vst [vmem:[#allocation22_spill] sm:$0xff] %v5908_v12  ;;  %vm2399_vm3 = vcmp.eq.f32.partialorder %v5664_v37, %v5908_v12  ;;  %2415 = vmin.xlane.f32.xlu1 %v2414_v25  ;;  %v1572_v37 = vadd.f32 %v1571_v32, %v1541_v30  ;;  %v2477_v32 = vand.u32 65535, %v6642_v40 }
 0x5ad   :  { %v5915_v33 = vpop.xlane.xlu1 %2439  ;;  %v2400_v44 = vsel %vm2399_vm3, %v2395_v21, inf  ;;  %v2465_v0 = vcvt.s32.f32 %v2463_v29  ;;  %v2491_v21 = vand.u32 65535, %v5691_v24  ;;  %v6644_v29 = vld [vmem:[#allocation46_spill] sm:$0xff] }
 0x5ae   :  { %6635 = vst [vmem:[#allocation23_spill] sm:$0xff] %v5915_v33  ;;  %vm2441_vm4 = vcmp.eq.f32.partialorder %v6636_v54, %v5915_v33  ;;  %2401 = vmin.xlane.f32.xlu0 %v2400_v44  ;;  %v6641_v44 = vld [vmem:[#allocation99_spill] sm:$0xff]  ;;  %v1573_v54 = vadd.f32 %v1572_v37, %v1542_v56  ;;  %v1512_v24 = vsub.f32 %v6645_v9, %v6644_v29  ;;  %v6650_v56 = vld [vmem:[#allocation126_spill] sm:$0xff] }
 0x5af   :  { %v5920_v13 = vpop.xlane.xlu0 %2425  ;;  %v2442_v47 = vsel %vm2441_vm4, %v2437_v3, inf  ;;  %v1511_v50 = vsub.f32 %v6641_v44, %v6640_v28  ;;  %v2451_v3 = vcvt.s32.f32 %v2449_v42  ;;  %v6647_v28 = vld [vmem:[#allocation124_spill] sm:$0xff]  ;;  %v2505_v37 = vand.u32 65535, %v6650_v56  ;;  %v6657_v56 = vld [vmem:[#allocation127_spill] sm:$0xff] }
 0x5b0   :  { %6638 = vst [vmem:[#allocation25_spill] sm:$0xff] %v5920_v13  ;;  %vm2427_vm5 = vcmp.eq.f32.partialorder %v5675_v39, %v5920_v13  ;;  %2443 = vmin.xlane.f32.xlu1 %v2442_v47  ;;  %v6646_v47 = vld [vmem:[#allocation121_spill] sm:$0xff]  ;;  %v2519_v13 = vand.u32 65535, %v6647_v28 }
 0x5b1   :  { %v5925_v62 = vpop.xlane.xlu1 %2467  ;;  %v2428_v25 = vsel %vm2427_vm5, %v2423_v1, inf  ;;  %v2493_v1 = vcvt.s32.f32 %v2491_v21  ;;  %v1543_v42 = vmul.f32 %v1511_v50, %v1511_v50  ;;  %v6652_v21 = vld [vmem:[#allocation125_spill] sm:$0xff] }
 0x5b2   :  { %6639 = vst [vmem:[#allocation27_spill] sm:$0xff] %v5925_v62  ;;  %vm2469_vm6 = vcmp.eq.f32.partialorder %v5688_v18, %v5925_v62  ;;  %2429 = vmin.xlane.f32.xlu0 %v2428_v25  ;;  %v6649_v25 = vld [vmem:[#allocation122_spill] sm:$0xff]  ;;  %v1544_v62 = vmul.f32 %v1512_v24, %v1512_v24  ;;  %v6653_v28 = vld [vmem:[#allocation129_spill] sm:$0xff] }
 0x5b3   :  { %v5932_v30 = vpop.xlane.xlu0 %2453  ;;  %v2470_v39 = vsel %vm2469_vm6, %v2465_v0, inf  ;;  %v2479_v0 = vcvt.s32.f32 %v2477_v32  ;;  %v6658_v24 = vld [vmem:[#allocation130_spill] sm:$0xff] }
 0x5b4   :  { %6643 = vst [vmem:[#allocation28_spill] sm:$0xff] %v5932_v30  ;;  %vm2455_vm7 = vcmp.eq.f32.partialorder %v6646_v47, %v5932_v30  ;;  %2471 = vmin.xlane.f32.xlu1 %v2470_v39  ;;  %v1574_v47 = vadd.f32 %v1573_v54, %v1543_v42  ;;  %v2521_v39 = vcvt.s32.f32 %v2519_v13  ;;  %v2533_v54 = vand.u32 65535, %v6658_v24  ;;  %v6660_v13 = vld [vmem:[#allocation48_spill] sm:$0xff] }
 0x5b5   :  { %v5939_v33 = vpop.xlane.xlu1 %2495  ;;  %v2456_v18 = vsel %vm2455_vm7, %v2451_v3, inf  ;;  %v2547_v3 = vand.u32 65535, %v6653_v28  ;;  %v6664_v24 = vld [vmem:[#allocation132_spill] sm:$0xff] }
 0x5b6   :  { %6648 = vst [vmem:[#allocation30_spill] sm:$0xff] %v5939_v33  ;;  %vm2497_vm8 = vcmp.eq.f32.partialorder %v6649_v25, %v5939_v33  ;;  %2457 = vmin.xlane.f32.xlu0 %v2456_v18  ;;  %v6655_v25 = vld [vmem:[#allocation47_spill] sm:$0xff]  ;;  %v6656_v18 = vld [vmem:[#allocation101_spill] sm:$0xff]  ;;  %v6662_v33 = vld [vmem:[#allocation128_spill] sm:$0xff] }
 0x5b7   :  { %v5944_v40 = vpop.xlane.xlu0 %2481  ;;  %v2498_v29 = vsel %vm2497_vm8, %v2493_v1, inf  ;;  %v1513_v32 = vsub.f32 %v6656_v18, %v6655_v25  ;;  %v2507_v1 = vcvt.s32.f32 %v2505_v37 }
 0x5b8   :  { %6651 = vst [vmem:[#allocation32_spill] sm:$0xff] %v5944_v40  ;;  %vm2483_vm9 = vcmp.eq.f32.partialorder %v6652_v21, %v5944_v40  ;;  %2499 = vmin.xlane.f32.xlu1 %v2498_v29  ;;  %v1575_v29 = vadd.f32 %v1574_v47, %v1544_v62  ;;  %v6661_v40 = vld [vmem:[#allocation104_spill] sm:$0xff]  ;;  %v6665_v62 = vld [vmem:[#allocation134_spill] sm:$0xff] }
 0x5b9   :  { %v5949_v50 = vpop.xlane.xlu1 %2523  ;;  %v2484_v30 = vsel %vm2483_vm9, %v2479_v0, inf  ;;  %v1514_v28 = vsub.f32 %v6661_v40, %v6660_v13  ;;  %v6663_v0 = vld [vmem:[#allocation131_spill] sm:$0xff]  ;;  %v1545_v37 = vmul.f32 %v1513_v32, %v1513_v32  ;;  %v2561_v47 = vand.u32 65535, %v6665_v62 }
 0x5ba   :  { %6654 = vst [vmem:[#allocation33_spill] sm:$0xff] %v5949_v50  ;;  %vm2525_vm10 = vcmp.eq.f32.partialorder %v6657_v56, %v5949_v50  ;;  %2485 = vmin.xlane.f32.xlu0 %v2484_v30  ;;  %v2575_v25 = vand.u32 65535, %v6663_v0  ;;  %v2549_v30 = vcvt.s32.f32 %v2547_v3 }
 0x5bb   :  { %v5956_v42 = vpop.xlane.xlu0 %2509  ;;  %v2526_v21 = vsel %vm2525_vm10, %v2521_v39, inf  ;;  %v2535_v39 = vcvt.s32.f32 %v2533_v54  ;;  %v1546_v40 = vmul.f32 %v1514_v28, %v1514_v28  ;;  %v6670_v54 = vld [vmem:[#allocation135_spill] sm:$0xff]  ;;  %v2563_v28 = vcvt.s32.f32 %v2561_v47 }
 0x5bc   :  { %6659 = vst [vmem:[#allocation35_spill] sm:$0xff] %v5956_v42  ;;  %vm2511_vm11 = vcmp.eq.f32.partialorder %v6662_v33, %v5956_v42  ;;  %2527 = vmin.xlane.f32.xlu1 %v2526_v21  ;;  %v1576_v33 = vadd.f32 %v1575_v29, %v1545_v37  ;;  %v6666_v21 = vld [vmem:[#allocation133_spill] sm:$0xff]  ;;  %v2577_v32 = vcvt.s32.f32 %v2575_v25  ;;  %v6669_v42 = vld [vmem:[#allocation103_spill] sm:$0xff]  ;;  %v6671_v37 = vld [vmem:[#allocation136_spill] sm:$0xff] }
 0x5bd   :  { %v5963_v12 = vpop.xlane.xlu1 %2551  ;;  %v2512_v56 = vsel %vm2511_vm11, %v2507_v1, inf  ;;  %v6668_v1 = vld [vmem:[#allocation49_spill] sm:$0xff] }
 0x5be   :  { %vm2553_vm12 = vcmp.eq.f32.partialorder %v6664_v24, %v5963_v12  ;;  %2513 = vmin.xlane.f32.xlu0 %v2512_v56  ;;  %v1515_v24 = vsub.f32 %v6669_v42, %v6668_v1  ;;  %v1577_v29 = vadd.f32 %v1576_v33, %v1546_v40  ;;  %v6672_v40 = vld [vmem:[#allocation85_spill] sm:$0xff] }
 0x5bf   :  { %v5968_v50 = vpop.xlane.xlu0 %2537  ;;  %v2554_v13 = vsel %vm2553_vm12, %v2549_v30, inf }
 0x5c0   :  { %vm2539_vm13 = vcmp.eq.f32.partialorder %v6666_v21, %v5968_v50  ;;  %2555 = vmin.xlane.f32.xlu1 %v2554_v13  ;;  %v1547_v13 = vmul.f32 %v1515_v24, %v1515_v24  ;;  %v2152_v21 = vcvt.f32.s32 %v5782_v57  ;;  %v2194_v24 = vcvt.f32.s32 %v5792_v58 }
 0x5c1   :  { %v5972_v0 = vpop.xlane.xlu1 %2579  ;;  %v2540_v3 = vsel %vm2539_vm13, %v2535_v39, inf  ;;  %v2166_v39 = vcvt.f32.s32 %v5774_v59  ;;  %v2180_v57 = vcvt.f32.s32 %v5796_v31 }
 0x5c2   :  { %6667 = vst [vmem:[#allocation37_spill] sm:$0xff] %v5972_v0  ;;  %2541 = vmin.xlane.f32.xlu0 %v2540_v3  ;;  %vm2581_vm14 = vcmp.eq.f32.partialorder %v6670_v54, %v5972_v0  ;;  %v1578_v25 = vadd.f32 %v1577_v29, %v1547_v13  ;;  %v6674_v29 = vmov 0.0   ;;  %v2195_v58 = vshll.u32 %v2194_v24, 16 }
 0x5c3   :  { %v5978_v56 = vpop.xlane.xlu0 %2565  ;;  %v2582_v30 = vsel %vm2581_vm14, %v2577_v32, inf  ;;  %v2167_v1 = vshll.u32 %v2166_v39, 16  ;;  %v2153_v32 = vshll.u32 %v2152_v21, 16  ;;  %v2181_v31 = vshll.u32 %v2180_v57, 16 }
 0x5c4   :  { %2583 = vmin.xlane.f32.xlu1 %v2582_v30  ;;  %vm2567_vm15 = vcmp.eq.f32.partialorder %v6671_v37, %v5978_v56  ;;  %v6673_v30 = vld [vmem:[#allocation50_spill] sm:$0xff]  ;;  %v6675_v37 = vld [vmem:[#allocation84_spill] sm:$0xff]  ;;  %v2250_v57 = vcvt.f32.s32 %v5820_v60 }
 0x5c5   :  { %v2568_v62 = vsel %vm2567_vm15, %v2563_v28, inf }
 0x5c6   :  { %2569 = vmin.xlane.f32.xlu0 %v2568_v62  ;;  %v2251_v60 = vshll.u32 %v2250_v57, 16 }
 0x5ca   :  { %1579 = vadd.xlane.f32.xlu0 %v1578_v25 }
 0x5f5   :  { %v2164_v3 = vpop.xlane.xlu1 %2163 }
 0x5f6   :  { %v2165_v54 = vcvt.f32.s32 %v2164_v3  ;;  %v2222_v3 = vcvt.f32.s32 %v5806_v36 }
 0x5f7   :  { %v2150_v0 = vpop.xlane.xlu0 %2149  ;;  %1420 = vxpose.xlu1.b32.start [1/16] %v6597_v26, 128  ;;  %1388 = vxpose.xlu0.b32.start [1/16] %v6672_v40, 128 }
 0x5f8   :  { %v2168_v47 = vadd.s32 %v2167_v1, %v2165_v54  ;;  %v2151_v33 = vcvt.f32.s32 %v2150_v0  ;;  %v6676_v0 = vmov 1.0   ;;  %v2223_v36 = vshll.u32 %v2222_v3, 16 }
 0x5f9   :  { %v2264_v3 = vcvt.f32.s32 %v5840_v22 }
 0x5fa   :  { %vm2590_vm0 = vcmp.eq.s32.totalorder %v6673_v30, %v2168_v47  ;;  %v2154_v28 = vadd.s32 %v2153_v32, %v2151_v33  ;;  %v2208_v32 = vcvt.f32.s32 %v5810_v53  ;;  %v6677_v47 = vld [vmem:[#allocation86_spill] sm:$0xff] }
 0x5fb   :  { %v3318_v59 = vsel %vm2590_vm0, 1.0, %v6674_v29  ;;  %1421 = vxpose.xlu1.b32.cont [2/16] %v6601_v52, 128  ;;  %1389 = vxpose.xlu0.b32.cont [2/16] %v6675_v37, 128  ;;  %v2265_v22 = vshll.u32 %v2264_v3, 16  ;;  %v6680_v3 = vld [vmem:[#allocation88_spill] sm:$0xff] }
 0x5fc   :  { %2687 = vst [vmem:[#allocation8 + $0x108] sm:$0xff] %v3318_v59  ;;  %vm2589_vm1 = vcmp.eq.s32.totalorder %v6673_v30, %v2154_v28  ;;  %v2209_v53 = vshll.u32 %v2208_v32, 16 }
 0x5fd   :  { %v2192_v26 = vpop.xlane.xlu1 %2191  ;;  %v3317_v62 = vsel %vm2589_vm1, 1.0, %v6674_v29  ;;  %3845 = vmatprep.mubr.msk.f32.mxu0 %vm2589_vm1, %v6676_v0 }
 0x5fe   :  { %v2193_v13 = vcvt.f32.s32 %v2192_v26  ;;  %2686 = vst [vmem:[#allocation8 + $0x100] sm:$0xff] %v3317_v62  ;;  %v3145_v25 = vadd.f32 %v3318_v59, %v3317_v62  ;;  %3846 = vmatmul.mubr.msk.f32.vlgmr.msra.gmra.mxu0 %vm2590_vm0, %v6676_v0  ;;  %v2236_v62 = vcvt.f32.s32 %v5826_v35 }
 0x5ff   :  { %v2178_v39 = vpop.xlane.xlu0 %2177  ;;  %1422 = vxpose.xlu1.b32.cont [3/16] %v6603_v17, 128  ;;  %1390 = vxpose.xlu0.b32.cont [3/16] %v5311_v19, 128 }
 0x600   :  { %v2196_v21 = vadd.s32 %v2195_v58, %v2193_v13  ;;  %v2179_v52 = vcvt.f32.s32 %v2178_v39  ;;  %v2237_v35 = vshll.u32 %v2236_v62, 16 }
 0x602   :  { %v2182_v1 = vadd.s32 %v2181_v31, %v2179_v52  ;;  %vm2592_vm2 = vcmp.eq.s32.totalorder %v6673_v30, %v2196_v21  ;;  %v2278_v31 = vcvt.f32.s32 %v5834_v51 }
 0x603   :  { %v3320_v54 = vsel %vm2592_vm2, 1.0, %v6674_v29  ;;  %1423 = vxpose.xlu1.b32.cont [4/16] %v6607_v16, 128  ;;  %1391 = vxpose.xlu0.b32.cont [4/16] %v6677_v47, 128 }
 0x604   :  { %vm2591_vm3 = vcmp.eq.s32.totalorder %v6673_v30, %v2182_v1  ;;  %2689 = vst [vmem:[#allocation8 + $0x118] sm:$0xff] %v3320_v54  ;;  %v2279_v51 = vshll.u32 %v2278_v31, 16 }
 0x605   :  { %v2220_v17 = vpop.xlane.xlu1 %2219  ;;  %v3319_v19 = vsel %vm2591_vm3, 1.0, %v6674_v29  ;;  %3848 = vmatprep.mubr.msk.f32.mxu0 %vm2591_vm3, %v6676_v0 }
 0x606   :  { %v2221_v40 = vcvt.f32.s32 %v2220_v17  ;;  %2688 = vst [vmem:[#allocation8 + $0x110] sm:$0xff] %v3319_v19  ;;  %v3146_v33 = vadd.f32 %v3319_v19, %v3145_v25  ;;  %3849 = vmatmul.mubr.msk.f32.gmra.mxu0 %vm2592_vm2, %v6676_v0  ;;  %v2306_v17 = vcvt.f32.s32 %v5848_v15 }
 0x607   :  { %v2206_v24 = vpop.xlane.xlu0 %2205  ;;  %1424 = vxpose.xlu1.b32.cont [5/16] %v6609_v23, 128  ;;  %1392 = vxpose.xlu0.b32.cont [5/16] %v5315_v43, 128 }
 0x608   :  { %v2224_v28 = vadd.s32 %v2223_v36, %v2221_v40  ;;  %v3147_v16 = vadd.f32 %v3320_v54, %v3146_v33  ;;  %v2207_v59 = vcvt.f32.s32 %v2206_v24  ;;  %v2292_v40 = vcvt.f32.s32 %v5854_v45 }
 0x609   :  { %v2307_v15 = vshll.u32 %v2306_v17, 16 }
 0x60a   :  { %v2210_v37 = vadd.s32 %v2209_v53, %v2207_v59  ;;  %vm2594_vm4 = vcmp.eq.s32.totalorder %v6673_v30, %v2224_v28  ;;  %v2293_v45 = vshll.u32 %v2292_v40, 16 }
 0x60b   :  { %v3322_v26 = vsel %vm2594_vm4, 1.0, %v6674_v29  ;;  %1425 = vxpose.xlu1.b32.cont [6/16] %v6613_v14, 128  ;;  %1393 = vxpose.xlu0.b32.cont [6/16] %v5313_v8, 128 }
 0x60c   :  { %vm2593_vm5 = vcmp.eq.s32.totalorder %v6673_v30, %v2210_v37  ;;  %2691 = vst [vmem:[#allocation8 + $0x128] sm:$0xff] %v3322_v26  ;;  %v2320_v37 = vcvt.f32.s32 %v5868_v38 }
 0x60d   :  { %v2248_v23 = vpop.xlane.xlu1 %2247  ;;  %v3321_v43 = vsel %vm2593_vm5, 1.0, %v6674_v29  ;;  %3851 = vmatprep.mubr.msk.f32.mxu0 %vm2593_vm5, %v6676_v0 }
 0x60e   :  { %v2249_v58 = vcvt.f32.s32 %v2248_v23  ;;  %2690 = vst [vmem:[#allocation8 + $0x120] sm:$0xff] %v3321_v43  ;;  %v3148_v13 = vadd.f32 %v3321_v43, %v3147_v16  ;;  %3852 = vmatmul.mubr.msk.f32.gmra.mxu0 %vm2594_vm4, %v6676_v0  ;;  %v2334_v16 = vcvt.f32.s32 %v5862_v5  ;;  %v2321_v38 = vshll.u32 %v2320_v37, 16 }
 0x60f   :  { %v2234_v25 = vpop.xlane.xlu0 %2233  ;;  %1426 = vxpose.xlu1.b32.cont [7/16] %v6616_v34, 128  ;;  %1394 = vxpose.xlu0.b32.cont [7/16] %v5319_v7, 128 }
 0x610   :  { %v2252_v39 = vadd.s32 %v2251_v60, %v2249_v58  ;;  %v3149_v14 = vadd.f32 %v3322_v26, %v3148_v13  ;;  %v2235_v8 = vcvt.f32.s32 %v2234_v25  ;;  %v2335_v5 = vshll.u32 %v2334_v16, 16 }
 0x611   :  { %v2362_v60 = vcvt.f32.s32 %v5876_v20  ;;  %v2348_v13 = vcvt.f32.s32 %v5884_v4 }
 0x612   :  { %v2238_v21 = vadd.s32 %v2237_v35, %v2235_v8  ;;  %vm2596_vm6 = vcmp.eq.s32.totalorder %v6673_v30, %v2252_v39  ;;  %v6678_v8 = vld [vmem:[#allocation18_spill] sm:$0xff] }
 0x613   :  { %v3324_v52 = vsel %vm2596_vm6, 1.0, %v6674_v29  ;;  %1427 = vxpose.xlu1.b32.cont [8/16] %v6620_v49, 128  ;;  %1395 = vxpose.xlu0.b32.cont [8/16] %v5317_v10, 128  ;;  %v2363_v20 = vshll.u32 %v2362_v60, 16  ;;  %v2349_v4 = vshll.u32 %v2348_v13, 16 }
 0x614   :  { %vm2595_vm7 = vcmp.eq.s32.totalorder %v6673_v30, %v2238_v21  ;;  %2693 = vst [vmem:[#allocation8 + $0x138] sm:$0xff] %v3324_v52 }
 0x615   :  { %v2276_v34 = vpop.xlane.xlu1 %2275  ;;  %v3323_v7 = vsel %vm2595_vm7, 1.0, %v6674_v29  ;;  %3854 = vmatprep.mubr.msk.f32.mxu0 %vm2595_vm7, %v6676_v0 }
 0x616   :  { %v2277_v1 = vcvt.f32.s32 %v2276_v34  ;;  %2692 = vst [vmem:[#allocation8 + $0x130] sm:$0xff] %v3323_v7  ;;  %v3150_v54 = vadd.f32 %v3323_v7, %v3149_v14  ;;  %3855 = vmatmul.mubr.msk.f32.gmra.mxu0 %vm2596_vm6, %v6676_v0  ;;  %v2390_v14 = vcvt.f32.s32 %v5891_v6 }
 0x617   :  { %v2262_v32 = vpop.xlane.xlu0 %2261  ;;  %1428 = vxpose.xlu1.b32.cont [9/16] %v6623_v11, 128  ;;  %1396 = vxpose.xlu0.b32.cont [9/16] %v5323_v27, 128 }
 0x618   :  { %v2280_v47 = vadd.s32 %v2279_v51, %v2277_v1  ;;  %v3151_v49 = vadd.f32 %v3324_v52, %v3150_v54  ;;  %v2263_v10 = vcvt.f32.s32 %v2262_v32  ;;  %v6679_v52 = vld [vmem:[#allocation104_spill] sm:$0xff]  ;;  %v2391_v1 = vshll.u32 %v2390_v14, 16 }
 0x619   :  { %v6681_v54 = vld [vmem:[#allocation20_spill] sm:$0xff] }
 0x61a   :  { %v2266_v19 = vadd.s32 %v2265_v22, %v2263_v10  ;;  %vm2598_vm8 = vcmp.eq.s32.totalorder %v6673_v30, %v2280_v47  ;;  %v2418_v32 = vcvt.f32.s32 %v6681_v54  ;;  %v6682_v10 = vld [vmem:[#allocation22_spill] sm:$0xff] }
 0x61b   :  { %v3326_v36 = vsel %vm2598_vm8, 1.0, %v6674_v29  ;;  %1429 = vxpose.xlu1.b32.cont [10/16] %v6630_v63, 128  ;;  %1397 = vxpose.xlu0.b32.cont [10/16] %v5321_v41, 128  ;;  %v2404_v17 = vcvt.f32.s32 %v6682_v10 }
 0x61c   :  { %vm2597_vm9 = vcmp.eq.s32.totalorder %v6673_v30, %v2266_v19  ;;  %2695 = vst [vmem:[#allocation8 + $0x148] sm:$0xff] %v3326_v36  ;;  %v6683_v19 = vld [vmem:[#allocation87_spill] sm:$0xff] }
 0x61d   :  { %v2304_v11 = vpop.xlane.xlu1 %2303  ;;  %v3325_v27 = vsel %vm2597_vm9, 1.0, %v6674_v29  ;;  %3857 = vmatprep.mubr.msk.f32.mxu0 %vm2597_vm9, %v6676_v0 }
 0x61e   :  { %v2305_v33 = vcvt.f32.s32 %v2304_v11  ;;  %2694 = vst [vmem:[#allocation8 + $0x140] sm:$0xff] %v3325_v27  ;;  %v3152_v24 = vadd.f32 %v3325_v27, %v3151_v49  ;;  %3858 = vmatmul.mubr.msk.f32.gmra.mxu0 %vm2598_vm8, %v6676_v0 }
 0x61f   :  { %v2290_v53 = vpop.xlane.xlu0 %2289  ;;  %1430 = vxpose.xlu1.b32.cont [11/16] %v6633_v48, 128  ;;  %1398 = vxpose.xlu0.b32.cont [11/16] %v5327_v2, 128 }
 0x620   :  { %v2308_v28 = vadd.s32 %v2307_v15, %v2305_v33  ;;  %v3153_v63 = vadd.f32 %v3326_v36, %v3152_v24  ;;  %v2291_v41 = vcvt.f32.s32 %v2290_v53  ;;  %v6684_v24 = vld [vmem:[#allocation23_spill] sm:$0xff] }
 0x621   :  { %v2446_v53 = vcvt.f32.s32 %v6684_v24 }
 0x622   :  { %v2294_v59 = vadd.s32 %v2293_v45, %v2291_v41  ;;  %vm2600_vm10 = vcmp.eq.s32.totalorder %v6673_v30, %v2308_v28  ;;  %v2405_v28 = vshll.u32 %v2404_v17, 16 }
 0x623   :  { %v3328_v57 = vsel %vm2600_vm10, 1.0, %v6674_v29  ;;  %1431 = vxpose.xlu1.b32.cont [12/16] %v6641_v44, 128  ;;  %1399 = vxpose.xlu0.b32.cont [12/16] %v5325_v55, 128 }
 0x624   :  { %vm2599_vm11 = vcmp.eq.s32.totalorder %v6673_v30, %v2294_v59  ;;  %2697 = vst [vmem:[#allocation8 + $0x158] sm:$0xff] %v3328_v57  ;;  %v6685_v59 = vld [vmem:[#allocation25_spill] sm:$0xff] }
 0x625   :  { %v2332_v48 = vpop.xlane.xlu1 %2331  ;;  %v3327_v2 = vsel %vm2599_vm11, 1.0, %v6674_v29  ;;  %3860 = vmatprep.mubr.msk.f32.mxu0 %vm2599_vm11, %v6676_v0 }
 0x626   :  { %v2333_v26 = vcvt.f32.s32 %v2332_v48  ;;  %2696 = vst [vmem:[#allocation8 + $0x150] sm:$0xff] %v3327_v2  ;;  %v3154_v62 = vadd.f32 %v3327_v2, %v3153_v63  ;;  %3861 = vmatmul.mubr.msk.f32.gmra.mxu0 %vm2600_vm10, %v6676_v0 }
 0x627   :  { %v2318_v23 = vpop.xlane.xlu0 %2317  ;;  %1432 = vxpose.xlu1.b32.cont [13/16] %v6645_v9, 128  ;;  %1400 = vxpose.xlu0.b32.cont [13/16] %v5331_v46, 128 }
 0x628   :  { %v2336_v43 = vadd.s32 %v2335_v5, %v2333_v26  ;;  %v3155_v44 = vadd.f32 %v3328_v57, %v3154_v62  ;;  %v2319_v55 = vcvt.f32.s32 %v2318_v23  ;;  %v2432_v57 = vcvt.f32.s32 %v6685_v59  ;;  %v6686_v5 = vld [vmem:[#allocation27_spill] sm:$0xff] }
 0x629   :  { %v2474_v26 = vcvt.f32.s32 %v6686_v5 }
 0x62a   :  { %v2322_v58 = vadd.s32 %v2321_v38, %v2319_v55  ;;  %vm2602_vm12 = vcmp.eq.s32.totalorder %v6673_v30, %v2336_v43  ;;  %v2447_v38 = vshll.u32 %v2446_v53, 16  ;;  %v6687_v55 = vld [vmem:[#allocation28_spill] sm:$0xff] }
 0x62b   :  { %v3330_v25 = vsel %vm2602_vm12, 1.0, %v6674_v29  ;;  %1433 = vxpose.xlu1.b32.cont [14/16] %v6656_v18, 128  ;;  %1401 = vxpose.xlu0.b32.cont [14/16] %v5329_v61, 128  ;;  %v2376_v61 = vcvt.f32.s32 %v6678_v8  ;;  %v2460_v60 = vcvt.f32.s32 %v6687_v55 }
 0x62c   :  { %vm2601_vm13 = vcmp.eq.s32.totalorder %v6673_v30, %v2322_v58  ;;  %2699 = vst [vmem:[#allocation8 + $0x168] sm:$0xff] %v3330_v25 }
 0x62d   :  { %v2360_v9 = vpop.xlane.xlu1 %2359  ;;  %v3329_v46 = vsel %vm2601_vm13, 1.0, %v6674_v29  ;;  %3863 = vmatprep.mubr.msk.f32.mxu0 %vm2601_vm13, %v6676_v0  ;;  %v2377_v49 = vshll.u32 %v2376_v61, 16 }
 0x62e   :  { %v2361_v35 = vcvt.f32.s32 %v2360_v9  ;;  %2698 = vst [vmem:[#allocation8 + $0x160] sm:$0xff] %v3329_v46  ;;  %v3156_v39 = vadd.f32 %v3329_v46, %v3155_v44  ;;  %3864 = vmatmul.mubr.msk.f32.gmra.mxu0 %vm2602_vm12, %v6676_v0  ;;  %v2433_v9 = vshll.u32 %v2432_v57, 16 }
 0x62f   :  { %v2346_v18 = vpop.xlane.xlu0 %2345  ;;  %1434 = vxpose.xlu1.b32.cont [15/16] %v6679_v52, 128  ;;  %1402 = vxpose.xlu0.b32.cont [15/16] %v6680_v3, 128  ;;  %v6689_v52 = vld [vmem:[#allocation32_spill] sm:$0xff] }
 0x630   :  { %v2364_v31 = vadd.s32 %v2363_v20, %v2361_v35  ;;  %v3157_v21 = vadd.f32 %v3330_v25, %v3156_v39  ;;  %v2347_v34 = vcvt.f32.s32 %v2346_v18  ;;  %v2475_v35 = vshll.u32 %v2474_v26, 16  ;;  %v6688_v39 = vld [vmem:[#allocation30_spill] sm:$0xff] }
 0x631   :  { %v2388_v51 = vpop.xlane.xlu1 %2387  ;;  %v2488_v3 = vcvt.f32.s32 %v6689_v52 }
 0x632   :  { %v2350_v7 = vadd.s32 %v2349_v4, %v2347_v34  ;;  %vm2604_vm14 = vcmp.eq.s32.totalorder %v6673_v30, %v2364_v31  ;;  %v2389_v22 = vcvt.f32.s32 %v2388_v51  ;;  %v2502_v4 = vcvt.f32.s32 %v6688_v39 }
 0x633   :  { %v2374_v47 = vpop.xlane.xlu0 %2373  ;;  %v3332_v6 = vsel %vm2604_vm14, 1.0, %v6674_v29  ;;  %1435 = vxpose.xlu1.b32.end [16/16] %v6669_v42, 128  ;;  %1403 = vxpose.xlu0.b32.end [16/16] %v6683_v19, 128  ;;  %v2419_v42 = vshll.u32 %v2418_v32, 16 }
 0x634   :  { %v2375_v36 = vcvt.f32.s32 %v2374_v47  ;;  %vm2603_vm15 = vcmp.eq.s32.totalorder %v6673_v30, %v2350_v7  ;;  %2701 = vst [vmem:[#allocation8 + $0x178] sm:$0xff] %v3332_v6  ;;  %v2392_v40 = vadd.s32 %v2391_v1, %v2389_v22  ;;  %v2503_v32 = vshll.u32 %v2502_v4, 16  ;;  %v6690_v22 = vld [vmem:[#allocation33_spill] sm:$0xff] }
 0x635   :  { %v3331_v11 = vsel %vm2603_vm15, 1.0, %v6674_v29  ;;  %3866 = vmatprep.mubr.msk.f32.mxu0 %vm2603_vm15, %v6676_v0  ;;  %v2416_v15 = vpop.xlane.xlu1 %2415  ;;  %v2530_v47 = vcvt.f32.s32 %v6690_v22 }
 0x636   :  { %v2378_v27 = vadd.s32 %v2377_v49, %v2375_v36  ;;  %2700 = vst [vmem:[#allocation8 + $0x170] sm:$0xff] %v3331_v11  ;;  %v3158_v33 = vadd.f32 %v3331_v11, %v3157_v21  ;;  %3867 = vmatmul.mubr.msk.f32.gmra.mxu0 %vm2604_vm14, %v6676_v0  ;;  %v2417_v45 = vcvt.f32.s32 %v2416_v15  ;;  %vm2606_vm0 = vcmp.eq.s32.totalorder %v6673_v30, %v2392_v40  ;;  %v6691_v40 = vld [vmem:[#allocation35_spill] sm:$0xff] }
 0x637   :  { %v2402_v41 = vpop.xlane.xlu0 %2401  ;;  %v3334_v16 = vsel %vm2606_vm0, 1.0, %v6674_v29  ;;  %v2461_v21 = vshll.u32 %v2460_v60, 16  ;;  %v2489_v36 = vshll.u32 %v2488_v3, 16  ;;  %v2516_v11 = vcvt.f32.s32 %v6691_v40 }
 0x638   :  { %v3159_v63 = vadd.f32 %v3332_v6, %v3158_v33  ;;  %vm2605_vm1 = vcmp.eq.s32.totalorder %v6673_v30, %v2378_v27  ;;  %v2420_v37 = vadd.s32 %v2419_v42, %v2417_v45  ;;  %v2403_v48 = vcvt.f32.s32 %v2402_v41  ;;  %2703 = vst [vmem:[#allocation8 + $0x188] sm:$0xff] %v3334_v16 }
 0x639   :  { %v3333_v2 = vsel %vm2605_vm1, 1.0, %v6674_v29  ;;  %3869 = vmatprep.mubr.msk.f32.mxu0 %vm2605_vm1, %v6676_v0  ;;  %v2444_v62 = vpop.xlane.xlu1 %2443  ;;  %v2531_v53 = vshll.u32 %v2530_v47, 16  ;;  %v2558_v45 = vcvt.f32.s32 %v5963_v12  ;;  %v2517_v57 = vshll.u32 %v2516_v11, 16 }
 0x63a   :  { %2702 = vst [vmem:[#allocation8 + $0x180] sm:$0xff] %v3333_v2  ;;  %v3160_v23 = vadd.f32 %v3333_v2, %v3159_v63  ;;  %3870 = vmatmul.mubr.msk.f32.gmra.mxu0 %vm2606_vm0, %v6676_v0  ;;  %v2406_v43 = vadd.s32 %v2405_v28, %v2403_v48  ;;  %v2445_v44 = vcvt.f32.s32 %v2444_v62  ;;  %vm2608_vm2 = vcmp.eq.s32.totalorder %v6673_v30, %v2420_v37 }
 0x63b   :  { %v2430_v13 = vpop.xlane.xlu0 %2429  ;;  %v3336_v25 = vsel %vm2608_vm2, 1.0, %v6674_v29  ;;  %v2544_v37 = vcvt.f32.s32 %v5968_v50  ;;  %v2559_v62 = vshll.u32 %v2558_v45, 16 }
 0x63c   :  { %v3161_v58 = vadd.f32 %v3334_v16, %v3160_v23  ;;  %v2448_v46 = vadd.s32 %v2447_v38, %v2445_v44  ;;  %v2431_v20 = vcvt.f32.s32 %v2430_v13  ;;  %vm2607_vm3 = vcmp.eq.s32.totalorder %v6673_v30, %v2406_v43  ;;  %2705 = vst [vmem:[#allocation8 + $0x198] sm:$0xff] %v3336_v25  ;;  %v6692_v23 = vld [vmem:[#allocation37_spill] sm:$0xff] }
 0x63d   :  { %v2472_v14 = vpop.xlane.xlu1 %2471  ;;  %v3335_v18 = vsel %vm2607_vm3, 1.0, %v6674_v29  ;;  %3872 = vmatprep.mubr.msk.f32.mxu0 %vm2607_vm3, %v6676_v0  ;;  %v2586_v38 = vcvt.f32.s32 %v6692_v23  ;;  %v2572_v13 = vcvt.f32.s32 %v5978_v56 }
 0x63e   :  { %v2434_v8 = vadd.s32 %v2433_v9, %v2431_v20  ;;  %v2473_v61 = vcvt.f32.s32 %v2472_v14  ;;  %2704 = vst [vmem:[#allocation8 + $0x190] sm:$0xff] %v3335_v18  ;;  %v3162_v31 = vadd.f32 %v3335_v18, %v3161_v58  ;;  %3873 = vmatmul.mubr.msk.f32.gmra.mxu0 %vm2608_vm2, %v6676_v0  ;;  %vm2610_vm4 = vcmp.eq.s32.totalorder %v6673_v30, %v2448_v46 }
 0x63f   :  { %v2458_v34 = vpop.xlane.xlu0 %2457  ;;  %v3338_v7 = vsel %vm2610_vm4, 1.0, %v6674_v29  ;;  %v2545_v58 = vshll.u32 %v2544_v37, 16  ;;  %v2587_v39 = vshll.u32 %v2586_v38, 16 }
 0x640   :  { %v2476_v51 = vadd.s32 %v2475_v35, %v2473_v61  ;;  %v3163_v1 = vadd.f32 %v3336_v25, %v3162_v31  ;;  %v2459_v54 = vcvt.f32.s32 %v2458_v34  ;;  %vm2609_vm5 = vcmp.eq.s32.totalorder %v6673_v30, %v2434_v8  ;;  %2707 = vst [vmem:[#allocation8 + $0x1a8] sm:$0xff] %v3338_v7  ;;  %v6693_v61 = vld [vmem:[#allocation51_spill] sm:$0xff] }
 0x641   :  { %v2500_v6 = vpop.xlane.xlu1 %2499  ;;  %v3337_v49 = vsel %vm2609_vm5, 1.0, %v6674_v29  ;;  %3875 = vmatprep.mubr.msk.f32.mxu0 %vm2609_vm5, %v6676_v0  ;;  %v1620_v31 = vrot.slane %v6693_v61, 4 }
 0x642   :  { %v2462_v10 = vadd.s32 %v2461_v21, %v2459_v54  ;;  %v2501_v17 = vcvt.f32.s32 %v2500_v6  ;;  %2706 = vst [vmem:[#allocation8 + $0x1a0] sm:$0xff] %v3337_v49  ;;  %v3164_v19 = vadd.f32 %v3337_v49, %v3163_v1  ;;  %3876 = vmatmul.mubr.msk.f32.gmra.mxu0 %vm2610_vm4, %v6676_v0  ;;  %vm2612_vm6 = vcmp.eq.s32.totalorder %v6673_v30, %v2476_v51 }
 0x643   :  { %v2486_v27 = vpop.xlane.xlu0 %2485  ;;  %v3340_v15 = vsel %vm2612_vm6, 1.0, %v6674_v29  ;;  %v2573_v21 = vshll.u32 %v2572_v13, 16  ;;  %v1621_v6 = vadd.f32 %v1620_v31, %v6693_v61 }
 0x644   :  { %v2504_v33 = vadd.s32 %v2503_v32, %v2501_v17  ;;  %v3165_v42 = vadd.f32 %v3338_v7, %v3164_v19  ;;  %v2487_v24 = vcvt.f32.s32 %v2486_v27  ;;  %vm2611_vm7 = vcmp.eq.s32.totalorder %v6673_v30, %v2462_v10  ;;  %2709 = vst [vmem:[#allocation8 + $0x1b8] sm:$0xff] %v3340_v15 }
 0x645   :  { %v2528_v28 = vpop.xlane.xlu1 %2527  ;;  %v3339_v63 = vsel %vm2611_vm7, 1.0, %v6674_v29  ;;  %3878 = vmatprep.mubr.msk.f32.mxu0 %vm2611_vm7, %v6676_v0  ;;  %v1622_v40 = vrot.slane %v1621_v6, 2 }
 0x646   :  { %vm2614_vm8 = vcmp.eq.s32.totalorder %v6673_v30, %v2504_v33  ;;  %v2490_v41 = vadd.s32 %v2489_v36, %v2487_v24  ;;  %v2529_v16 = vcvt.f32.s32 %v2528_v28  ;;  %2708 = vst [vmem:[#allocation8 + $0x1b0] sm:$0xff] %v3339_v63  ;;  %v3166_v59 = vadd.f32 %v3339_v63, %v3165_v42  ;;  %3879 = vmatmul.mubr.msk.f32.gmra.mxu0 %vm2612_vm6, %v6676_v0 }
 0x647   :  { %v3342_v12 = vsel %vm2614_vm8, 1.0, %v6674_v29  ;;  %v2514_v48 = vpop.xlane.xlu0 %2513  ;;  %v1623_v42 = vadd.f32 %v1622_v40, %v1621_v6  ;;  %v6694_v63 = vlaneseq  ;;  %v6704_v40 = vld [vmem:[#allocation67_spill] sm:$0xff] }
 0x648   :  { %2711 = vst [vmem:[#allocation8 + $0x1c8] sm:$0xff] %v3342_v12  ;;  %v2532_v2 = vadd.s32 %v2531_v53, %v2529_v16  ;;  %v3167_v5 = vadd.f32 %v3340_v15, %v3166_v59  ;;  %v2515_v26 = vcvt.f32.s32 %v2514_v48  ;;  %vm2613_vm9 = vcmp.eq.s32.totalorder %v6673_v30, %v2490_v41 }
 0x649   :  { %v2556_v43 = vpop.xlane.xlu1 %2555  ;;  %v3341_v44 = vsel %vm2613_vm9, 1.0, %v6674_v29  ;;  %3881 = vmatprep.mubr.msk.f32.mxu1 %vm2613_vm9, %v6676_v0  ;;  %v3184_v41 = vshrl.u32 %v6694_v63, 7 }
 0x64a   :  { %v2518_v50 = vadd.s32 %v2517_v57, %v2515_v26  ;;  %v2557_v55 = vcvt.f32.s32 %v2556_v43  ;;  %2710 = vst [vmem:[#allocation8 + $0x1c0] sm:$0xff] %v3341_v44  ;;  %v3168_v60 = vadd.f32 %v3341_v44, %v3167_v5  ;;  %3882 = vmatmul.mubr.msk.f32.vlgmr.msra.gmra.mxu1 %vm2614_vm8, %v6676_v0  ;;  %vm2616_vm10 = vcmp.eq.s32.totalorder %v6673_v30, %v2532_v2  ;;  %v6696_v43 = vld [vmem:[#allocation54_spill] sm:$0xff] }
 0x64b   :  { %v2542_v25 = vpop.xlane.xlu0 %2541  ;;  %v3344_v9 = vsel %vm2616_vm10, 1.0, %v6674_v29  ;;  %vm3185_vm0 = vcmp.eq.s32.totalorder %v3184_v41, 0 }
 0x64c   :  { %v2560_v46 = vadd.s32 %v2559_v62, %v2557_v55  ;;  %v2543_v20 = vcvt.f32.s32 %v2542_v25  ;;  %vm2615_vm11 = vcmp.eq.s32.totalorder %v6673_v30, %v2518_v50  ;;  %v3169_v35 = vadd.f32 %v3342_v12, %v3168_v60  ;;  %2713 = vst [vmem:[#allocation8 + $0x1d8] sm:$0xff] %v3344_v9  ;;  %v6695_v62 = vld [vmem:[#allocation52_spill] sm:$0xff] }
 0x64d   :  { %v2584_v4 = vpop.xlane.xlu1 %2583  ;;  %v3343_v14 = vsel %vm2615_vm11, 1.0, %v6674_v29  ;;  %3884 = vmatprep.mubr.msk.f32.mxu1 %vm2615_vm11, %v6676_v0  ;;  %v6697_v50 = vld [vmem:[#allocation56_spill] sm:$0xff] }
 0x64e   :  { %v2546_v18 = vadd.s32 %v2545_v58, %v2543_v20  ;;  %v2585_v8 = vcvt.f32.s32 %v2584_v4  ;;  %2712 = vst [vmem:[#allocation8 + $0x1d0] sm:$0xff] %v3343_v14  ;;  %v3170_v56 = vadd.f32 %v3343_v14, %v3169_v35  ;;  %3885 = vmatmul.mubr.msk.f32.gmra.mxu1 %vm2616_vm10, %v6676_v0  ;;  %vm2618_vm12 = vcmp.eq.s32.totalorder %v6673_v30, %v2560_v46  ;;  %v6698_v46 = vld [vmem:[#allocation57_spill] sm:$0xff]  ;;  %v6699_v35 = vld [vmem:[#allocation59_spill] sm:$0xff] }
 0x64f   :  { %v2570_v52 = vpop.xlane.xlu0 %2569  ;;  %v3346_v3 = vsel %vm2618_vm12, 1.0, %v6674_v29 }
 0x650   :  { %v2588_v34 = vadd.s32 %v2587_v39, %v2585_v8  ;;  %v3171_v7 = vadd.f32 %v3344_v9, %v3170_v56  ;;  %v2571_v51 = vcvt.f32.s32 %v2570_v52  ;;  %vm2617_vm13 = vcmp.eq.s32.totalorder %v6673_v30, %v2546_v18  ;;  %2715 = vst [vmem:[#allocation8 + $0x1e8] sm:$0xff] %v3346_v3  ;;  %v6700_v56 = vld [vmem:[#allocation61_spill] sm:$0xff] }
 0x651   :  { %v3345_v1 = vsel %vm2617_vm13, 1.0, %v6674_v29  ;;  %3887 = vmatprep.mubr.msk.f32.mxu1 %vm2617_vm13, %v6676_v0 }
 0x652   :  { %v2574_v54 = vadd.s32 %v2573_v21, %v2571_v51  ;;  %2714 = vst [vmem:[#allocation8 + $0x1e0] sm:$0xff] %v3345_v1  ;;  %v3172_v32 = vadd.f32 %v3345_v1, %v3171_v7  ;;  %3888 = vmatmul.mubr.msk.f32.gmra.mxu1 %vm2618_vm12, %v6676_v0  ;;  %vm2620_vm14 = vcmp.eq.s32.totalorder %v6673_v30, %v2588_v34  ;;  %v6701_v21 = vld [vmem:[#allocation62_spill] sm:$0xff] }
 0x653   :  { %v1580_v22 = vpop.xlane.xlu0 %1579  ;;  %v3348_v47 = vsel %vm2620_vm14, 1.0, %v6674_v29 }
 0x654   :  { %v3173_v49 = vadd.f32 %v3346_v3, %v3172_v32  ;;  %v1581_v10 = vrot.slane %v1580_v22, 4  ;;  %vm2619_vm15 = vcmp.eq.s32.totalorder %v6673_v30, %v2574_v54  ;;  %2717 = vst [vmem:[#allocation8 + $0x1f8] sm:$0xff] %v3348_v47  ;;  %v6702_v54 = vld [vmem:[#allocation64_spill] sm:$0xff] }
 0x655   :  { %v3347_v17 = vsel %vm2619_vm15, 1.0, %v6674_v29  ;;  %3890 = vmatprep.mubr.msk.f32.mxu1 %vm2619_vm15, %v6676_v0  ;;  %v1624_v29 = vrot.slane %v1623_v42, 1 }
 0x656   :  { %v1582_v19 = vadd.f32 %v1581_v10, %v1580_v22  ;;  %2716 = vst [vmem:[#allocation8 + $0x1f0] sm:$0xff] %v3347_v17  ;;  %v3174_v36 = vadd.f32 %v3347_v17, %v3173_v49  ;;  %3891 = vmatmul.mubr.msk.f32.gmra.mxu1 %vm2620_vm14, %v6676_v0 }
 0x657   :  { %v1625_v59 = vadd.f32 %v1624_v29, %v1623_v42  ;;  %v6706_v29 = vld [vmem:[#allocation71_spill] sm:$0xff] }
 0x658   :  { %v1583_v11 = vrot.slane %v1582_v19, 2  ;;  %v3175_v27 = vadd.f32 %v3348_v47, %v3174_v36  ;;  %v6703_v47 = vld [vmem:[#allocation66_spill] sm:$0xff] }
 0x65a   :  { %v3176_v15 = vrot.slane %v3175_v27, 4  ;;  %v1584_v33 = vadd.f32 %v1583_v11, %v1582_v19 }
 0x65c   :  { %v3177_v24 = vadd.f32 %v3176_v15, %v3175_v27  ;;  %v1585_v53 = vrot.slane %v1584_v33, 1  ;;  %v6705_v15 = vld [vmem:[#allocation69_spill] sm:$0xff] }
 0x65e   :  { %v3178_v45 = vrot.slane %v3177_v24, 2  ;;  %v1586_v30 = vadd.f32 %v1585_v53, %v1584_v33 }
 0x660   :  { %v3179_v28 = vadd.f32 %v3178_v45, %v3177_v24  ;;  %3925 = vpush %v1586_v30 }
 0x662   :  { %v3180_v16 = vrot.slane %v3179_v28, 1 }
 0x664   :  { %v3181_v57 = vadd.f32 %v3180_v16, %v3179_v28 }
 0x666   :  { %v3182_v0 = vadd.f32 %v3181_v57, %v1625_v59  ;;  %v6707_v57 = vld [vmem:[#allocation72_spill] sm:$0xff] }
 0x668   :  { %v3186_v37 = vsel %vm3185_vm0, %v3182_v0, 0.0 }
 0x669   :  { %3187 = vst [vmem:[#allocation10] sm:$0xff] %v3186_v37 }
 0x673   :  { %v1436_v42 = vpop.trf.xlu1 }
 0x674   :  { %1453 = vst [vmem:[#allocation7 + $0x8] sm:$0xff] %v1436_v42 }
 0x677   :  { %v1437_v30 = vpop.trf.xlu1 }
 0x678   :  { %1455 = vst [vmem:[#allocation7 + $0x18] sm:$0xff] %v1437_v30 }
 0x67b   :  { %v1438_v37 = vpop.trf.xlu1 }
 0x67c   :  { %1457 = vst [vmem:[#allocation7 + $0x28] sm:$0xff] %v1438_v37 }
 0x6be   :  { %v3847_v12 = vpop.f32.mrf.mxu0 }
 0x6bf   :  { %v3041_v44 = vsub.f32 %v3847_v12, %v6696_v43 }
 0x6c0   :  { %v2784_v48 = vpop.f32.mrf.mxu0 }
 0x6c1   :  { %2943 = vxpose.xlu0.b32.start [1/16] %v2784_v48, 128  ;;  %v3040_v23 = vsub.f32 %v2784_v48, %v6695_v62  ;;  %v3073_v58 = vmul.f32 %v3041_v44, %v3041_v44  ;;  %v1439_v62 = vpop.trf.xlu1 }
 0x6c2   :  { %1459 = vst [vmem:[#allocation7 + $0x38] sm:$0xff] %v1439_v62 }
 0x6c3   :  { %v3072_v60 = vmul.f32 %v3040_v23, %v3040_v23 }
 0x6c5   :  { %2944 = vxpose.xlu0.b32.cont [2/16] %v3847_v12, 128  ;;  %v3104_v9 = vadd.f32 %v3073_v58, %v3072_v60  ;;  %v6710_v60 = vld [vmem:[#allocation76_spill] sm:$0xff] }
 0x6c6   :  { %v3850_v2 = vpop.f32.mrf.mxu0 }
 0x6c7   :  { %v3043_v20 = vsub.f32 %v3850_v2, %v6698_v46 }
 0x6c8   :  { %v2794_v5 = vpop.f32.mrf.mxu0 }
 0x6c9   :  { %2945 = vxpose.xlu0.b32.cont [3/16] %v2794_v5, 128  ;;  %v3042_v55 = vsub.f32 %v2794_v5, %v6697_v50  ;;  %v3075_v18 = vmul.f32 %v3043_v20, %v3043_v20  ;;  %v6709_v50 = vld [vmem:[#allocation77_spill] sm:$0xff] }
 0x6cb   :  { %v3074_v13 = vmul.f32 %v3042_v55, %v3042_v55 }
 0x6cd   :  { %2946 = vxpose.xlu0.b32.cont [4/16] %v3850_v2, 128  ;;  %v3105_v14 = vadd.f32 %v3104_v9, %v3074_v13  ;;  %v6708_v2 = vld [vmem:[#allocation74_spill] sm:$0xff]  ;;  %v1440_v13 = vpop.trf.xlu1 }
 0x6ce   :  { %v3853_v26 = vpop.f32.mrf.mxu0  ;;  %1461 = vst [vmem:[#allocation7 + $0x48] sm:$0xff] %v1440_v13 }
 0x6cf   :  { %v3045_v61 = vsub.f32 %v3853_v26, %v6700_v56  ;;  %v3106_v31 = vadd.f32 %v3105_v14, %v3075_v18  ;;  %v6712_v18 = vld [vmem:[#allocation53_spill] sm:$0xff] }
 0x6d0   :  { %v2804_v38 = vpop.f32.mrf.mxu0 }
 0x6d1   :  { %2947 = vxpose.xlu0.b32.cont [5/16] %v2804_v38, 128  ;;  %v3044_v39 = vsub.f32 %v2804_v38, %v6699_v35  ;;  %v3077_v51 = vmul.f32 %v3045_v61, %v3045_v61  ;;  %v1441_v56 = vpop.trf.xlu1 }
 0x6d2   :  { %1463 = vst [vmem:[#allocation7 + $0x58] sm:$0xff] %v1441_v56 }
 0x6d3   :  { %v3076_v8 = vmul.f32 %v3044_v39, %v3044_v39 }
 0x6d5   :  { %2948 = vxpose.xlu0.b32.cont [6/16] %v3853_v26, 128  ;;  %v3107_v34 = vadd.f32 %v3106_v31, %v3076_v8 }
 0x6d6   :  { %v3856_v25 = vpop.f32.mrf.mxu0 }
 0x6d7   :  { %v3047_v32 = vsub.f32 %v3856_v25, %v6702_v54  ;;  %v3108_v22 = vadd.f32 %v3107_v34, %v3077_v51  ;;  %v6713_v51 = vld [vmem:[#allocation60_spill] sm:$0xff]  ;;  %v6714_v54 = vld [vmem:[#allocation58_spill] sm:$0xff] }
 0x6d8   :  { %v2814_v4 = vpop.f32.mrf.mxu0 }
 0x6d9   :  { %2949 = vxpose.xlu0.b32.cont [7/16] %v2814_v4, 128  ;;  %v3046_v52 = vsub.f32 %v2814_v4, %v6701_v21  ;;  %v3079_v17 = vmul.f32 %v3047_v32, %v3047_v32  ;;  %v6711_v4 = vld [vmem:[#allocation55_spill] sm:$0xff] }
 0x6db   :  { %v3078_v1 = vmul.f32 %v3046_v52, %v3046_v52 }
 0x6dd   :  { %2950 = vxpose.xlu0.b32.cont [8/16] %v3856_v25, 128  ;;  %v3109_v49 = vadd.f32 %v3108_v22, %v3078_v1 }
 0x6de   :  { %v3859_v3 = vpop.f32.mrf.mxu0 }
 0x6df   :  { %v3049_v11 = vsub.f32 %v3859_v3, %v6704_v40  ;;  %v3110_v27 = vadd.f32 %v3109_v49, %v3079_v17 }
 0x6e0   :  { %v2824_v7 = vpop.f32.mrf.mxu0 }
 0x6e1   :  { %2951 = vxpose.xlu0.b32.cont [9/16] %v2824_v7, 128  ;;  %v3048_v6 = vsub.f32 %v2824_v7, %v6703_v47  ;;  %v3081_v53 = vmul.f32 %v3049_v11, %v3049_v11  ;;  %v1442_v7 = vpop.trf.xlu1  ;;  %v6716_v11 = vld [vmem:[#allocation63_spill] sm:$0xff] }
 0x6e2   :  { %1465 = vst [vmem:[#allocation7 + $0x68] sm:$0xff] %v1442_v7 }
 0x6e3   :  { %v3080_v19 = vmul.f32 %v3048_v6, %v3048_v6 }
 0x6e5   :  { %2952 = vxpose.xlu0.b32.cont [10/16] %v3859_v3, 128  ;;  %v3111_v24 = vadd.f32 %v3110_v27, %v3080_v19 }
 0x6e6   :  { %v3862_v10 = vpop.f32.mrf.mxu0 }
 0x6e7   :  { %v3051_v63 = vsub.f32 %v3862_v10, %v6706_v29  ;;  %v3112_v41 = vadd.f32 %v3111_v24, %v3081_v53 }
 0x6e8   :  { %v2834_v36 = vpop.f32.mrf.mxu0 }
 0x6e9   :  { %v3050_v33 = vsub.f32 %v2834_v36, %v6705_v15  ;;  %2953 = vxpose.xlu0.b32.cont [11/16] %v2834_v36, 128  ;;  %v3083_v12 = vmul.f32 %v3051_v63, %v3051_v63  ;;  %v6715_v36 = vld [vmem:[#allocation65_spill] sm:$0xff]  ;;  %v6718_v63 = vld [vmem:[#allocation68_spill] sm:$0xff] }
 0x6eb   :  { %v3082_v45 = vmul.f32 %v3050_v33, %v3050_v33 }
 0x6ed   :  { %2954 = vxpose.xlu0.b32.cont [12/16] %v3862_v10, 128  ;;  %v3113_v59 = vadd.f32 %v3112_v41, %v3082_v45  ;;  %v1443_v10 = vpop.trf.xlu1 }
 0x6ee   :  { %v3865_v28 = vpop.f32.mrf.mxu0  ;;  %1467 = vst [vmem:[#allocation7 + $0x78] sm:$0xff] %v1443_v10 }
 0x6ef   :  { %v3053_v5 = vsub.f32 %v3865_v28, %v6708_v2  ;;  %v3114_v26 = vadd.f32 %v3113_v59, %v3083_v12  ;;  %v6719_v2 = vld [vmem:[#allocation75_spill] sm:$0xff] }
 0x6f0   :  { %v2844_v16 = vpop.f32.mrf.mxu0 }
 0x6f1   :  { %v3052_v0 = vsub.f32 %v2844_v16, %v6707_v57  ;;  %2955 = vxpose.xlu0.b32.cont [13/16] %v2844_v16, 128  ;;  %v3085_v44 = vmul.f32 %v3053_v5, %v3053_v5  ;;  %v1444_v53 = vpop.trf.xlu1 }
 0x6f2   :  { %1469 = vst [vmem:[#allocation7 + $0x88] sm:$0xff] %v1444_v53 }
 0x6f3   :  { %v3084_v48 = vmul.f32 %v3052_v0, %v3052_v0 }
 0x6f5   :  { %2956 = vxpose.xlu0.b32.cont [14/16] %v3865_v28, 128  ;;  %v3115_v38 = vadd.f32 %v3114_v26, %v3084_v48  ;;  %v6717_v28 = vld [vmem:[#allocation70_spill] sm:$0xff]  ;;  %v1445_v37 = vpop.trf.xlu1  ;;  %v6720_v26 = vld [vmem:[#allocation73_spill] sm:$0xff] }
 0x6f6   :  { %v3868_v23 = vpop.f32.mrf.mxu0  ;;  %1471 = vst [vmem:[#allocation7 + $0x98] sm:$0xff] %v1445_v37 }
 0x6f7   :  { %v3055_v55 = vsub.f32 %v3868_v23, %v6709_v50  ;;  %v3116_v46 = vadd.f32 %v3115_v38, %v3085_v44  ;;  %v1404_v50 = vpop.trf.xlu0 }
 0x6f8   :  { %v2854_v43 = vpop.f32.mrf.mxu0  ;;  %1452 = vst [vmem:[#allocation7] sm:$0xff] %v1404_v50 }
 0x6f9   :  { %v3054_v58 = vsub.f32 %v2854_v43, %v6710_v60  ;;  %2957 = vxpose.xlu0.b32.cont [15/16] %v2854_v43, 128  ;;  %v3087_v35 = vmul.f32 %v3055_v55, %v3055_v55 }
 0x6fa   :  { %v6189_v25 = vpop.f32.mrf.mxu0 }
 0x6fb   :  { %v3086_v9 = vmul.f32 %v3054_v58, %v3054_v58  ;;  %v3057_v14 = vsub.f32 %v6189_v25, %v6711_v4  ;;  %v6721_v58 = vld [vmem:[#allocation79_spill] sm:$0xff] }
 0x6fc   :  { %v6191_v20 = vpop.f32.mrf.mxu0 }
 0x6fd   :  { %v3117_v39 = vadd.f32 %v3116_v46, %v3086_v9  ;;  %v3056_v8 = vsub.f32 %v6191_v20, %v6712_v18  ;;  %2958 = vxpose.xlu0.b32.end [16/16] %v3868_v23, 128  ;;  %v3089_v52 = vmul.f32 %v3057_v14, %v3057_v14  ;;  %v6722_v9 = vld [vmem:[#allocation78_spill] sm:$0xff] }
 0x6fe   :  { %v6197_v21 = vpop.f32.mrf.mxu0 }
 0x6ff   :  { %v3088_v61 = vmul.f32 %v3056_v8, %v3056_v8  ;;  %v3118_v31 = vadd.f32 %v3117_v39, %v3087_v35  ;;  %v3059_v1 = vsub.f32 %v6197_v21, %v6713_v51  ;;  %v1446_v35 = vpop.trf.xlu1  ;;  %v1405_v8 = vpop.trf.xlu0 }
 0x700   :  { %v6199_v34 = vpop.f32.mrf.mxu0  ;;  %1473 = vst [vmem:[#allocation7 + $0xa8] sm:$0xff] %v1446_v35  ;;  %1454 = vst [vmem:[#allocation7 + $0x10] sm:$0xff] %v1405_v8 }
 0x701   :  { %v3119_v3 = vadd.f32 %v3118_v31, %v3088_v61  ;;  %v3058_v32 = vsub.f32 %v6199_v34, %v6714_v54  ;;  %v3091_v17 = vmul.f32 %v3059_v1, %v3059_v1  ;;  %v6723_v31 = vld [vmem:[#allocation81_spill] sm:$0xff] }
 0x702   :  { %v6205_v47 = vpop.f32.mrf.mxu0 }
 0x703   :  { %v3120_v22 = vadd.f32 %v3119_v3, %v3089_v52  ;;  %v3090_v6 = vmul.f32 %v3058_v32, %v3058_v32  ;;  %v3061_v40 = vsub.f32 %v6205_v47, %v6715_v36  ;;  %v6724_v3 = vld [vmem:[#allocation80_spill] sm:$0xff]  ;;  %v1447_v51 = vpop.trf.xlu1 }
 0x704   :  { %v6207_v49 = vpop.f32.mrf.mxu0  ;;  %1475 = vst [vmem:[#allocation7 + $0xb8] sm:$0xff] %v1447_v51 }
 0x705   :  { %v3121_v19 = vadd.f32 %v3120_v22, %v3090_v6  ;;  %v3060_v27 = vsub.f32 %v6207_v49, %v6716_v11  ;;  %v3093_v45 = vmul.f32 %v3061_v40, %v3061_v40  ;;  %v1406_v6 = vpop.trf.xlu0  ;;  %v6726_v40 = vld [vmem:[#allocation82_spill] sm:$0xff] }
 0x706   :  { %v6213_v15 = vpop.f32.mrf.mxu0  ;;  %1456 = vst [vmem:[#allocation7 + $0x20] sm:$0xff] %v1406_v6 }
 0x707   :  { %v3092_v33 = vmul.f32 %v3060_v27, %v3060_v27  ;;  %v3122_v42 = vadd.f32 %v3121_v19, %v3091_v17  ;;  %v3063_v29 = vsub.f32 %v6213_v15, %v6717_v28  ;;  %v6725_v19 = vld [vmem:[#allocation83_spill] sm:$0xff]  ;;  %v1448_v27 = vpop.trf.xlu1 }
 0x708   :  { %v6215_v24 = vpop.f32.mrf.mxu0  ;;  %1477 = vst [vmem:[#allocation7 + $0xc8] sm:$0xff] %v1448_v27 }
 0x709   :  { %v3123_v30 = vadd.f32 %v3122_v42, %v3092_v33  ;;  %v3062_v41 = vsub.f32 %v6215_v24, %v6718_v63  ;;  %v3095_v12 = vmul.f32 %v3063_v29, %v3063_v29  ;;  %v1407_v53 = vpop.trf.xlu0 }
 0x70a   :  { %v6221_v16 = vpop.f32.mrf.mxu1  ;;  %1458 = vst [vmem:[#allocation7 + $0x30] sm:$0xff] %v1407_v53 }
 0x70b   :  { %v3094_v59 = vmul.f32 %v3062_v41, %v3062_v41  ;;  %v3124_v57 = vadd.f32 %v3123_v30, %v3093_v45  ;;  %v3065_v5 = vsub.f32 %v6221_v16, %v6719_v2  ;;  %v1449_v28 = vpop.trf.xlu1 }
 0x70c   :  { %v6223_v0 = vpop.f32.mrf.mxu1  ;;  %1479 = vst [vmem:[#allocation7 + $0xd8] sm:$0xff] %v1449_v28 }
 0x70d   :  { %v3125_v48 = vadd.f32 %v3124_v57, %v3094_v59  ;;  %v3064_v62 = vsub.f32 %v6223_v0, %v6720_v26  ;;  %v3097_v55 = vmul.f32 %v3065_v5, %v3065_v5  ;;  %v1408_v63 = vpop.trf.xlu0 }
 0x70e   :  { %v6229_v23 = vpop.f32.mrf.mxu1  ;;  %1460 = vst [vmem:[#allocation7 + $0x40] sm:$0xff] %v1408_v63 }
 0x70f   :  { %v3126_v38 = vadd.f32 %v3125_v48, %v3095_v12  ;;  %v3096_v43 = vmul.f32 %v3064_v62, %v3064_v62  ;;  %v3067_v13 = vsub.f32 %v6229_v23, %v6721_v58  ;;  %v1450_v41 = vpop.trf.xlu1 }
 0x710   :  { %v6231_v44 = vpop.f32.mrf.mxu1  ;;  %1481 = vst [vmem:[#allocation7 + $0xe8] sm:$0xff] %v1450_v41 }
 0x711   :  { %v3127_v60 = vadd.f32 %v3126_v38, %v3096_v43  ;;  %v3066_v46 = vsub.f32 %v6231_v44, %v6722_v9  ;;  %v3099_v56 = vmul.f32 %v3067_v13, %v3067_v13  ;;  %v1409_v59 = vpop.trf.xlu0 }
 0x712   :  { %v6237_v39 = vpop.f32.mrf.mxu1  ;;  %1462 = vst [vmem:[#allocation7 + $0x50] sm:$0xff] %v1409_v59 }
 0x713   :  { %v3098_v4 = vmul.f32 %v3066_v46, %v3066_v46  ;;  %v3128_v14 = vadd.f32 %v3127_v60, %v3097_v55  ;;  %v3069_v52 = vsub.f32 %v6237_v39, %v6723_v31  ;;  %v1451_v57 = vpop.trf.xlu1 }
 0x714   :  { %v6239_v18 = vpop.f32.mrf.mxu1  ;;  %1483 = vst [vmem:[#allocation7 + $0xf8] sm:$0xff] %v1451_v57 }
 0x715   :  { %v3129_v61 = vadd.f32 %v3128_v14, %v3098_v4  ;;  %v3068_v7 = vsub.f32 %v6239_v18, %v6724_v3  ;;  %v3101_v10 = vmul.f32 %v3069_v52, %v3069_v52  ;;  %v1410_v37 = vpop.trf.xlu0 }
 0x716   :  { %v6245_v1 = vpop.f32.mrf.mxu1  ;;  %1464 = vst [vmem:[#allocation7 + $0x60] sm:$0xff] %v1410_v37 }
 0x717   :  { %v3100_v54 = vmul.f32 %v3068_v7, %v3068_v7  ;;  %v3130_v32 = vadd.f32 %v3129_v61, %v3099_v56  ;;  %v3071_v36 = vsub.f32 %v6245_v1, %v6725_v19 }
 0x718   :  { %v6247_v22 = vpop.f32.mrf.mxu1 }
 0x719   :  { %v3131_v17 = vadd.f32 %v3130_v32, %v3100_v54  ;;  %v3070_v11 = vsub.f32 %v6247_v22, %v6726_v40  ;;  %v3103_v45 = vmul.f32 %v3071_v36, %v3071_v36  ;;  %v1411_v12 = vpop.trf.xlu0 }
 0x71a   :  { %1466 = vst [vmem:[#allocation7 + $0x70] sm:$0xff] %v1411_v12 }
 0x71b   :  { %v3102_v33 = vmul.f32 %v3070_v11, %v3070_v11  ;;  %v3132_v42 = vadd.f32 %v3131_v17, %v3101_v10 }
 0x71d   :  { %v3133_v30 = vadd.f32 %v3132_v42, %v3102_v33  ;;  %v1412_v48 = vpop.trf.xlu0 }
 0x71e   :  { %1468 = vst [vmem:[#allocation7 + $0x80] sm:$0xff] %v1412_v48 }
 0x71f   :  { %v3134_v29 = vadd.f32 %v3133_v30, %v3103_v45 }
 0x721   :  { %3135 = vadd.xlane.f32.xlu1 %v3134_v29  ;;  %v1413_v2 = vpop.trf.xlu0 }
 0x722   :  { %1470 = vst [vmem:[#allocation7 + $0x90] sm:$0xff] %v1413_v2 }
 0x725   :  { %v1414_v5 = vpop.trf.xlu0 }
 0x726   :  { %1472 = vst [vmem:[#allocation7 + $0xa0] sm:$0xff] %v1414_v5 }
 0x729   :  { %v1415_v26 = vpop.trf.xlu0 }
 0x72a   :  { %1474 = vst [vmem:[#allocation7 + $0xb0] sm:$0xff] %v1415_v26 }
 0x72d   :  { %v1416_v62 = vpop.trf.xlu0 }
 0x72e   :  { %1476 = vst [vmem:[#allocation7 + $0xc0] sm:$0xff] %v1416_v62 }
 0x731   :  { %v1417_v38 = vpop.trf.xlu0 }
 0x732   :  { %1478 = vst [vmem:[#allocation7 + $0xd0] sm:$0xff] %v1417_v38 }
 0x735   :  { %v1418_v43 = vpop.trf.xlu0 }
 0x736   :  { %1480 = vst [vmem:[#allocation7 + $0xe0] sm:$0xff] %v1418_v43 }
 0x739   :  { %v1419_v50 = vpop.trf.xlu0 }
 0x73a   :  { %1482 = vst [vmem:[#allocation7 + $0xf0] sm:$0xff] %v1419_v50 }
 0x73d   :  { %v2959_v55 = vpop.trf.xlu0 }
 0x73e   :  { %3008 = vst [vmem:[#allocation7 + $0x100] sm:$0xff] %v2959_v55 }
 0x741   :  { %v2960_v60 = vpop.trf.xlu0 }
 0x742   :  { %3010 = vst [vmem:[#allocation7 + $0x110] sm:$0xff] %v2960_v60 }
 0x745   :  { %v2961_v58 = vpop.trf.xlu0 }
 0x746   :  { %3012 = vst [vmem:[#allocation7 + $0x120] sm:$0xff] %v2961_v58 }
 0x749   :  { %v2962_v13 = vpop.trf.xlu0 }
 0x74a   :  { %3014 = vst [vmem:[#allocation7 + $0x130] sm:$0xff] %v2962_v13 }
 0x74d   :  { %v2963_v9 = vpop.trf.xlu0 }
 0x74e   :  { %3016 = vst [vmem:[#allocation7 + $0x140] sm:$0xff] %v2963_v9 }
 0x751   :  { %v2964_v46 = vpop.trf.xlu0 }
 0x752   :  { %3018 = vst [vmem:[#allocation7 + $0x150] sm:$0xff] %v2964_v46 }
 0x754   :  { %2975 = vxpose.xlu1.b32.start [1/16] %v6191_v20, 128 }
 0x755   :  { %v2965_v20 = vpop.trf.xlu0 }
 0x756   :  { %3020 = vst [vmem:[#allocation7 + $0x160] sm:$0xff] %v2965_v20 }
 0x758   :  { %2976 = vxpose.xlu1.b32.cont [2/16] %v6189_v25, 128 }
 0x759   :  { %v2966_v25 = vpop.trf.xlu0 }
 0x75a   :  { %3022 = vst [vmem:[#allocation7 + $0x170] sm:$0xff] %v2966_v25 }
 0x75c   :  { %2977 = vxpose.xlu1.b32.cont [3/16] %v6199_v34, 128 }
 0x75d   :  { %v2967_v34 = vpop.trf.xlu0 }
 0x75e   :  { %3024 = vst [vmem:[#allocation7 + $0x180] sm:$0xff] %v2967_v34 }
 0x760   :  { %2978 = vxpose.xlu1.b32.cont [4/16] %v6197_v21, 128 }
 0x761   :  { %v2968_v21 = vpop.trf.xlu0 }
 0x762   :  { %3026 = vst [vmem:[#allocation7 + $0x190] sm:$0xff] %v2968_v21 }
 0x764   :  { %2979 = vxpose.xlu1.b32.cont [5/16] %v6207_v49, 128 }
 0x765   :  { %v2969_v49 = vpop.trf.xlu0 }
 0x766   :  { %3028 = vst [vmem:[#allocation7 + $0x1a0] sm:$0xff] %v2969_v49 }
 0x768   :  { %2980 = vxpose.xlu1.b32.cont [6/16] %v6205_v47, 128 }
 0x769   :  { %v2970_v47 = vpop.trf.xlu0 }
 0x76a   :  { %3030 = vst [vmem:[#allocation7 + $0x1b0] sm:$0xff] %v2970_v47 }
 0x76c   :  { %2981 = vxpose.xlu1.b32.cont [7/16] %v6215_v24, 128 }
 0x76d   :  { %v2971_v24 = vpop.trf.xlu0 }
 0x76e   :  { %3032 = vst [vmem:[#allocation7 + $0x1c0] sm:$0xff] %v2971_v24 }
 0x770   :  { %2982 = vxpose.xlu1.b32.cont [8/16] %v6213_v15, 128 }
 0x771   :  { %v2972_v15 = vpop.trf.xlu0 }
 0x772   :  { %3034 = vst [vmem:[#allocation7 + $0x1d0] sm:$0xff] %v2972_v15 }
 0x774   :  { %2983 = vxpose.xlu1.b32.cont [9/16] %v6223_v0, 128 }
 0x775   :  { %v2973_v0 = vpop.trf.xlu0 }
 0x776   :  { %3036 = vst [vmem:[#allocation7 + $0x1e0] sm:$0xff] %v2973_v0 }
 0x778   :  { %2984 = vxpose.xlu1.b32.cont [10/16] %v6221_v16, 128 }
 0x779   :  { %v2974_v16 = vpop.trf.xlu0 }
 0x77a   :  { %3038 = vst [vmem:[#allocation7 + $0x1f0] sm:$0xff] %v2974_v16 }
 0x77c   :  { %2985 = vxpose.xlu1.b32.cont [11/16] %v6231_v44, 128 }
 0x780   :  { %2986 = vxpose.xlu1.b32.cont [12/16] %v6229_v23, 128 }
 0x784   :  { %2987 = vxpose.xlu1.b32.cont [13/16] %v6239_v18, 128 }
 0x788   :  { %2988 = vxpose.xlu1.b32.cont [14/16] %v6237_v39, 128 }
 0x78c   :  { %2989 = vxpose.xlu1.b32.cont [15/16] %v6247_v22, 128 }
 0x78d   :  { %4009 = shalt.err (!%p4006_p0)
}
 0x78e   :  { %3214 = dma.vmem_to_hbm [thread:$0]  %s3209_s13, 8192, %s6291_s4, [#allocation9], %s4092_s7, %s4092_s7, %s4093_s8  }
 0x78f   :  { %s4097_s17 = smov [#allocation10]  }
 0x790   :  { %s3221_s18 = sshll.u32 %s4097_s17, 4  ;;  %2990 = vxpose.xlu1.b32.end [16/16] %v6245_v1, 128  ;;  %s3222_s18 = int_to_ptr.vmem [resolvable:$true] %s3221_s18 }
 0x791   :  { %s4018_s19 = scalar_lea.vmem %s3222_s18, 128  ;;  %p4023_p2 = scmp.lt.s32.totalorder %s3222_s18, %s3222_s18 }
 0x792   :  { %p4019_p1 = scmp.ne.s32.totalorder %s3222_s18, %s4018_s19  ;;  %p4024_p3 = scmp.lt.s32.totalorder %s4018_s19, %s4018_s19 }
 0x794   :  { %p4025_p4 = por %p4024_p3, %p4023_p2 }
 0x796   :  { %p4026_p5 = pnand %p4025_p4, %p4019_p1 }
 0x798   :  { %4029 = shalt.err (!%p4026_p5)
}
 0x799   :  { %3224 = dma.vmem_to_hbm [thread:$0]  %s3222_s18, 128, %s6292_s5, [#allocation9]  }
 0x79a   :  { %s3926_s4 = spop %3925  ;;  %s4098_s5 = smov [#allocation11]  }
 0x79b   :  { %s3231_s22 = sshll.u32 %s4098_s5, 4  ;;  %s3232_s22 = int_to_ptr.vmem [resolvable:$true] %s3231_s22 }
 0x79c   :  { %s4038_s27 = scalar_lea.vmem %s3232_s22, 128  ;;  %p4043_p7 = scmp.lt.s32.totalorder %s3232_s22, %s3232_s22 }
 0x79d   :  { %p4039_p6 = scmp.ne.s32.totalorder %s3232_s22, %s4038_s27  ;;  %p4044_p8 = scmp.lt.s32.totalorder %s4038_s27, %s4038_s27 }
 0x79f   :  { %p4045_p9 = por %p4044_p8, %p4043_p7 }
 0x7a1   :  { %p4046_p10 = pnand %p4045_p9, %p4039_p6 }
 0x7aa   :  { %v3136_v23 = vpop.xlane.xlu1 %3135 }
 0x7ab   :  { %v3137_v44 = vrot.slane %v3136_v23, 4 }
 0x7ad   :  { %v3138_v35 = vadd.f32 %v3137_v44, %v3136_v23 }
 0x7af   :  { %v3139_v39 = vrot.slane %v3138_v35, 2 }
 0x7b1   :  { %v3140_v4 = vadd.f32 %v3139_v39, %v3138_v35 }
 0x7b3   :  { %v3141_v14 = vrot.slane %v3140_v4, 1 }
 0x7b5   :  { %v3142_v18 = vadd.f32 %v3141_v14, %v3140_v4 }
 0x7b7   :  { %3927 = vpush %v3142_v18 }
 0x7d0   :  { %v2991_v8 = vpop.trf.xlu1 }
 0x7d1   :  { %3009 = vst [vmem:[#allocation7 + $0x108] sm:$0xff] %v2991_v8 }
 0x7d4   :  { %v2992_v56 = vpop.trf.xlu1 }
 0x7d5   :  { %3011 = vst [vmem:[#allocation7 + $0x118] sm:$0xff] %v2992_v56 }
 0x7d8   :  { %v2993_v61 = vpop.trf.xlu1 }
 0x7d9   :  { %3013 = vst [vmem:[#allocation7 + $0x128] sm:$0xff] %v2993_v61 }
 0x7dc   :  { %v2994_v31 = vpop.trf.xlu1 }
 0x7dd   :  { %3015 = vst [vmem:[#allocation7 + $0x138] sm:$0xff] %v2994_v31 }
 0x7e0   :  { %v2995_v52 = vpop.trf.xlu1 }
 0x7e1   :  { %3017 = vst [vmem:[#allocation7 + $0x148] sm:$0xff] %v2995_v52 }
 0x7e4   :  { %v2996_v3 = vpop.trf.xlu1 }
 0x7e5   :  { %3019 = vst [vmem:[#allocation7 + $0x158] sm:$0xff] %v2996_v3 }
 0x7e8   :  { %v2997_v7 = vpop.trf.xlu1  ;;  %s3928_s23 = spop %3927 }
 0x7e9   :  { %3021 = vst [vmem:[#allocation7 + $0x168] sm:$0xff] %v2997_v7  ;;  %s3144_s26 = sadd.f32 %s3928_s23, %s3926_s4 }
 0x7eb   :  { %v3188_v51 = vstv %s3144_s26 }
 0x7ec   :  { %3190 = vst [vmem:[#allocation11] sm:$0xff] %v3188_v51  ;;  %v2998_v1 = vpop.trf.xlu1 }
 0x7ed   :  { %3023 = vst [vmem:[#allocation7 + $0x178] sm:$0xff] %v2998_v1 }
 0x7ee   :  { %4049 = shalt.err (!%p4046_p10)
}
 0x7ef   :  { %3234 = dma.vmem_to_hbm [thread:$0]  %s3232_s22, 128, %s6293_s6, [#allocation12]  }
 0x7f0   :  { %v2999_v54 = vpop.trf.xlu1  ;;  %s4099_s30 = smov [#allocation7]  }
 0x7f1   :  { %3025 = vst [vmem:[#allocation7 + $0x188] sm:$0xff] %v2999_v54  ;;  %s3196_s7 = sshll.u32 %s4099_s30, 4  ;;  %s3197_s7 = int_to_ptr.vmem [resolvable:$true] %s3196_s7 }
 0x7f2   :  { %s4058_s6 = scalar_lea.vmem %s3197_s7, 8192  ;;  %p4063_p12 = scmp.lt.s32.totalorder %s3197_s7, %s3197_s7 }
 0x7f3   :  { %p4059_p11 = scmp.ne.s32.totalorder %s3197_s7, %s4058_s6  ;;  %p4064_p13 = scmp.lt.s32.totalorder %s4058_s6, %s4058_s6 }
 0x7f4   :  { %v3000_v32 = vpop.trf.xlu1 }
 0x7f5   :  { %3027 = vst [vmem:[#allocation7 + $0x198] sm:$0xff] %v3000_v32  ;;  %p4065_p0 = por %p4064_p13, %p4063_p12 }
 0x7f7   :  { %p4066_p1 = pnand %p4065_p0, %p4059_p11 }
 0x7f8   :  { %v3001_v22 = vpop.trf.xlu1 }
 0x7f9   :  { %3029 = vst [vmem:[#allocation7 + $0x1a8] sm:$0xff] %v3001_v22 }
 0x7fc   :  { %v3002_v6 = vpop.trf.xlu1 }
 0x7fd   :  { %3031 = vst [vmem:[#allocation7 + $0x1b8] sm:$0xff] %v3002_v6 }
 0x800   :  { %v3003_v10 = vpop.trf.xlu1 }
 0x801   :  { %3033 = vst [vmem:[#allocation7 + $0x1c8] sm:$0xff] %v3003_v10 }
 0x804   :  { %v3004_v17 = vpop.trf.xlu1 }
 0x805   :  { %3035 = vst [vmem:[#allocation7 + $0x1d8] sm:$0xff] %v3004_v17 }
 0x808   :  { %v3005_v19 = vpop.trf.xlu1 }
 0x809   :  { %3037 = vst [vmem:[#allocation7 + $0x1e8] sm:$0xff] %v3005_v19 }
 0x80c   :  { %v3006_v36 = vpop.trf.xlu1 }
 0x80d   :  { %3039 = vst [vmem:[#allocation7 + $0x1f8] sm:$0xff] %v3006_v36 }
 0x80e   :  { %4069 = shalt.err (!%p4066_p1)
}
 0x80f   :  { %3202 = dma.vmem_to_hbm [thread:$0]  %s3197_s7, 8192, %s6290_s3, [#allocation4], %s4089_s24, %s4089_s24, %s4090_s25  }
 0x810   :  { %4082 = dma.done.wait [#allocation4], 8192  }
 0x811   :  { %4083 = vsyncadd [#allocation4], 4294959104 }
 0x812   :  { %4084 = dma.done.wait [#allocation9], 8320  }
 0x813   :  { %4085 = vsyncadd [#allocation9], 4294958976 }
 0x814   :  { %4086 = dma.done.wait [#allocation12], 128  }
 0x815   :  { %4087 = vsyncadd [#allocation12], 4294967168 }
 0x816   :  { %3247 = vsyncpa [#allocation3], 1 }
 0x817   :  { %3248 = vsyncpa [#allocation6], 1 }
 0x818   :  { %3249 = vsyncpa [#allocation4], 1 }
 0x819   :  { %3250 = vsyncpa [#allocation9], 1 }
 0x81a   :  { %3251 = vsyncpa [#allocation12], 1 }

</bundles_post_ra>
